<compile_context>
chip_gen: v7x
topology: tpu7x:2x2x1
jax: 0.10.0
libtpu: 0.0.40
codegen_flags: <defaults>
</compile_context>

<pallas_src>
import functools
import math

import numpy as np
import jax
import jax.numpy as jnp
from jax.experimental import pallas as pl
from jax.experimental.pallas import tpu as pltpu


# ----------------------------------------------------------------------------
# Config (mirrors the PyTorch module's __init__ arguments, small shapes)
# ----------------------------------------------------------------------------
class Config:
    encoder_layers = 2
    sequence_len = 8          # T
    encoder_input = 16        # F  (actual_d_feature = 2*F)
    model_dimension = 32      # D
    d_ff = 64
    n_heads = 2
    k = 16                    # d_k
    v = 16                    # d_v
    dropout = 0.1             # identity here (eval mode)
    mit_weight = 1.0
    ort_weight = 1.0
    use_gpu = False


LAYER_PARAM_NAMES = ("ln1_g", "ln1_b", "wqkv", "wo",
                     "ln2_g", "ln2_b", "w1", "b1", "w2", "b2")


# ----------------------------------------------------------------------------
# Fused forward kernel
# ----------------------------------------------------------------------------
def _encoder_layer(x, lp, diag, scale, H, d_k, d_v, want_attn):
    """One SAITS encoder layer (pre-LN MHA w/ diagonal mask + pre-LN FFN)."""
    lg1, lb1, wqkv, wo, lg2, lb2, w1, b1, w2, b2 = lp

    # pre-LN before attention (eps = 1e-5, PyTorch LayerNorm default)
    mu = jnp.mean(x, axis=-1, keepdims=True)
    var = jnp.mean((x - mu) ** 2, axis=-1, keepdims=True)
    xln = (x - mu) * jax.lax.rsqrt(var + 1e-5) * lg1 + lb1

    # packed QKV projection: one (D, H*(2*d_k+d_v)) matmul instead of three
    qkv = jnp.dot(xln, wqkv, preferred_element_type=jnp.float32)
    q = qkv[:, : H * d_k]
    k = qkv[:, H * d_k: 2 * H * d_k]
    v = qkv[:, 2 * H * d_k:]

    head_outs = []
    attn_sum = None
    for h in range(H):                                # static, tiny (H = 2)
        qh = q[:, h * d_k:(h + 1) * d_k]
        kh = k[:, h * d_k:(h + 1) * d_k]
        vh = v[:, h * d_v:(h + 1) * d_v]
        scores = jnp.dot(qh * scale, kh.T, preferred_element_type=jnp.float32)
        scores = jnp.where(diag, -1e9, scores)        # mask self position
        scores = scores - jnp.max(scores, axis=-1, keepdims=True)
        e = jnp.exp(scores)
        attn = e * pl.reciprocal(jnp.sum(e, axis=-1, keepdims=True), approx=True)
        head_outs.append(jnp.dot(attn, vh, preferred_element_type=jnp.float32))
        if want_attn:
            attn_sum = attn if attn_sum is None else attn_sum + attn

    ctx = jnp.concatenate(head_outs, axis=-1)         # (T, H*d_v)
    y = jnp.dot(ctx, wo, preferred_element_type=jnp.float32) + x   # residual

    # position-wise FFN, pre-LN (eps = 1e-6)
    mu2 = jnp.mean(y, axis=-1, keepdims=True)
    var2 = jnp.mean((y - mu2) ** 2, axis=-1, keepdims=True)
    yln = (y - mu2) * jax.lax.rsqrt(var2 + 1e-6) * lg2 + lb2
    h1 = jnp.maximum(
        jnp.dot(yln, w1, preferred_element_type=jnp.float32) + b1, 0.0)
    out = jnp.dot(h1, w2, preferred_element_type=jnp.float32) + b2 + y

    attn_mean = attn_sum * (1.0 / H) if want_attn else None
    return out, attn_mean


def _saits_fused_kernel(*refs, L, H, d_k, d_v, F, n_passes):
    it = iter(refs)
    x_ref, m_ref, pos_ref = next(it), next(it), next(it)
    e1w_ref, e1b_ref = next(it), next(it)
    blk1 = [next(it) for _ in LAYER_PARAM_NAMES]
    rdzw_ref, rdzb_ref = next(it), next(it)
    e2w_ref, e2b_ref = next(it), next(it)
    blk2 = [next(it) for _ in LAYER_PARAM_NAMES]
    rdbw_ref, rdbb_ref = next(it), next(it)
    rdgw_ref, rdgb_ref = next(it), next(it)
    wcw_ref, wcb_ref = next(it), next(it)
    dec_ref, stats_ref = next(it), next(it)

    x = x_ref[0]                 # (T, F)
    m = m_ref[0]                 # (T, F)
    pos = pos_ref[...]           # (T, D)
    T = x.shape[0]

    # diagonal mask: built once per grid step, reused by all layer applications
    row = jax.lax.broadcasted_iota(jnp.int32, (T, T), 0)
    col = jax.lax.broadcasted_iota(jnp.int32, (T, T), 1)
    diag = row == col
    scale = 1.0 / math.sqrt(d_k)

    def run_block(enc, blk, want_attn):
        attn_mean = None
        for l in range(L):
            lp = [r[l] for r in blk]            # layer-l weights, loaded once
            for p_i in range(n_passes):         # PyTorch nested loop: L passes
                last = want_attn and (l == L - 1) and (p_i == n_passes - 1)
                enc, am = _encoder_layer(enc, lp, diag, scale, H, d_k, d_v, last)
                if last:
                    attn_mean = am
        return enc, attn_mean

    # ----- first DMSA block (embedding via split weights: no concat needed) --
    e1w = e1w_ref[...]
    enc = (jnp.dot(x, e1w[:F], preferred_element_type=jnp.float32)
           + jnp.dot(m, e1w[F:], preferred_element_type=jnp.float32)
           + e1b_ref[...] + pos)
    enc, _ = run_block(enc, blk1, want_attn=False)
    x1_tilde = (jnp.dot(enc, rdzw_ref[...], preferred_element_type=jnp.float32)
                + rdzb_ref[...])
    xc = m * x + (1.0 - m) * x1_tilde

    # ----- second DMSA block -------------------------------------------------
    e2w = e2w_ref[...]
    enc = (jnp.dot(xc, e2w[:F], preferred_element_type=jnp.float32)
           + jnp.dot(m, e2w[F:], preferred_element_type=jnp.float32)
           + e2b_ref[...] + pos)
    enc, attn_mean = run_block(enc, blk2, want_attn=True)
    x2_tilde = (jnp.dot(
        jnp.maximum(jnp.dot(enc, rdbw_ref[...],
                            preferred_element_type=jnp.float32) + rdbb_ref[...],
                    0.0),
        rdgw_ref[...], preferred_element_type=jnp.float32) + rdgb_ref[...])

    # combining weights (split weight avoids cat([mask, attn_mean], dim=2))
    wcw = wcw_ref[...]
    cw = jax.nn.sigmoid(
        jnp.dot(m, wcw[:F], preferred_element_type=jnp.float32)
        + jnp.dot(attn_mean, wcw[F:], preferred_element_type=jnp.float32)
        + wcb_ref[...])
    x3_tilde = (1.0 - cw) * x2_tilde + cw * x1_tilde
    dec_ref[0] = m * x + (1.0 - m) * x3_tilde

    # masked-MAE partial sums for this batch element (reduced in the wrapper)
    s1 = jnp.sum(jnp.abs(x1_tilde - x) * m)
    s2 = jnp.sum(jnp.abs(x2_tilde - x) * m)
    s3 = jnp.sum(jnp.abs(x3_tilde - x) * m)
    sm = jnp.sum(m)
    lane = jax.lax.broadcasted_iota(jnp.int32, (1, 1, 4), 2)
    stats_ref[...] = (jnp.where(lane == 0, s1, 0.0)
                      + jnp.where(lane == 1, s2, 0.0)
                      + jnp.where(lane == 2, s3, 0.0)
                      + jnp.where(lane == 3, sm, 0.0))


# ----------------------------------------------------------------------------
# Wrapper
# ----------------------------------------------------------------------------
def _rep_spec(shape):
    n = len(shape)
    return pl.BlockSpec(shape, lambda b, _n=n: (0,) * _n)


def saits_forward(params, cfg, x_encoded, x_mark_encoded, mask, stage="train"):
    del x_mark_encoded, stage     # unused by the PyTorch forward as well
    B, T, F = x_encoded.shape
    L, H, d_k, d_v = cfg.encoder_layers, cfg.n_heads, cfg.k, cfg.v

    blk1 = [params["block1"][n] for n in LAYER_PARAM_NAMES]
    blk2 = [params["block2"][n] for n in LAYER_PARAM_NAMES]
    args = [x_encoded, mask, params["pos_table"],
            params["emb1_w"], params["emb1_b"], *blk1,
            params["rdz_w"], params["rdz_b"],
            params["emb2_w"], params["emb2_b"], *blk2,
            params["rdb_w"], params["rdb_b"],
            params["rdg_w"], params["rdg_b"],
            params["wc_w"], params["wc_b"]]

    in_specs = [pl.BlockSpec((1, T, F), lambda b: (b, 0, 0)),
                pl.BlockSpec((1, T, F), lambda b: (b, 0, 0))]
    in_specs += [_rep_spec(a.shape) for a in args[2:]]
    out_specs = [pl.BlockSpec((1, T, F), lambda b: (b, 0, 0)),
                 pl.BlockSpec((1, 1, 4), lambda b: (b, 0, 0))]
    out_shapes = (jax.ShapeDtypeStruct((B, T, F), jnp.float32),
                  jax.ShapeDtypeStruct((B, 1, 4), jnp.float32))

    kern = functools.partial(_saits_fused_kernel, L=L, H=H, d_k=d_k, d_v=d_v,
                             F=F, n_passes=L)
    dec_out, stats = pl.pallas_call(
        kern,
        out_shape=out_shapes,
        grid=(B,),
        in_specs=in_specs,
        out_specs=out_specs,
        compiler_params=pltpu.CompilerParams(dimension_semantics=("parallel",)),
    )(*args)

    totals = jnp.sum(stats[:, 0, :], axis=0)        # [S1, S2, S3, sum(mask)]
    denom = totals[3] + 1e-9
    mae1, mae2, mae3 = totals[0] / denom, totals[1] / denom, totals[2] / denom
    reconstruction_loss = (mae1 + mae2 + mae3) / 3.0
    # TODO(synk): original forward references undefined `self.MIT` / `inputs`
    # (X_holdout / indicating_mask); no holdout data exists here -> MAE = 0.
    imputation_mae = jnp.float32(0.0)

    return {"imputed_data": dec_out,
            "reconstruction_loss": reconstruction_loss,
            "imputation_loss": imputation_mae,
            "reconstruction_MAE": mae3,
            "imputation_MAE": imputation_mae}


# ----------------------------------------------------------------------------
# Parameter construction (deterministic synthetic init)
# ----------------------------------------------------------------------------
def sinusoid_pos_table(n_position, d_model):
    pos = np.arange(n_position)[:, None].astype(np.float64)
    div = np.power(10000.0, 2 * (np.arange(d_model) // 2) / d_model)
    table = pos / div
    table[:, 0::2] = np.sin(table[:, 0::2])
    table[:, 1::2] = np.cos(table[:, 1::2])
    return jnp.asarray(table, dtype=jnp.float32)


def make_linear_params(key, d_in, d_out, scale=0.05):
    w = scale * jax.random.normal(key, (d_in, d_out), jnp.float32)
    b = jnp.zeros((1, d_out), jnp.float32)
    return w, b


def make_encoder_layer_params(key, D, d_ff, H, d_k, d_v, scale=0.05):
    ks = jax.random.split(key, 6)
    wq = scale * jax.random.normal(ks[0], (D, H * d_k), jnp.float32)
    wk = scale * jax.random.normal(ks[1], (D, H * d_k), jnp.float32)
    wv = scale * jax.random.normal(ks[2], (D, H * d_v), jnp.float32)
    return dict(
        ln1_g=jnp.ones((1, D), jnp.float32), ln1_b=jnp.zeros((1, D), jnp.float32),
        wqkv=jnp.concatenate([wq, wk, wv], axis=1),           # packed QKV
        wo=scale * jax.random.normal(ks[3], (H * d_v, D), jnp.float32),
        ln2_g=jnp.ones((1, D), jnp.float32), ln2_b=jnp.zeros((1, D), jnp.float32),
        w1=scale * jax.random.normal(ks[4], (D, d_ff), jnp.float32),
        b1=jnp.zeros((1, d_ff), jnp.float32),
        w2=scale * jax.random.normal(ks[5], (d_ff, D), jnp.float32),
        b2=jnp.zeros((1, D), jnp.float32))


def stack_layers(layers):
    return {k: jnp.stack([lyr[k] for lyr in layers]) for k in layers[0]}


def make_params(cfg, key):
    F, D, T, L = (cfg.encoder_input, cfg.model_dimension,
                  cfg.sequence_len, cfg.encoder_layers)
    keys = jax.random.split(key, 8 + 2 * L)
    p = {}
    p["emb1_w"], p["emb1_b"] = make_linear_params(keys[0], 2 * F, D)
    p["emb2_w"], p["emb2_b"] = make_linear_params(keys[1], 2 * F, D)
    p["rdz_w"], p["rdz_b"] = make_linear_params(keys[2], D, F)
    p["rdb_w"], p["rdb_b"] = make_linear_params(keys[3], D, F)
    p["rdg_w"], p["rdg_b"] = make_linear_params(keys[4], F, F)
    p["wc_w"], p["wc_b"] = make_linear_params(keys[5], F + T, F)
    p["pos_table"] = sinusoid_pos_table(T, D)
    p["block1"] = stack_layers(
        [make_encoder_layer_params(keys[8 + i], D, cfg.d_ff, cfg.n_heads, cfg.k, cfg.v)
         for i in range(L)])
    p["block2"] = stack_layers(
        [make_encoder_layer_params(keys[8 + L + i], D, cfg.d_ff, cfg.n_heads, cfg.k, cfg.v)
         for i in range(L)])
    return p


# ----------------------------------------------------------------------------
# Pure-JAX reference (same math) for the end-to-end correctness check
# ----------------------------------------------------------------------------
def _ref_encoder_layer(x, lp, H, d_k, d_v):
    lg1, lb1, wqkv, wo, lg2, lb2, w1, b1, w2, b2 = (lp[n] for n in LAYER_PARAM_NAMES)
    B, T, D = x.shape
    mu = jnp.mean(x, -1, keepdims=True)
    var = jnp.mean((x - mu) ** 2, -1, keepdims=True)
    xln = (x - mu) / jnp.sqrt(var + 1e-5) * lg1[0] + lb1[0]
    qkv = xln @ wqkv
    q = qkv[..., :H * d_k].reshape(B, T, H, d_k).transpose(0, 2, 1, 3)
    k = qkv[..., H * d_k:2 * H * d_k].reshape(B, T, H, d_k).transpose(0, 2, 1, 3)
    v = qkv[..., 2 * H * d_k:].reshape(B, T, H, d_v).transpose(0, 2, 1, 3)
    sc = jnp.einsum("bhqd,bhkd->bhqk", q / math.sqrt(d_k), k)
    sc = jnp.where(jnp.eye(T, dtype=bool)[None, None], -1e9, sc)
    attn = jax.nn.softmax(sc, axis=-1)
    ctx = jnp.einsum("bhqk,bhkd->bhqd", attn, v).transpose(0, 2, 1, 3).reshape(B, T, H * d_v)
    y = ctx @ wo + x
    mu2 = jnp.mean(y, -1, keepdims=True)
    var2 = jnp.mean((y - mu2) ** 2, -1, keepdims=True)
    yln = (y - mu2) / jnp.sqrt(var2 + 1e-6) * lg2[0] + lb2[0]
    out = jax.nn.relu(yln @ w1 + b1[0]) @ w2 + b2[0] + y
    return out, attn


def _ref_masked_mae(pred, tgt, msk):
    return jnp.sum(jnp.abs(pred - tgt) * msk) / (jnp.sum(msk) + 1e-9)


def ref_forward(params, cfg, x, mask):
    L, H, d_k, d_v = cfg.encoder_layers, cfg.n_heads, cfg.k, cfg.v
    pos = params["pos_table"][None]

    def run_block(enc, blk):
        attn = None
        for l in range(L):
            lp = {k: v[l] for k, v in blk.items()}
            for _ in range(L):                         # PyTorch nested loop
                enc, attn = _ref_encoder_layer(enc, lp, H, d_k, d_v)
        return enc, attn

    enc = jnp.concatenate([x, mask], -1) @ params["emb1_w"] + params["emb1_b"] + pos
    enc, _ = run_block(enc, params["block1"])
    x1_t = enc @ params["rdz_w"] + params["rdz_b"]
    xc = mask * x + (1 - mask) * x1_t

    enc = jnp.concatenate([xc, mask], -1) @ params["emb2_w"] + params["emb2_b"] + pos
    enc, attn = run_block(enc, params["block2"])
    x2_t = (jax.nn.relu(enc @ params["rdb_w"] + params["rdb_b"])
            @ params["rdg_w"] + params["rdg_b"])

    attn_m = jnp.mean(attn, axis=1)                    # head mean -> (B, T, T)
    cw = jax.nn.sigmoid(jnp.concatenate([mask, attn_m], -1)
                        @ params["wc_w"] + params["wc_b"])
    x3_t = (1 - cw) * x2_t + cw * x1_t
    dec = mask * x + (1 - mask) * x3_t
    rec = (_ref_masked_mae(x1_t, x, mask) + _ref_masked_mae(x2_t, x, mask)
           + _ref_masked_mae(x3_t, x, mask)) / 3.0
    return dec, rec, _ref_masked_mae(x3_t, x, mask)


# ----------------------------------------------------------------------------
if __name__ == "__main__":
    cfg = Config()
    B, T, F = 2, cfg.sequence_len, cfg.encoder_input

    root = jax.random.PRNGKey(0)
    k_x, k_m, k_mark, k_p = jax.random.split(root, 4)
    x_encoded = jax.random.normal(k_x, (B, T, F), jnp.float32)
    x_mark_encoded = jax.random.normal(k_mark, (B, T, 4), jnp.float32)
    mask = jax.random.bernoulli(k_m, 0.7, (B, T, F)).astype(jnp.float32)
    params = make_params(cfg, k_p)

    fwd = jax.jit(lambda p, x, xm, m: saits_forward(p, cfg, x, xm, m))
    out = fwd(params, x_encoded, x_mark_encoded, mask)
    out = jax.tree_util.tree_map(jax.block_until_ready, out)

    # correctness: full forward vs pure-JAX reference (approx reciprocal in the
    # kernel's softmax -> small tolerance)
    ref_dec, ref_rec, ref_final = ref_forward(params, cfg, x_encoded, mask)
    assert out["imputed_data"].shape == (B, T, F)
    assert jnp.allclose(out["imputed_data"], ref_dec, atol=2e-3, rtol=2e-3)
    assert jnp.allclose(out["reconstruction_loss"], ref_rec, atol=2e-3, rtol=2e-3)
    assert jnp.allclose(out["reconstruction_MAE"], ref_final, atol=2e-3, rtol=2e-3)
    assert bool(jnp.isfinite(out["reconstruction_loss"]))

    print("KERNEL_OK")
</pallas_src>

<mosaic_0001>
module attributes {stable_mosaic.version = 11 : i64} {
  func.func @_saits_fused_kernel(%arg0: i32, %arg1: memref<1x8x16xf32, #tpu.memory_space<vmem>>, %arg2: memref<1x8x16xf32, #tpu.memory_space<vmem>>, %arg3: memref<8x32xf32, #tpu.memory_space<vmem>>, %arg4: memref<32x32xf32, #tpu.memory_space<vmem>>, %arg5: memref<1x32xf32, #tpu.memory_space<vmem>>, %arg6: memref<2x1x32xf32, #tpu.memory_space<vmem>>, %arg7: memref<2x1x32xf32, #tpu.memory_space<vmem>>, %arg8: memref<2x32x96xf32, #tpu.memory_space<vmem>>, %arg9: memref<2x32x32xf32, #tpu.memory_space<vmem>>, %arg10: memref<2x1x32xf32, #tpu.memory_space<vmem>>, %arg11: memref<2x1x32xf32, #tpu.memory_space<vmem>>, %arg12: memref<2x32x64xf32, #tpu.memory_space<vmem>>, %arg13: memref<2x1x64xf32, #tpu.memory_space<vmem>>, %arg14: memref<2x64x32xf32, #tpu.memory_space<vmem>>, %arg15: memref<2x1x32xf32, #tpu.memory_space<vmem>>, %arg16: memref<32x16xf32, #tpu.memory_space<vmem>>, %arg17: memref<1x16xf32, #tpu.memory_space<vmem>>, %arg18: memref<32x32xf32, #tpu.memory_space<vmem>>, %arg19: memref<1x32xf32, #tpu.memory_space<vmem>>, %arg20: memref<2x1x32xf32, #tpu.memory_space<vmem>>, %arg21: memref<2x1x32xf32, #tpu.memory_space<vmem>>, %arg22: memref<2x32x96xf32, #tpu.memory_space<vmem>>, %arg23: memref<2x32x32xf32, #tpu.memory_space<vmem>>, %arg24: memref<2x1x32xf32, #tpu.memory_space<vmem>>, %arg25: memref<2x1x32xf32, #tpu.memory_space<vmem>>, %arg26: memref<2x32x64xf32, #tpu.memory_space<vmem>>, %arg27: memref<2x1x64xf32, #tpu.memory_space<vmem>>, %arg28: memref<2x64x32xf32, #tpu.memory_space<vmem>>, %arg29: memref<2x1x32xf32, #tpu.memory_space<vmem>>, %arg30: memref<32x16xf32, #tpu.memory_space<vmem>>, %arg31: memref<1x16xf32, #tpu.memory_space<vmem>>, %arg32: memref<16x16xf32, #tpu.memory_space<vmem>>, %arg33: memref<1x16xf32, #tpu.memory_space<vmem>>, %arg34: memref<24x16xf32, #tpu.memory_space<vmem>>, %arg35: memref<1x16xf32, #tpu.memory_space<vmem>>, %arg36: memref<1x8x16xf32, #tpu.memory_space<vmem>>, %arg37: memref<1x1x4xf32, #tpu.memory_space<vmem>>) attributes {dimension_semantics = [#tpu.dimension_semantics<parallel>], iteration_bounds = array<i64: 2>, scalar_prefetch = 0 : i64, scratch_operands = 0 : i64, tpu.core_type = #tpu.core_type<tc>, window_params = [{transform_indices = @transform_0, window_bounds = array<i64: 1, 8, 16>}, {transform_indices = @transform_1, window_bounds = array<i64: 1, 8, 16>}, {pipeline_mode = #tpu.pipeline_mode<synchronous>, transform_indices = @transform_2, window_bounds = array<i64: 8, 32>}, {pipeline_mode = #tpu.pipeline_mode<synchronous>, transform_indices = @transform_3, window_bounds = array<i64: 32, 32>}, {pipeline_mode = #tpu.pipeline_mode<synchronous>, transform_indices = @transform_4, window_bounds = array<i64: 1, 32>}, {pipeline_mode = #tpu.pipeline_mode<synchronous>, transform_indices = @transform_5, window_bounds = array<i64: 2, 1, 32>}, {pipeline_mode = #tpu.pipeline_mode<synchronous>, transform_indices = @transform_6, window_bounds = array<i64: 2, 1, 32>}, {pipeline_mode = #tpu.pipeline_mode<synchronous>, transform_indices = @transform_7, window_bounds = array<i64: 2, 32, 96>}, {pipeline_mode = #tpu.pipeline_mode<synchronous>, transform_indices = @transform_8, window_bounds = array<i64: 2, 32, 32>}, {pipeline_mode = #tpu.pipeline_mode<synchronous>, transform_indices = @transform_9, window_bounds = array<i64: 2, 1, 32>}, {pipeline_mode = #tpu.pipeline_mode<synchronous>, transform_indices = @transform_10, window_bounds = array<i64: 2, 1, 32>}, {pipeline_mode = #tpu.pipeline_mode<synchronous>, transform_indices = @transform_11, window_bounds = array<i64: 2, 32, 64>}, {pipeline_mode = #tpu.pipeline_mode<synchronous>, transform_indices = @transform_12, window_bounds = array<i64: 2, 1, 64>}, {pipeline_mode = #tpu.pipeline_mode<synchronous>, transform_indices = @transform_13, window_bounds = array<i64: 2, 64, 32>}, {pipeline_mode = #tpu.pipeline_mode<synchronous>, transform_indices = @transform_14, window_bounds = array<i64: 2, 1, 32>}, {pipeline_mode = #tpu.pipeline_mode<synchronous>, transform_indices = @transform_15, window_bounds = array<i64: 32, 16>}, {pipeline_mode = #tpu.pipeline_mode<synchronous>, transform_indices = @transform_16, window_bounds = array<i64: 1, 16>}, {pipeline_mode = #tpu.pipeline_mode<synchronous>, transform_indices = @transform_17, window_bounds = array<i64: 32, 32>}, {pipeline_mode = #tpu.pipeline_mode<synchronous>, transform_indices = @transform_18, window_bounds = array<i64: 1, 32>}, {pipeline_mode = #tpu.pipeline_mode<synchronous>, transform_indices = @transform_19, window_bounds = array<i64: 2, 1, 32>}, {pipeline_mode = #tpu.pipeline_mode<synchronous>, transform_indices = @transform_20, window_bounds = array<i64: 2, 1, 32>}, {pipeline_mode = #tpu.pipeline_mode<synchronous>, transform_indices = @transform_21, window_bounds = array<i64: 2, 32, 96>}, {pipeline_mode = #tpu.pipeline_mode<synchronous>, transform_indices = @transform_22, window_bounds = array<i64: 2, 32, 32>}, {pipeline_mode = #tpu.pipeline_mode<synchronous>, transform_indices = @transform_23, window_bounds = array<i64: 2, 1, 32>}, {pipeline_mode = #tpu.pipeline_mode<synchronous>, transform_indices = @transform_24, window_bounds = array<i64: 2, 1, 32>}, {pipeline_mode = #tpu.pipeline_mode<synchronous>, transform_indices = @transform_25, window_bounds = array<i64: 2, 32, 64>}, {pipeline_mode = #tpu.pipeline_mode<synchronous>, transform_indices = @transform_26, window_bounds = array<i64: 2, 1, 64>}, {pipeline_mode = #tpu.pipeline_mode<synchronous>, transform_indices = @transform_27, window_bounds = array<i64: 2, 64, 32>}, {pipeline_mode = #tpu.pipeline_mode<synchronous>, transform_indices = @transform_28, window_bounds = array<i64: 2, 1, 32>}, {pipeline_mode = #tpu.pipeline_mode<synchronous>, transform_indices = @transform_29, window_bounds = array<i64: 32, 16>}, {pipeline_mode = #tpu.pipeline_mode<synchronous>, transform_indices = @transform_30, window_bounds = array<i64: 1, 16>}, {pipeline_mode = #tpu.pipeline_mode<synchronous>, transform_indices = @transform_31, window_bounds = array<i64: 16, 16>}, {pipeline_mode = #tpu.pipeline_mode<synchronous>, transform_indices = @transform_32, window_bounds = array<i64: 1, 16>}, {pipeline_mode = #tpu.pipeline_mode<synchronous>, transform_indices = @transform_33, window_bounds = array<i64: 24, 16>}, {pipeline_mode = #tpu.pipeline_mode<synchronous>, transform_indices = @transform_34, window_bounds = array<i64: 1, 16>}, {transform_indices = @transform_35, window_bounds = array<i64: 1, 8, 16>}, {transform_indices = @transform_36, window_bounds = array<i64: 1, 1, 4>}]} {
    %c0 = arith.constant 0 : index
    %c0_0 = arith.constant 0 : index
    %c0_1 = arith.constant 0 : index
    %0 = vector.load %arg1[%c0, %c0_0, %c0_1] : memref<1x8x16xf32, #tpu.memory_space<vmem>>, vector<1x8x16xf32>
    %1 = vector.shape_cast %0 : vector<1x8x16xf32> to vector<8x16xf32>
    %c0_2 = arith.constant 0 : index
    %c0_3 = arith.constant 0 : index
    %c0_4 = arith.constant 0 : index
    %2 = vector.load %arg2[%c0_2, %c0_3, %c0_4] : memref<1x8x16xf32, #tpu.memory_space<vmem>>, vector<1x8x16xf32>
    %3 = vector.shape_cast %2 : vector<1x8x16xf32> to vector<8x16xf32>
    %c0_5 = arith.constant 0 : index
    %c0_6 = arith.constant 0 : index
    %4 = vector.load %arg3[%c0_5, %c0_6] : memref<8x32xf32, #tpu.memory_space<vmem>>, vector<8x32xf32>
    %5 = tpu.iota {dimensions = array<i32: 0>} : vector<8x8xi32>
    %6 = tpu.iota {dimensions = array<i32: 1>} : vector<8x8xi32>
    %7 = arith.cmpi eq, %5, %6 : vector<8x8xi32>
    %c0_7 = arith.constant 0 : index
    %c0_8 = arith.constant 0 : index
    %8 = vector.load %arg4[%c0_7, %c0_8] : memref<32x32xf32, #tpu.memory_space<vmem>>, vector<32x32xf32>
    %9 = vector.extract_strided_slice %8 {offsets = [0, 0], sizes = [16, 32], strides = [1, 1]} : vector<32x32xf32> to vector<16x32xf32>
    %cst = arith.constant dense<0.000000e+00> : vector<8x32xf32>
    %10 = tpu.matmul %1, %9, %cst {dimension_numbers = #tpu.dot_dimension_numbers<[1], [0], [0], [1], [0, 0, 1, 1], [], []>} : vector<8x16xf32>, vector<16x32xf32>, vector<8x32xf32> -> vector<8x32xf32>
    %11 = vector.extract_strided_slice %8 {offsets = [16, 0], sizes = [16, 32], strides = [1, 1]} : vector<32x32xf32> to vector<16x32xf32>
    %cst_9 = arith.constant dense<0.000000e+00> : vector<8x32xf32>
    %12 = tpu.matmul %3, %11, %cst_9 {dimension_numbers = #tpu.dot_dimension_numbers<[1], [0], [0], [1], [0, 0, 1, 1], [], []>} : vector<8x16xf32>, vector<16x32xf32>, vector<8x32xf32> -> vector<8x32xf32>
    %13 = arith.addf %10, %12 : vector<8x32xf32>
    %c0_10 = arith.constant 0 : index
    %c0_11 = arith.constant 0 : index
    %14 = vector.load %arg5[%c0_10, %c0_11] : memref<1x32xf32, #tpu.memory_space<vmem>>, vector<1x32xf32>
    %15 = vector.broadcast %14 : vector<1x32xf32> to vector<8x32xf32>
    %16 = arith.addf %13, %15 : vector<8x32xf32>
    %17 = arith.addf %16, %4 : vector<8x32xf32>
    %c0_12 = arith.constant 0 : index
    %c0_13 = arith.constant 0 : index
    %c0_14 = arith.constant 0 : index
    %18 = vector.load %arg6[%c0_12, %c0_13, %c0_14] : memref<2x1x32xf32, #tpu.memory_space<vmem>>, vector<1x1x32xf32>
    %19 = vector.shape_cast %18 : vector<1x1x32xf32> to vector<1x32xf32>
    %c0_15 = arith.constant 0 : index
    %c0_16 = arith.constant 0 : index
    %c0_17 = arith.constant 0 : index
    %20 = vector.load %arg7[%c0_15, %c0_16, %c0_17] : memref<2x1x32xf32, #tpu.memory_space<vmem>>, vector<1x1x32xf32>
    %21 = vector.shape_cast %20 : vector<1x1x32xf32> to vector<1x32xf32>
    %c0_18 = arith.constant 0 : index
    %c0_19 = arith.constant 0 : index
    %c0_20 = arith.constant 0 : index
    %22 = vector.load %arg8[%c0_18, %c0_19, %c0_20] : memref<2x32x96xf32, #tpu.memory_space<vmem>>, vector<1x32x96xf32>
    %23 = vector.shape_cast %22 : vector<1x32x96xf32> to vector<32x96xf32>
    %c0_21 = arith.constant 0 : index
    %c0_22 = arith.constant 0 : index
    %c0_23 = arith.constant 0 : index
    %24 = vector.load %arg9[%c0_21, %c0_22, %c0_23] : memref<2x32x32xf32, #tpu.memory_space<vmem>>, vector<1x32x32xf32>
    %25 = vector.shape_cast %24 : vector<1x32x32xf32> to vector<32x32xf32>
    %c0_24 = arith.constant 0 : index
    %c0_25 = arith.constant 0 : index
    %c0_26 = arith.constant 0 : index
    %26 = vector.load %arg10[%c0_24, %c0_25, %c0_26] : memref<2x1x32xf32, #tpu.memory_space<vmem>>, vector<1x1x32xf32>
    %27 = vector.shape_cast %26 : vector<1x1x32xf32> to vector<1x32xf32>
    %c0_27 = arith.constant 0 : index
    %c0_28 = arith.constant 0 : index
    %c0_29 = arith.constant 0 : index
    %28 = vector.load %arg11[%c0_27, %c0_28, %c0_29] : memref<2x1x32xf32, #tpu.memory_space<vmem>>, vector<1x1x32xf32>
    %29 = vector.shape_cast %28 : vector<1x1x32xf32> to vector<1x32xf32>
    %c0_30 = arith.constant 0 : index
    %c0_31 = arith.constant 0 : index
    %c0_32 = arith.constant 0 : index
    %30 = vector.load %arg12[%c0_30, %c0_31, %c0_32] : memref<2x32x64xf32, #tpu.memory_space<vmem>>, vector<1x32x64xf32>
    %31 = vector.shape_cast %30 : vector<1x32x64xf32> to vector<32x64xf32>
    %c0_33 = arith.constant 0 : index
    %c0_34 = arith.constant 0 : index
    %c0_35 = arith.constant 0 : index
    %32 = vector.load %arg13[%c0_33, %c0_34, %c0_35] : memref<2x1x64xf32, #tpu.memory_space<vmem>>, vector<1x1x64xf32>
    %33 = vector.shape_cast %32 : vector<1x1x64xf32> to vector<1x64xf32>
    %c0_36 = arith.constant 0 : index
    %c0_37 = arith.constant 0 : index
    %c0_38 = arith.constant 0 : index
    %34 = vector.load %arg14[%c0_36, %c0_37, %c0_38] : memref<2x64x32xf32, #tpu.memory_space<vmem>>, vector<1x64x32xf32>
    %35 = vector.shape_cast %34 : vector<1x64x32xf32> to vector<64x32xf32>
    %c0_39 = arith.constant 0 : index
    %c0_40 = arith.constant 0 : index
    %c0_41 = arith.constant 0 : index
    %36 = vector.load %arg15[%c0_39, %c0_40, %c0_41] : memref<2x1x32xf32, #tpu.memory_space<vmem>>, vector<1x1x32xf32>
    %37 = vector.shape_cast %36 : vector<1x1x32xf32> to vector<1x32xf32>
    %cst_42 = arith.constant dense<0.000000e+00> : vector<8xf32>
    %38 = vector.multi_reduction <add>, %17, %cst_42 [1] : vector<8x32xf32> to vector<8xf32>
    %39 = vector.shape_cast %38 : vector<8xf32> to vector<8x1xf32>
    %cst_43 = arith.constant 3.200000e+01 : f32
    %40 = vector.broadcast %cst_43 : f32 to vector<8x1xf32>
    %41 = arith.divf %39, %40 : vector<8x1xf32>
    %42 = vector.broadcast %41 : vector<8x1xf32> to vector<8x32xf32>
    %43 = arith.subf %17, %42 : vector<8x32xf32>
    %44 = arith.mulf %43, %43 : vector<8x32xf32>
    %cst_44 = arith.constant dense<0.000000e+00> : vector<8xf32>
    %45 = vector.multi_reduction <add>, %44, %cst_44 [1] : vector<8x32xf32> to vector<8xf32>
    %46 = vector.shape_cast %45 : vector<8xf32> to vector<8x1xf32>
    %cst_45 = arith.constant 3.200000e+01 : f32
    %47 = vector.broadcast %cst_45 : f32 to vector<8x1xf32>
    %48 = arith.divf %46, %47 : vector<8x1xf32>
    %49 = vector.broadcast %41 : vector<8x1xf32> to vector<8x32xf32>
    %50 = arith.subf %17, %49 : vector<8x32xf32>
    %cst_46 = arith.constant 9.99999974E-6 : f32
    %51 = vector.broadcast %cst_46 : f32 to vector<8x1xf32>
    %52 = arith.addf %48, %51 : vector<8x1xf32>
    %53 = math.rsqrt %52 : vector<8x1xf32>
    %54 = vector.broadcast %53 : vector<8x1xf32> to vector<8x32xf32>
    %55 = arith.mulf %50, %54 : vector<8x32xf32>
    %56 = vector.broadcast %19 : vector<1x32xf32> to vector<8x32xf32>
    %57 = arith.mulf %55, %56 : vector<8x32xf32>
    %58 = vector.broadcast %21 : vector<1x32xf32> to vector<8x32xf32>
    %59 = arith.addf %57, %58 : vector<8x32xf32>
    %cst_47 = arith.constant dense<0.000000e+00> : vector<8x96xf32>
    %60 = tpu.matmul %59, %23, %cst_47 {dimension_numbers = #tpu.dot_dimension_numbers<[1], [0], [0], [1], [0, 0, 1, 1], [], []>} : vector<8x32xf32>, vector<32x96xf32>, vector<8x96xf32> -> vector<8x96xf32>
    %61 = vector.extract_strided_slice %60 {offsets = [0, 0], sizes = [8, 32], strides = [1, 1]} : vector<8x96xf32> to vector<8x32xf32>
    %62 = vector.extract_strided_slice %60 {offsets = [0, 32], sizes = [8, 32], strides = [1, 1]} : vector<8x96xf32> to vector<8x32xf32>
    %63 = vector.extract_strided_slice %60 {offsets = [0, 64], sizes = [8, 32], strides = [1, 1]} : vector<8x96xf32> to vector<8x32xf32>
    %64 = vector.extract_strided_slice %61 {offsets = [0, 0], sizes = [8, 16], strides = [1, 1]} : vector<8x32xf32> to vector<8x16xf32>
    %65 = vector.extract_strided_slice %62 {offsets = [0, 0], sizes = [8, 16], strides = [1, 1]} : vector<8x32xf32> to vector<8x16xf32>
    %66 = vector.extract_strided_slice %63 {offsets = [0, 0], sizes = [8, 16], strides = [1, 1]} : vector<8x32xf32> to vector<8x16xf32>
    %cst_48 = arith.constant 2.500000e-01 : f32
    %67 = vector.broadcast %cst_48 : f32 to vector<8x16xf32>
    %68 = arith.mulf %64, %67 : vector<8x16xf32>
    %69 = tpu.transpose %65, [1, 0] : vector<8x16xf32> -> vector<16x8xf32>
    %cst_49 = arith.constant dense<0.000000e+00> : vector<8x8xf32>
    %70 = tpu.matmul %68, %69, %cst_49 {dimension_numbers = #tpu.dot_dimension_numbers<[1], [0], [0], [1], [0, 0, 1, 1], [], []>} : vector<8x16xf32>, vector<16x8xf32>, vector<8x8xf32> -> vector<8x8xf32>
    %cst_50 = arith.constant -1.000000e+09 : f32
    %71 = vector.broadcast %cst_50 : f32 to vector<8x8xf32>
    %72 = arith.select %7, %71, %70 : vector<8x8xi1>, vector<8x8xf32>
    %cst_51 = arith.constant dense<0xFF800000> : vector<8xf32>
    %73 = vector.multi_reduction <maximumf>, %72, %cst_51 [1] : vector<8x8xf32> to vector<8xf32>
    %74 = vector.shape_cast %73 : vector<8xf32> to vector<8x1xf32>
    %75 = vector.broadcast %74 : vector<8x1xf32> to vector<8x8xf32>
    %76 = arith.subf %72, %75 : vector<8x8xf32>
    %77 = math.exp %76 : vector<8x8xf32>
    %cst_52 = arith.constant dense<0.000000e+00> : vector<8xf32>
    %78 = vector.multi_reduction <add>, %77, %cst_52 [1] : vector<8x8xf32> to vector<8xf32>
    %79 = vector.shape_cast %78 : vector<8xf32> to vector<8x1xf32>
    %80 = tpu.reciprocal %79 {approx = true} : vector<8x1xf32> -> vector<8x1xf32>
    %81 = vector.broadcast %80 : vector<8x1xf32> to vector<8x8xf32>
    %82 = arith.mulf %77, %81 : vector<8x8xf32>
    %cst_53 = arith.constant dense<0.000000e+00> : vector<8x16xf32>
    %83 = tpu.matmul %82, %66, %cst_53 {dimension_numbers = #tpu.dot_dimension_numbers<[1], [0], [0], [1], [0, 0, 1, 1], [], []>} : vector<8x8xf32>, vector<8x16xf32>, vector<8x16xf32> -> vector<8x16xf32>
    %84 = vector.extract_strided_slice %61 {offsets = [0, 16], sizes = [8, 16], strides = [1, 1]} : vector<8x32xf32> to vector<8x16xf32>
    %85 = vector.extract_strided_slice %62 {offsets = [0, 16], sizes = [8, 16], strides = [1, 1]} : vector<8x32xf32> to vector<8x16xf32>
    %86 = vector.extract_strided_slice %63 {offsets = [0, 16], sizes = [8, 16], strides = [1, 1]} : vector<8x32xf32> to vector<8x16xf32>
    %cst_54 = arith.constant 2.500000e-01 : f32
    %87 = vector.broadcast %cst_54 : f32 to vector<8x16xf32>
    %88 = arith.mulf %84, %87 : vector<8x16xf32>
    %89 = tpu.transpose %85, [1, 0] : vector<8x16xf32> -> vector<16x8xf32>
    %cst_55 = arith.constant dense<0.000000e+00> : vector<8x8xf32>
    %90 = tpu.matmul %88, %89, %cst_55 {dimension_numbers = #tpu.dot_dimension_numbers<[1], [0], [0], [1], [0, 0, 1, 1], [], []>} : vector<8x16xf32>, vector<16x8xf32>, vector<8x8xf32> -> vector<8x8xf32>
    %cst_56 = arith.constant -1.000000e+09 : f32
    %91 = vector.broadcast %cst_56 : f32 to vector<8x8xf32>
    %92 = arith.select %7, %91, %90 : vector<8x8xi1>, vector<8x8xf32>
    %cst_57 = arith.constant dense<0xFF800000> : vector<8xf32>
    %93 = vector.multi_reduction <maximumf>, %92, %cst_57 [1] : vector<8x8xf32> to vector<8xf32>
    %94 = vector.shape_cast %93 : vector<8xf32> to vector<8x1xf32>
    %95 = vector.broadcast %94 : vector<8x1xf32> to vector<8x8xf32>
    %96 = arith.subf %92, %95 : vector<8x8xf32>
    %97 = math.exp %96 : vector<8x8xf32>
    %cst_58 = arith.constant dense<0.000000e+00> : vector<8xf32>
    %98 = vector.multi_reduction <add>, %97, %cst_58 [1] : vector<8x8xf32> to vector<8xf32>
    %99 = vector.shape_cast %98 : vector<8xf32> to vector<8x1xf32>
    %100 = tpu.reciprocal %99 {approx = true} : vector<8x1xf32> -> vector<8x1xf32>
    %101 = vector.broadcast %100 : vector<8x1xf32> to vector<8x8xf32>
    %102 = arith.mulf %97, %101 : vector<8x8xf32>
    %cst_59 = arith.constant dense<0.000000e+00> : vector<8x16xf32>
    %103 = tpu.matmul %102, %86, %cst_59 {dimension_numbers = #tpu.dot_dimension_numbers<[1], [0], [0], [1], [0, 0, 1, 1], [], []>} : vector<8x8xf32>, vector<8x16xf32>, vector<8x16xf32> -> vector<8x16xf32>
    %104 = tpu.concatenate %83, %103 in 1 : vector<8x16xf32>, vector<8x16xf32> -> vector<8x32xf32>
    %cst_60 = arith.constant dense<0.000000e+00> : vector<8x32xf32>
    %105 = tpu.matmul %104, %25, %cst_60 {dimension_numbers = #tpu.dot_dimension_numbers<[1], [0], [0], [1], [0, 0, 1, 1], [], []>} : vector<8x32xf32>, vector<32x32xf32>, vector<8x32xf32> -> vector<8x32xf32>
    %106 = arith.addf %105, %17 : vector<8x32xf32>
    %cst_61 = arith.constant dense<0.000000e+00> : vector<8xf32>
    %107 = vector.multi_reduction <add>, %106, %cst_61 [1] : vector<8x32xf32> to vector<8xf32>
    %108 = vector.shape_cast %107 : vector<8xf32> to vector<8x1xf32>
    %cst_62 = arith.constant 3.200000e+01 : f32
    %109 = vector.broadcast %cst_62 : f32 to vector<8x1xf32>
    %110 = arith.divf %108, %109 : vector<8x1xf32>
    %111 = vector.broadcast %110 : vector<8x1xf32> to vector<8x32xf32>
    %112 = arith.subf %106, %111 : vector<8x32xf32>
    %113 = arith.mulf %112, %112 : vector<8x32xf32>
    %cst_63 = arith.constant dense<0.000000e+00> : vector<8xf32>
    %114 = vector.multi_reduction <add>, %113, %cst_63 [1] : vector<8x32xf32> to vector<8xf32>
    %115 = vector.shape_cast %114 : vector<8xf32> to vector<8x1xf32>
    %cst_64 = arith.constant 3.200000e+01 : f32
    %116 = vector.broadcast %cst_64 : f32 to vector<8x1xf32>
    %117 = arith.divf %115, %116 : vector<8x1xf32>
    %118 = vector.broadcast %110 : vector<8x1xf32> to vector<8x32xf32>
    %119 = arith.subf %106, %118 : vector<8x32xf32>
    %cst_65 = arith.constant 9.99999997E-7 : f32
    %120 = vector.broadcast %cst_65 : f32 to vector<8x1xf32>
    %121 = arith.addf %117, %120 : vector<8x1xf32>
    %122 = math.rsqrt %121 : vector<8x1xf32>
    %123 = vector.broadcast %122 : vector<8x1xf32> to vector<8x32xf32>
    %124 = arith.mulf %119, %123 : vector<8x32xf32>
    %125 = vector.broadcast %27 : vector<1x32xf32> to vector<8x32xf32>
    %126 = arith.mulf %124, %125 : vector<8x32xf32>
    %127 = vector.broadcast %29 : vector<1x32xf32> to vector<8x32xf32>
    %128 = arith.addf %126, %127 : vector<8x32xf32>
    %cst_66 = arith.constant dense<0.000000e+00> : vector<8x64xf32>
    %129 = tpu.matmul %128, %31, %cst_66 {dimension_numbers = #tpu.dot_dimension_numbers<[1], [0], [0], [1], [0, 0, 1, 1], [], []>} : vector<8x32xf32>, vector<32x64xf32>, vector<8x64xf32> -> vector<8x64xf32>
    %130 = vector.broadcast %33 : vector<1x64xf32> to vector<8x64xf32>
    %131 = arith.addf %129, %130 : vector<8x64xf32>
    %cst_67 = arith.constant 0.000000e+00 : f32
    %132 = vector.broadcast %cst_67 : f32 to vector<8x64xf32>
    %133 = arith.maximumf %131, %132 : vector<8x64xf32>
    %cst_68 = arith.constant dense<0.000000e+00> : vector<8x32xf32>
    %134 = tpu.matmul %133, %35, %cst_68 {dimension_numbers = #tpu.dot_dimension_numbers<[1], [0], [0], [1], [0, 0, 1, 1], [], []>} : vector<8x64xf32>, vector<64x32xf32>, vector<8x32xf32> -> vector<8x32xf32>
    %135 = vector.broadcast %37 : vector<1x32xf32> to vector<8x32xf32>
    %136 = arith.addf %134, %135 : vector<8x32xf32>
    %137 = arith.addf %136, %106 : vector<8x32xf32>
    %cst_69 = arith.constant dense<0.000000e+00> : vector<8xf32>
    %138 = vector.multi_reduction <add>, %137, %cst_69 [1] : vector<8x32xf32> to vector<8xf32>
    %139 = vector.shape_cast %138 : vector<8xf32> to vector<8x1xf32>
    %cst_70 = arith.constant 3.200000e+01 : f32
    %140 = vector.broadcast %cst_70 : f32 to vector<8x1xf32>
    %141 = arith.divf %139, %140 : vector<8x1xf32>
    %142 = vector.broadcast %141 : vector<8x1xf32> to vector<8x32xf32>
    %143 = arith.subf %137, %142 : vector<8x32xf32>
    %144 = arith.mulf %143, %143 : vector<8x32xf32>
    %cst_71 = arith.constant dense<0.000000e+00> : vector<8xf32>
    %145 = vector.multi_reduction <add>, %144, %cst_71 [1] : vector<8x32xf32> to vector<8xf32>
    %146 = vector.shape_cast %145 : vector<8xf32> to vector<8x1xf32>
    %cst_72 = arith.constant 3.200000e+01 : f32
    %147 = vector.broadcast %cst_72 : f32 to vector<8x1xf32>
    %148 = arith.divf %146, %147 : vector<8x1xf32>
    %149 = vector.broadcast %141 : vector<8x1xf32> to vector<8x32xf32>
    %150 = arith.subf %137, %149 : vector<8x32xf32>
    %cst_73 = arith.constant 9.99999974E-6 : f32
    %151 = vector.broadcast %cst_73 : f32 to vector<8x1xf32>
    %152 = arith.addf %148, %151 : vector<8x1xf32>
    %153 = math.rsqrt %152 : vector<8x1xf32>
    %154 = vector.broadcast %153 : vector<8x1xf32> to vector<8x32xf32>
    %155 = arith.mulf %150, %154 : vector<8x32xf32>
    %156 = vector.broadcast %19 : vector<1x32xf32> to vector<8x32xf32>
    %157 = arith.mulf %155, %156 : vector<8x32xf32>
    %158 = vector.broadcast %21 : vector<1x32xf32> to vector<8x32xf32>
    %159 = arith.addf %157, %158 : vector<8x32xf32>
    %cst_74 = arith.constant dense<0.000000e+00> : vector<8x96xf32>
    %160 = tpu.matmul %159, %23, %cst_74 {dimension_numbers = #tpu.dot_dimension_numbers<[1], [0], [0], [1], [0, 0, 1, 1], [], []>} : vector<8x32xf32>, vector<32x96xf32>, vector<8x96xf32> -> vector<8x96xf32>
    %161 = vector.extract_strided_slice %160 {offsets = [0, 0], sizes = [8, 32], strides = [1, 1]} : vector<8x96xf32> to vector<8x32xf32>
    %162 = vector.extract_strided_slice %160 {offsets = [0, 32], sizes = [8, 32], strides = [1, 1]} : vector<8x96xf32> to vector<8x32xf32>
    %163 = vector.extract_strided_slice %160 {offsets = [0, 64], sizes = [8, 32], strides = [1, 1]} : vector<8x96xf32> to vector<8x32xf32>
    %164 = vector.extract_strided_slice %161 {offsets = [0, 0], sizes = [8, 16], strides = [1, 1]} : vector<8x32xf32> to vector<8x16xf32>
    %165 = vector.extract_strided_slice %162 {offsets = [0, 0], sizes = [8, 16], strides = [1, 1]} : vector<8x32xf32> to vector<8x16xf32>
    %166 = vector.extract_strided_slice %163 {offsets = [0, 0], sizes = [8, 16], strides = [1, 1]} : vector<8x32xf32> to vector<8x16xf32>
    %cst_75 = arith.constant 2.500000e-01 : f32
    %167 = vector.broadcast %cst_75 : f32 to vector<8x16xf32>
    %168 = arith.mulf %164, %167 : vector<8x16xf32>
    %169 = tpu.transpose %165, [1, 0] : vector<8x16xf32> -> vector<16x8xf32>
    %cst_76 = arith.constant dense<0.000000e+00> : vector<8x8xf32>
    %170 = tpu.matmul %168, %169, %cst_76 {dimension_numbers = #tpu.dot_dimension_numbers<[1], [0], [0], [1], [0, 0, 1, 1], [], []>} : vector<8x16xf32>, vector<16x8xf32>, vector<8x8xf32> -> vector<8x8xf32>
    %cst_77 = arith.constant -1.000000e+09 : f32
    %171 = vector.broadcast %cst_77 : f32 to vector<8x8xf32>
    %172 = arith.select %7, %171, %170 : vector<8x8xi1>, vector<8x8xf32>
    %cst_78 = arith.constant dense<0xFF800000> : vector<8xf32>
    %173 = vector.multi_reduction <maximumf>, %172, %cst_78 [1] : vector<8x8xf32> to vector<8xf32>
    %174 = vector.shape_cast %173 : vector<8xf32> to vector<8x1xf32>
    %175 = vector.broadcast %174 : vector<8x1xf32> to vector<8x8xf32>
    %176 = arith.subf %172, %175 : vector<8x8xf32>
    %177 = math.exp %176 : vector<8x8xf32>
    %cst_79 = arith.constant dense<0.000000e+00> : vector<8xf32>
    %178 = vector.multi_reduction <add>, %177, %cst_79 [1] : vector<8x8xf32> to vector<8xf32>
    %179 = vector.shape_cast %178 : vector<8xf32> to vector<8x1xf32>
    %180 = tpu.reciprocal %179 {approx = true} : vector<8x1xf32> -> vector<8x1xf32>
    %181 = vector.broadcast %180 : vector<8x1xf32> to vector<8x8xf32>
    %182 = arith.mulf %177, %181 : vector<8x8xf32>
    %cst_80 = arith.constant dense<0.000000e+00> : vector<8x16xf32>
    %183 = tpu.matmul %182, %166, %cst_80 {dimension_numbers = #tpu.dot_dimension_numbers<[1], [0], [0], [1], [0, 0, 1, 1], [], []>} : vector<8x8xf32>, vector<8x16xf32>, vector<8x16xf32> -> vector<8x16xf32>
    %184 = vector.extract_strided_slice %161 {offsets = [0, 16], sizes = [8, 16], strides = [1, 1]} : vector<8x32xf32> to vector<8x16xf32>
    %185 = vector.extract_strided_slice %162 {offsets = [0, 16], sizes = [8, 16], strides = [1, 1]} : vector<8x32xf32> to vector<8x16xf32>
    %186 = vector.extract_strided_slice %163 {offsets = [0, 16], sizes = [8, 16], strides = [1, 1]} : vector<8x32xf32> to vector<8x16xf32>
    %cst_81 = arith.constant 2.500000e-01 : f32
    %187 = vector.broadcast %cst_81 : f32 to vector<8x16xf32>
    %188 = arith.mulf %184, %187 : vector<8x16xf32>
    %189 = tpu.transpose %185, [1, 0] : vector<8x16xf32> -> vector<16x8xf32>
    %cst_82 = arith.constant dense<0.000000e+00> : vector<8x8xf32>
    %190 = tpu.matmul %188, %189, %cst_82 {dimension_numbers = #tpu.dot_dimension_numbers<[1], [0], [0], [1], [0, 0, 1, 1], [], []>} : vector<8x16xf32>, vector<16x8xf32>, vector<8x8xf32> -> vector<8x8xf32>
    %cst_83 = arith.constant -1.000000e+09 : f32
    %191 = vector.broadcast %cst_83 : f32 to vector<8x8xf32>
    %192 = arith.select %7, %191, %190 : vector<8x8xi1>, vector<8x8xf32>
    %cst_84 = arith.constant dense<0xFF800000> : vector<8xf32>
    %193 = vector.multi_reduction <maximumf>, %192, %cst_84 [1] : vector<8x8xf32> to vector<8xf32>
    %194 = vector.shape_cast %193 : vector<8xf32> to vector<8x1xf32>
    %195 = vector.broadcast %194 : vector<8x1xf32> to vector<8x8xf32>
    %196 = arith.subf %192, %195 : vector<8x8xf32>
    %197 = math.exp %196 : vector<8x8xf32>
    %cst_85 = arith.constant dense<0.000000e+00> : vector<8xf32>
    %198 = vector.multi_reduction <add>, %197, %cst_85 [1] : vector<8x8xf32> to vector<8xf32>
    %199 = vector.shape_cast %198 : vector<8xf32> to vector<8x1xf32>
    %200 = tpu.reciprocal %199 {approx = true} : vector<8x1xf32> -> vector<8x1xf32>
    %201 = vector.broadcast %200 : vector<8x1xf32> to vector<8x8xf32>
    %202 = arith.mulf %197, %201 : vector<8x8xf32>
    %cst_86 = arith.constant dense<0.000000e+00> : vector<8x16xf32>
    %203 = tpu.matmul %202, %186, %cst_86 {dimension_numbers = #tpu.dot_dimension_numbers<[1], [0], [0], [1], [0, 0, 1, 1], [], []>} : vector<8x8xf32>, vector<8x16xf32>, vector<8x16xf32> -> vector<8x16xf32>
    %204 = tpu.concatenate %183, %203 in 1 : vector<8x16xf32>, vector<8x16xf32> -> vector<8x32xf32>
    %cst_87 = arith.constant dense<0.000000e+00> : vector<8x32xf32>
    %205 = tpu.matmul %204, %25, %cst_87 {dimension_numbers = #tpu.dot_dimension_numbers<[1], [0], [0], [1], [0, 0, 1, 1], [], []>} : vector<8x32xf32>, vector<32x32xf32>, vector<8x32xf32> -> vector<8x32xf32>
    %206 = arith.addf %205, %137 : vector<8x32xf32>
    %cst_88 = arith.constant dense<0.000000e+00> : vector<8xf32>
    %207 = vector.multi_reduction <add>, %206, %cst_88 [1] : vector<8x32xf32> to vector<8xf32>
    %208 = vector.shape_cast %207 : vector<8xf32> to vector<8x1xf32>
    %cst_89 = arith.constant 3.200000e+01 : f32
    %209 = vector.broadcast %cst_89 : f32 to vector<8x1xf32>
    %210 = arith.divf %208, %209 : vector<8x1xf32>
    %211 = vector.broadcast %210 : vector<8x1xf32> to vector<8x32xf32>
    %212 = arith.subf %206, %211 : vector<8x32xf32>
    %213 = arith.mulf %212, %212 : vector<8x32xf32>
    %cst_90 = arith.constant dense<0.000000e+00> : vector<8xf32>
    %214 = vector.multi_reduction <add>, %213, %cst_90 [1] : vector<8x32xf32> to vector<8xf32>
    %215 = vector.shape_cast %214 : vector<8xf32> to vector<8x1xf32>
    %cst_91 = arith.constant 3.200000e+01 : f32
    %216 = vector.broadcast %cst_91 : f32 to vector<8x1xf32>
    %217 = arith.divf %215, %216 : vector<8x1xf32>
    %218 = vector.broadcast %210 : vector<8x1xf32> to vector<8x32xf32>
    %219 = arith.subf %206, %218 : vector<8x32xf32>
    %cst_92 = arith.constant 9.99999997E-7 : f32
    %220 = vector.broadcast %cst_92 : f32 to vector<8x1xf32>
    %221 = arith.addf %217, %220 : vector<8x1xf32>
    %222 = math.rsqrt %221 : vector<8x1xf32>
    %223 = vector.broadcast %222 : vector<8x1xf32> to vector<8x32xf32>
    %224 = arith.mulf %219, %223 : vector<8x32xf32>
    %225 = vector.broadcast %27 : vector<1x32xf32> to vector<8x32xf32>
    %226 = arith.mulf %224, %225 : vector<8x32xf32>
    %227 = vector.broadcast %29 : vector<1x32xf32> to vector<8x32xf32>
    %228 = arith.addf %226, %227 : vector<8x32xf32>
    %cst_93 = arith.constant dense<0.000000e+00> : vector<8x64xf32>
    %229 = tpu.matmul %228, %31, %cst_93 {dimension_numbers = #tpu.dot_dimension_numbers<[1], [0], [0], [1], [0, 0, 1, 1], [], []>} : vector<8x32xf32>, vector<32x64xf32>, vector<8x64xf32> -> vector<8x64xf32>
    %230 = vector.broadcast %33 : vector<1x64xf32> to vector<8x64xf32>
    %231 = arith.addf %229, %230 : vector<8x64xf32>
    %cst_94 = arith.constant 0.000000e+00 : f32
    %232 = vector.broadcast %cst_94 : f32 to vector<8x64xf32>
    %233 = arith.maximumf %231, %232 : vector<8x64xf32>
    %cst_95 = arith.constant dense<0.000000e+00> : vector<8x32xf32>
    %234 = tpu.matmul %233, %35, %cst_95 {dimension_numbers = #tpu.dot_dimension_numbers<[1], [0], [0], [1], [0, 0, 1, 1], [], []>} : vector<8x64xf32>, vector<64x32xf32>, vector<8x32xf32> -> vector<8x32xf32>
    %235 = vector.broadcast %37 : vector<1x32xf32> to vector<8x32xf32>
    %236 = arith.addf %234, %235 : vector<8x32xf32>
    %237 = arith.addf %236, %206 : vector<8x32xf32>
    %c1 = arith.constant 1 : index
    %c0_96 = arith.constant 0 : index
    %c0_97 = arith.constant 0 : index
    %238 = vector.load %arg6[%c1, %c0_96, %c0_97] : memref<2x1x32xf32, #tpu.memory_space<vmem>>, vector<1x1x32xf32>
    %239 = vector.shape_cast %238 : vector<1x1x32xf32> to vector<1x32xf32>
    %c1_98 = arith.constant 1 : index
    %c0_99 = arith.constant 0 : index
    %c0_100 = arith.constant 0 : index
    %240 = vector.load %arg7[%c1_98, %c0_99, %c0_100] : memref<2x1x32xf32, #tpu.memory_space<vmem>>, vector<1x1x32xf32>
    %241 = vector.shape_cast %240 : vector<1x1x32xf32> to vector<1x32xf32>
    %c1_101 = arith.constant 1 : index
    %c0_102 = arith.constant 0 : index
    %c0_103 = arith.constant 0 : index
    %242 = vector.load %arg8[%c1_101, %c0_102, %c0_103] : memref<2x32x96xf32, #tpu.memory_space<vmem>>, vector<1x32x96xf32>
    %243 = vector.shape_cast %242 : vector<1x32x96xf32> to vector<32x96xf32>
    %c1_104 = arith.constant 1 : index
    %c0_105 = arith.constant 0 : index
    %c0_106 = arith.constant 0 : index
    %244 = vector.load %arg9[%c1_104, %c0_105, %c0_106] : memref<2x32x32xf32, #tpu.memory_space<vmem>>, vector<1x32x32xf32>
    %245 = vector.shape_cast %244 : vector<1x32x32xf32> to vector<32x32xf32>
    %c1_107 = arith.constant 1 : index
    %c0_108 = arith.constant 0 : index
    %c0_109 = arith.constant 0 : index
    %246 = vector.load %arg10[%c1_107, %c0_108, %c0_109] : memref<2x1x32xf32, #tpu.memory_space<vmem>>, vector<1x1x32xf32>
    %247 = vector.shape_cast %246 : vector<1x1x32xf32> to vector<1x32xf32>
    %c1_110 = arith.constant 1 : index
    %c0_111 = arith.constant 0 : index
    %c0_112 = arith.constant 0 : index
    %248 = vector.load %arg11[%c1_110, %c0_111, %c0_112] : memref<2x1x32xf32, #tpu.memory_space<vmem>>, vector<1x1x32xf32>
    %249 = vector.shape_cast %248 : vector<1x1x32xf32> to vector<1x32xf32>
    %c1_113 = arith.constant 1 : index
    %c0_114 = arith.constant 0 : index
    %c0_115 = arith.constant 0 : index
    %250 = vector.load %arg12[%c1_113, %c0_114, %c0_115] : memref<2x32x64xf32, #tpu.memory_space<vmem>>, vector<1x32x64xf32>
    %251 = vector.shape_cast %250 : vector<1x32x64xf32> to vector<32x64xf32>
    %c1_116 = arith.constant 1 : index
    %c0_117 = arith.constant 0 : index
    %c0_118 = arith.constant 0 : index
    %252 = vector.load %arg13[%c1_116, %c0_117, %c0_118] : memref<2x1x64xf32, #tpu.memory_space<vmem>>, vector<1x1x64xf32>
    %253 = vector.shape_cast %252 : vector<1x1x64xf32> to vector<1x64xf32>
    %c1_119 = arith.constant 1 : index
    %c0_120 = arith.constant 0 : index
    %c0_121 = arith.constant 0 : index
    %254 = vector.load %arg14[%c1_119, %c0_120, %c0_121] : memref<2x64x32xf32, #tpu.memory_space<vmem>>, vector<1x64x32xf32>
    %255 = vector.shape_cast %254 : vector<1x64x32xf32> to vector<64x32xf32>
    %c1_122 = arith.constant 1 : index
    %c0_123 = arith.constant 0 : index
    %c0_124 = arith.constant 0 : index
    %256 = vector.load %arg15[%c1_122, %c0_123, %c0_124] : memref<2x1x32xf32, #tpu.memory_space<vmem>>, vector<1x1x32xf32>
    %257 = vector.shape_cast %256 : vector<1x1x32xf32> to vector<1x32xf32>
    %cst_125 = arith.constant dense<0.000000e+00> : vector<8xf32>
    %258 = vector.multi_reduction <add>, %237, %cst_125 [1] : vector<8x32xf32> to vector<8xf32>
    %259 = vector.shape_cast %258 : vector<8xf32> to vector<8x1xf32>
    %cst_126 = arith.constant 3.200000e+01 : f32
    %260 = vector.broadcast %cst_126 : f32 to vector<8x1xf32>
    %261 = arith.divf %259, %260 : vector<8x1xf32>
    %262 = vector.broadcast %261 : vector<8x1xf32> to vector<8x32xf32>
    %263 = arith.subf %237, %262 : vector<8x32xf32>
    %264 = arith.mulf %263, %263 : vector<8x32xf32>
    %cst_127 = arith.constant dense<0.000000e+00> : vector<8xf32>
    %265 = vector.multi_reduction <add>, %264, %cst_127 [1] : vector<8x32xf32> to vector<8xf32>
    %266 = vector.shape_cast %265 : vector<8xf32> to vector<8x1xf32>
    %cst_128 = arith.constant 3.200000e+01 : f32
    %267 = vector.broadcast %cst_128 : f32 to vector<8x1xf32>
    %268 = arith.divf %266, %267 : vector<8x1xf32>
    %269 = vector.broadcast %261 : vector<8x1xf32> to vector<8x32xf32>
    %270 = arith.subf %237, %269 : vector<8x32xf32>
    %cst_129 = arith.constant 9.99999974E-6 : f32
    %271 = vector.broadcast %cst_129 : f32 to vector<8x1xf32>
    %272 = arith.addf %268, %271 : vector<8x1xf32>
    %273 = math.rsqrt %272 : vector<8x1xf32>
    %274 = vector.broadcast %273 : vector<8x1xf32> to vector<8x32xf32>
    %275 = arith.mulf %270, %274 : vector<8x32xf32>
    %276 = vector.broadcast %239 : vector<1x32xf32> to vector<8x32xf32>
    %277 = arith.mulf %275, %276 : vector<8x32xf32>
    %278 = vector.broadcast %241 : vector<1x32xf32> to vector<8x32xf32>
    %279 = arith.addf %277, %278 : vector<8x32xf32>
    %cst_130 = arith.constant dense<0.000000e+00> : vector<8x96xf32>
    %280 = tpu.matmul %279, %243, %cst_130 {dimension_numbers = #tpu.dot_dimension_numbers<[1], [0], [0], [1], [0, 0, 1, 1], [], []>} : vector<8x32xf32>, vector<32x96xf32>, vector<8x96xf32> -> vector<8x96xf32>
    %281 = vector.extract_strided_slice %280 {offsets = [0, 0], sizes = [8, 32], strides = [1, 1]} : vector<8x96xf32> to vector<8x32xf32>
    %282 = vector.extract_strided_slice %280 {offsets = [0, 32], sizes = [8, 32], strides = [1, 1]} : vector<8x96xf32> to vector<8x32xf32>
    %283 = vector.extract_strided_slice %280 {offsets = [0, 64], sizes = [8, 32], strides = [1, 1]} : vector<8x96xf32> to vector<8x32xf32>
    %284 = vector.extract_strided_slice %281 {offsets = [0, 0], sizes = [8, 16], strides = [1, 1]} : vector<8x32xf32> to vector<8x16xf32>
    %285 = vector.extract_strided_slice %282 {offsets = [0, 0], sizes = [8, 16], strides = [1, 1]} : vector<8x32xf32> to vector<8x16xf32>
    %286 = vector.extract_strided_slice %283 {offsets = [0, 0], sizes = [8, 16], strides = [1, 1]} : vector<8x32xf32> to vector<8x16xf32>
    %cst_131 = arith.constant 2.500000e-01 : f32
    %287 = vector.broadcast %cst_131 : f32 to vector<8x16xf32>
    %288 = arith.mulf %284, %287 : vector<8x16xf32>
    %289 = tpu.transpose %285, [1, 0] : vector<8x16xf32> -> vector<16x8xf32>
    %cst_132 = arith.constant dense<0.000000e+00> : vector<8x8xf32>
    %290 = tpu.matmul %288, %289, %cst_132 {dimension_numbers = #tpu.dot_dimension_numbers<[1], [0], [0], [1], [0, 0, 1, 1], [], []>} : vector<8x16xf32>, vector<16x8xf32>, vector<8x8xf32> -> vector<8x8xf32>
    %cst_133 = arith.constant -1.000000e+09 : f32
    %291 = vector.broadcast %cst_133 : f32 to vector<8x8xf32>
    %292 = arith.select %7, %291, %290 : vector<8x8xi1>, vector<8x8xf32>
    %cst_134 = arith.constant dense<0xFF800000> : vector<8xf32>
    %293 = vector.multi_reduction <maximumf>, %292, %cst_134 [1] : vector<8x8xf32> to vector<8xf32>
    %294 = vector.shape_cast %293 : vector<8xf32> to vector<8x1xf32>
    %295 = vector.broadcast %294 : vector<8x1xf32> to vector<8x8xf32>
    %296 = arith.subf %292, %295 : vector<8x8xf32>
    %297 = math.exp %296 : vector<8x8xf32>
    %cst_135 = arith.constant dense<0.000000e+00> : vector<8xf32>
    %298 = vector.multi_reduction <add>, %297, %cst_135 [1] : vector<8x8xf32> to vector<8xf32>
    %299 = vector.shape_cast %298 : vector<8xf32> to vector<8x1xf32>
    %300 = tpu.reciprocal %299 {approx = true} : vector<8x1xf32> -> vector<8x1xf32>
    %301 = vector.broadcast %300 : vector<8x1xf32> to vector<8x8xf32>
    %302 = arith.mulf %297, %301 : vector<8x8xf32>
    %cst_136 = arith.constant dense<0.000000e+00> : vector<8x16xf32>
    %303 = tpu.matmul %302, %286, %cst_136 {dimension_numbers = #tpu.dot_dimension_numbers<[1], [0], [0], [1], [0, 0, 1, 1], [], []>} : vector<8x8xf32>, vector<8x16xf32>, vector<8x16xf32> -> vector<8x16xf32>
    %304 = vector.extract_strided_slice %281 {offsets = [0, 16], sizes = [8, 16], strides = [1, 1]} : vector<8x32xf32> to vector<8x16xf32>
    %305 = vector.extract_strided_slice %282 {offsets = [0, 16], sizes = [8, 16], strides = [1, 1]} : vector<8x32xf32> to vector<8x16xf32>
    %306 = vector.extract_strided_slice %283 {offsets = [0, 16], sizes = [8, 16], strides = [1, 1]} : vector<8x32xf32> to vector<8x16xf32>
    %cst_137 = arith.constant 2.500000e-01 : f32
    %307 = vector.broadcast %cst_137 : f32 to vector<8x16xf32>
    %308 = arith.mulf %304, %307 : vector<8x16xf32>
    %309 = tpu.transpose %305, [1, 0] : vector<8x16xf32> -> vector<16x8xf32>
    %cst_138 = arith.constant dense<0.000000e+00> : vector<8x8xf32>
    %310 = tpu.matmul %308, %309, %cst_138 {dimension_numbers = #tpu.dot_dimension_numbers<[1], [0], [0], [1], [0, 0, 1, 1], [], []>} : vector<8x16xf32>, vector<16x8xf32>, vector<8x8xf32> -> vector<8x8xf32>
    %cst_139 = arith.constant -1.000000e+09 : f32
    %311 = vector.broadcast %cst_139 : f32 to vector<8x8xf32>
    %312 = arith.select %7, %311, %310 : vector<8x8xi1>, vector<8x8xf32>
    %cst_140 = arith.constant dense<0xFF800000> : vector<8xf32>
    %313 = vector.multi_reduction <maximumf>, %312, %cst_140 [1] : vector<8x8xf32> to vector<8xf32>
    %314 = vector.shape_cast %313 : vector<8xf32> to vector<8x1xf32>
    %315 = vector.broadcast %314 : vector<8x1xf32> to vector<8x8xf32>
    %316 = arith.subf %312, %315 : vector<8x8xf32>
    %317 = math.exp %316 : vector<8x8xf32>
    %cst_141 = arith.constant dense<0.000000e+00> : vector<8xf32>
    %318 = vector.multi_reduction <add>, %317, %cst_141 [1] : vector<8x8xf32> to vector<8xf32>
    %319 = vector.shape_cast %318 : vector<8xf32> to vector<8x1xf32>
    %320 = tpu.reciprocal %319 {approx = true} : vector<8x1xf32> -> vector<8x1xf32>
    %321 = vector.broadcast %320 : vector<8x1xf32> to vector<8x8xf32>
    %322 = arith.mulf %317, %321 : vector<8x8xf32>
    %cst_142 = arith.constant dense<0.000000e+00> : vector<8x16xf32>
    %323 = tpu.matmul %322, %306, %cst_142 {dimension_numbers = #tpu.dot_dimension_numbers<[1], [0], [0], [1], [0, 0, 1, 1], [], []>} : vector<8x8xf32>, vector<8x16xf32>, vector<8x16xf32> -> vector<8x16xf32>
    %324 = tpu.concatenate %303, %323 in 1 : vector<8x16xf32>, vector<8x16xf32> -> vector<8x32xf32>
    %cst_143 = arith.constant dense<0.000000e+00> : vector<8x32xf32>
    %325 = tpu.matmul %324, %245, %cst_143 {dimension_numbers = #tpu.dot_dimension_numbers<[1], [0], [0], [1], [0, 0, 1, 1], [], []>} : vector<8x32xf32>, vector<32x32xf32>, vector<8x32xf32> -> vector<8x32xf32>
    %326 = arith.addf %325, %237 : vector<8x32xf32>
    %cst_144 = arith.constant dense<0.000000e+00> : vector<8xf32>
    %327 = vector.multi_reduction <add>, %326, %cst_144 [1] : vector<8x32xf32> to vector<8xf32>
    %328 = vector.shape_cast %327 : vector<8xf32> to vector<8x1xf32>
    %cst_145 = arith.constant 3.200000e+01 : f32
    %329 = vector.broadcast %cst_145 : f32 to vector<8x1xf32>
    %330 = arith.divf %328, %329 : vector<8x1xf32>
    %331 = vector.broadcast %330 : vector<8x1xf32> to vector<8x32xf32>
    %332 = arith.subf %326, %331 : vector<8x32xf32>
    %333 = arith.mulf %332, %332 : vector<8x32xf32>
    %cst_146 = arith.constant dense<0.000000e+00> : vector<8xf32>
    %334 = vector.multi_reduction <add>, %333, %cst_146 [1] : vector<8x32xf32> to vector<8xf32>
    %335 = vector.shape_cast %334 : vector<8xf32> to vector<8x1xf32>
    %cst_147 = arith.constant 3.200000e+01 : f32
    %336 = vector.broadcast %cst_147 : f32 to vector<8x1xf32>
    %337 = arith.divf %335, %336 : vector<8x1xf32>
    %338 = vector.broadcast %330 : vector<8x1xf32> to vector<8x32xf32>
    %339 = arith.subf %326, %338 : vector<8x32xf32>
    %cst_148 = arith.constant 9.99999997E-7 : f32
    %340 = vector.broadcast %cst_148 : f32 to vector<8x1xf32>
    %341 = arith.addf %337, %340 : vector<8x1xf32>
    %342 = math.rsqrt %341 : vector<8x1xf32>
    %343 = vector.broadcast %342 : vector<8x1xf32> to vector<8x32xf32>
    %344 = arith.mulf %339, %343 : vector<8x32xf32>
    %345 = vector.broadcast %247 : vector<1x32xf32> to vector<8x32xf32>
    %346 = arith.mulf %344, %345 : vector<8x32xf32>
    %347 = vector.broadcast %249 : vector<1x32xf32> to vector<8x32xf32>
    %348 = arith.addf %346, %347 : vector<8x32xf32>
    %cst_149 = arith.constant dense<0.000000e+00> : vector<8x64xf32>
    %349 = tpu.matmul %348, %251, %cst_149 {dimension_numbers = #tpu.dot_dimension_numbers<[1], [0], [0], [1], [0, 0, 1, 1], [], []>} : vector<8x32xf32>, vector<32x64xf32>, vector<8x64xf32> -> vector<8x64xf32>
    %350 = vector.broadcast %253 : vector<1x64xf32> to vector<8x64xf32>
    %351 = arith.addf %349, %350 : vector<8x64xf32>
    %cst_150 = arith.constant 0.000000e+00 : f32
    %352 = vector.broadcast %cst_150 : f32 to vector<8x64xf32>
    %353 = arith.maximumf %351, %352 : vector<8x64xf32>
    %cst_151 = arith.constant dense<0.000000e+00> : vector<8x32xf32>
    %354 = tpu.matmul %353, %255, %cst_151 {dimension_numbers = #tpu.dot_dimension_numbers<[1], [0], [0], [1], [0, 0, 1, 1], [], []>} : vector<8x64xf32>, vector<64x32xf32>, vector<8x32xf32> -> vector<8x32xf32>
    %355 = vector.broadcast %257 : vector<1x32xf32> to vector<8x32xf32>
    %356 = arith.addf %354, %355 : vector<8x32xf32>
    %357 = arith.addf %356, %326 : vector<8x32xf32>
    %cst_152 = arith.constant dense<0.000000e+00> : vector<8xf32>
    %358 = vector.multi_reduction <add>, %357, %cst_152 [1] : vector<8x32xf32> to vector<8xf32>
    %359 = vector.shape_cast %358 : vector<8xf32> to vector<8x1xf32>
    %cst_153 = arith.constant 3.200000e+01 : f32
    %360 = vector.broadcast %cst_153 : f32 to vector<8x1xf32>
    %361 = arith.divf %359, %360 : vector<8x1xf32>
    %362 = vector.broadcast %361 : vector<8x1xf32> to vector<8x32xf32>
    %363 = arith.subf %357, %362 : vector<8x32xf32>
    %364 = arith.mulf %363, %363 : vector<8x32xf32>
    %cst_154 = arith.constant dense<0.000000e+00> : vector<8xf32>
    %365 = vector.multi_reduction <add>, %364, %cst_154 [1] : vector<8x32xf32> to vector<8xf32>
    %366 = vector.shape_cast %365 : vector<8xf32> to vector<8x1xf32>
    %cst_155 = arith.constant 3.200000e+01 : f32
    %367 = vector.broadcast %cst_155 : f32 to vector<8x1xf32>
    %368 = arith.divf %366, %367 : vector<8x1xf32>
    %369 = vector.broadcast %361 : vector<8x1xf32> to vector<8x32xf32>
    %370 = arith.subf %357, %369 : vector<8x32xf32>
    %cst_156 = arith.constant 9.99999974E-6 : f32
    %371 = vector.broadcast %cst_156 : f32 to vector<8x1xf32>
    %372 = arith.addf %368, %371 : vector<8x1xf32>
    %373 = math.rsqrt %372 : vector<8x1xf32>
    %374 = vector.broadcast %373 : vector<8x1xf32> to vector<8x32xf32>
    %375 = arith.mulf %370, %374 : vector<8x32xf32>
    %376 = vector.broadcast %239 : vector<1x32xf32> to vector<8x32xf32>
    %377 = arith.mulf %375, %376 : vector<8x32xf32>
    %378 = vector.broadcast %241 : vector<1x32xf32> to vector<8x32xf32>
    %379 = arith.addf %377, %378 : vector<8x32xf32>
    %cst_157 = arith.constant dense<0.000000e+00> : vector<8x96xf32>
    %380 = tpu.matmul %379, %243, %cst_157 {dimension_numbers = #tpu.dot_dimension_numbers<[1], [0], [0], [1], [0, 0, 1, 1], [], []>} : vector<8x32xf32>, vector<32x96xf32>, vector<8x96xf32> -> vector<8x96xf32>
    %381 = vector.extract_strided_slice %380 {offsets = [0, 0], sizes = [8, 32], strides = [1, 1]} : vector<8x96xf32> to vector<8x32xf32>
    %382 = vector.extract_strided_slice %380 {offsets = [0, 32], sizes = [8, 32], strides = [1, 1]} : vector<8x96xf32> to vector<8x32xf32>
    %383 = vector.extract_strided_slice %380 {offsets = [0, 64], sizes = [8, 32], strides = [1, 1]} : vector<8x96xf32> to vector<8x32xf32>
    %384 = vector.extract_strided_slice %381 {offsets = [0, 0], sizes = [8, 16], strides = [1, 1]} : vector<8x32xf32> to vector<8x16xf32>
    %385 = vector.extract_strided_slice %382 {offsets = [0, 0], sizes = [8, 16], strides = [1, 1]} : vector<8x32xf32> to vector<8x16xf32>
    %386 = vector.extract_strided_slice %383 {offsets = [0, 0], sizes = [8, 16], strides = [1, 1]} : vector<8x32xf32> to vector<8x16xf32>
    %cst_158 = arith.constant 2.500000e-01 : f32
    %387 = vector.broadcast %cst_158 : f32 to vector<8x16xf32>
    %388 = arith.mulf %384, %387 : vector<8x16xf32>
    %389 = tpu.transpose %385, [1, 0] : vector<8x16xf32> -> vector<16x8xf32>
    %cst_159 = arith.constant dense<0.000000e+00> : vector<8x8xf32>
    %390 = tpu.matmul %388, %389, %cst_159 {dimension_numbers = #tpu.dot_dimension_numbers<[1], [0], [0], [1], [0, 0, 1, 1], [], []>} : vector<8x16xf32>, vector<16x8xf32>, vector<8x8xf32> -> vector<8x8xf32>
    %cst_160 = arith.constant -1.000000e+09 : f32
    %391 = vector.broadcast %cst_160 : f32 to vector<8x8xf32>
    %392 = arith.select %7, %391, %390 : vector<8x8xi1>, vector<8x8xf32>
    %cst_161 = arith.constant dense<0xFF800000> : vector<8xf32>
    %393 = vector.multi_reduction <maximumf>, %392, %cst_161 [1] : vector<8x8xf32> to vector<8xf32>
    %394 = vector.shape_cast %393 : vector<8xf32> to vector<8x1xf32>
    %395 = vector.broadcast %394 : vector<8x1xf32> to vector<8x8xf32>
    %396 = arith.subf %392, %395 : vector<8x8xf32>
    %397 = math.exp %396 : vector<8x8xf32>
    %cst_162 = arith.constant dense<0.000000e+00> : vector<8xf32>
    %398 = vector.multi_reduction <add>, %397, %cst_162 [1] : vector<8x8xf32> to vector<8xf32>
    %399 = vector.shape_cast %398 : vector<8xf32> to vector<8x1xf32>
    %400 = tpu.reciprocal %399 {approx = true} : vector<8x1xf32> -> vector<8x1xf32>
    %401 = vector.broadcast %400 : vector<8x1xf32> to vector<8x8xf32>
    %402 = arith.mulf %397, %401 : vector<8x8xf32>
    %cst_163 = arith.constant dense<0.000000e+00> : vector<8x16xf32>
    %403 = tpu.matmul %402, %386, %cst_163 {dimension_numbers = #tpu.dot_dimension_numbers<[1], [0], [0], [1], [0, 0, 1, 1], [], []>} : vector<8x8xf32>, vector<8x16xf32>, vector<8x16xf32> -> vector<8x16xf32>
    %404 = vector.extract_strided_slice %381 {offsets = [0, 16], sizes = [8, 16], strides = [1, 1]} : vector<8x32xf32> to vector<8x16xf32>
    %405 = vector.extract_strided_slice %382 {offsets = [0, 16], sizes = [8, 16], strides = [1, 1]} : vector<8x32xf32> to vector<8x16xf32>
    %406 = vector.extract_strided_slice %383 {offsets = [0, 16], sizes = [8, 16], strides = [1, 1]} : vector<8x32xf32> to vector<8x16xf32>
    %cst_164 = arith.constant 2.500000e-01 : f32
    %407 = vector.broadcast %cst_164 : f32 to vector<8x16xf32>
    %408 = arith.mulf %404, %407 : vector<8x16xf32>
    %409 = tpu.transpose %405, [1, 0] : vector<8x16xf32> -> vector<16x8xf32>
    %cst_165 = arith.constant dense<0.000000e+00> : vector<8x8xf32>
    %410 = tpu.matmul %408, %409, %cst_165 {dimension_numbers = #tpu.dot_dimension_numbers<[1], [0], [0], [1], [0, 0, 1, 1], [], []>} : vector<8x16xf32>, vector<16x8xf32>, vector<8x8xf32> -> vector<8x8xf32>
    %cst_166 = arith.constant -1.000000e+09 : f32
    %411 = vector.broadcast %cst_166 : f32 to vector<8x8xf32>
    %412 = arith.select %7, %411, %410 : vector<8x8xi1>, vector<8x8xf32>
    %cst_167 = arith.constant dense<0xFF800000> : vector<8xf32>
    %413 = vector.multi_reduction <maximumf>, %412, %cst_167 [1] : vector<8x8xf32> to vector<8xf32>
    %414 = vector.shape_cast %413 : vector<8xf32> to vector<8x1xf32>
    %415 = vector.broadcast %414 : vector<8x1xf32> to vector<8x8xf32>
    %416 = arith.subf %412, %415 : vector<8x8xf32>
    %417 = math.exp %416 : vector<8x8xf32>
    %cst_168 = arith.constant dense<0.000000e+00> : vector<8xf32>
    %418 = vector.multi_reduction <add>, %417, %cst_168 [1] : vector<8x8xf32> to vector<8xf32>
    %419 = vector.shape_cast %418 : vector<8xf32> to vector<8x1xf32>
    %420 = tpu.reciprocal %419 {approx = true} : vector<8x1xf32> -> vector<8x1xf32>
    %421 = vector.broadcast %420 : vector<8x1xf32> to vector<8x8xf32>
    %422 = arith.mulf %417, %421 : vector<8x8xf32>
    %cst_169 = arith.constant dense<0.000000e+00> : vector<8x16xf32>
    %423 = tpu.matmul %422, %406, %cst_169 {dimension_numbers = #tpu.dot_dimension_numbers<[1], [0], [0], [1], [0, 0, 1, 1], [], []>} : vector<8x8xf32>, vector<8x16xf32>, vector<8x16xf32> -> vector<8x16xf32>
    %424 = tpu.concatenate %403, %423 in 1 : vector<8x16xf32>, vector<8x16xf32> -> vector<8x32xf32>
    %cst_170 = arith.constant dense<0.000000e+00> : vector<8x32xf32>
    %425 = tpu.matmul %424, %245, %cst_170 {dimension_numbers = #tpu.dot_dimension_numbers<[1], [0], [0], [1], [0, 0, 1, 1], [], []>} : vector<8x32xf32>, vector<32x32xf32>, vector<8x32xf32> -> vector<8x32xf32>
    %426 = arith.addf %425, %357 : vector<8x32xf32>
    %cst_171 = arith.constant dense<0.000000e+00> : vector<8xf32>
    %427 = vector.multi_reduction <add>, %426, %cst_171 [1] : vector<8x32xf32> to vector<8xf32>
    %428 = vector.shape_cast %427 : vector<8xf32> to vector<8x1xf32>
    %cst_172 = arith.constant 3.200000e+01 : f32
    %429 = vector.broadcast %cst_172 : f32 to vector<8x1xf32>
    %430 = arith.divf %428, %429 : vector<8x1xf32>
    %431 = vector.broadcast %430 : vector<8x1xf32> to vector<8x32xf32>
    %432 = arith.subf %426, %431 : vector<8x32xf32>
    %433 = arith.mulf %432, %432 : vector<8x32xf32>
    %cst_173 = arith.constant dense<0.000000e+00> : vector<8xf32>
    %434 = vector.multi_reduction <add>, %433, %cst_173 [1] : vector<8x32xf32> to vector<8xf32>
    %435 = vector.shape_cast %434 : vector<8xf32> to vector<8x1xf32>
    %cst_174 = arith.constant 3.200000e+01 : f32
    %436 = vector.broadcast %cst_174 : f32 to vector<8x1xf32>
    %437 = arith.divf %435, %436 : vector<8x1xf32>
    %438 = vector.broadcast %430 : vector<8x1xf32> to vector<8x32xf32>
    %439 = arith.subf %426, %438 : vector<8x32xf32>
    %cst_175 = arith.constant 9.99999997E-7 : f32
    %440 = vector.broadcast %cst_175 : f32 to vector<8x1xf32>
    %441 = arith.addf %437, %440 : vector<8x1xf32>
    %442 = math.rsqrt %441 : vector<8x1xf32>
    %443 = vector.broadcast %442 : vector<8x1xf32> to vector<8x32xf32>
    %444 = arith.mulf %439, %443 : vector<8x32xf32>
    %445 = vector.broadcast %247 : vector<1x32xf32> to vector<8x32xf32>
    %446 = arith.mulf %444, %445 : vector<8x32xf32>
    %447 = vector.broadcast %249 : vector<1x32xf32> to vector<8x32xf32>
    %448 = arith.addf %446, %447 : vector<8x32xf32>
    %cst_176 = arith.constant dense<0.000000e+00> : vector<8x64xf32>
    %449 = tpu.matmul %448, %251, %cst_176 {dimension_numbers = #tpu.dot_dimension_numbers<[1], [0], [0], [1], [0, 0, 1, 1], [], []>} : vector<8x32xf32>, vector<32x64xf32>, vector<8x64xf32> -> vector<8x64xf32>
    %450 = vector.broadcast %253 : vector<1x64xf32> to vector<8x64xf32>
    %451 = arith.addf %449, %450 : vector<8x64xf32>
    %cst_177 = arith.constant 0.000000e+00 : f32
    %452 = vector.broadcast %cst_177 : f32 to vector<8x64xf32>
    %453 = arith.maximumf %451, %452 : vector<8x64xf32>
    %cst_178 = arith.constant dense<0.000000e+00> : vector<8x32xf32>
    %454 = tpu.matmul %453, %255, %cst_178 {dimension_numbers = #tpu.dot_dimension_numbers<[1], [0], [0], [1], [0, 0, 1, 1], [], []>} : vector<8x64xf32>, vector<64x32xf32>, vector<8x32xf32> -> vector<8x32xf32>
    %455 = vector.broadcast %257 : vector<1x32xf32> to vector<8x32xf32>
    %456 = arith.addf %454, %455 : vector<8x32xf32>
    %457 = arith.addf %456, %426 : vector<8x32xf32>
    %c0_179 = arith.constant 0 : index
    %c0_180 = arith.constant 0 : index
    %458 = vector.load %arg16[%c0_179, %c0_180] : memref<32x16xf32, #tpu.memory_space<vmem>>, vector<32x16xf32>
    %cst_181 = arith.constant dense<0.000000e+00> : vector<8x16xf32>
    %459 = tpu.matmul %457, %458, %cst_181 {dimension_numbers = #tpu.dot_dimension_numbers<[1], [0], [0], [1], [0, 0, 1, 1], [], []>} : vector<8x32xf32>, vector<32x16xf32>, vector<8x16xf32> -> vector<8x16xf32>
    %c0_182 = arith.constant 0 : index
    %c0_183 = arith.constant 0 : index
    %460 = vector.load %arg17[%c0_182, %c0_183] : memref<1x16xf32, #tpu.memory_space<vmem>>, vector<1x16xf32>
    %461 = vector.broadcast %460 : vector<1x16xf32> to vector<8x16xf32>
    %462 = arith.addf %459, %461 : vector<8x16xf32>
    %463 = arith.mulf %3, %1 : vector<8x16xf32>
    %cst_184 = arith.constant 1.000000e+00 : f32
    %464 = vector.broadcast %cst_184 : f32 to vector<8x16xf32>
    %465 = arith.subf %464, %3 : vector<8x16xf32>
    %466 = arith.mulf %465, %462 : vector<8x16xf32>
    %467 = arith.addf %463, %466 : vector<8x16xf32>
    %c0_185 = arith.constant 0 : index
    %c0_186 = arith.constant 0 : index
    %468 = vector.load %arg18[%c0_185, %c0_186] : memref<32x32xf32, #tpu.memory_space<vmem>>, vector<32x32xf32>
    %469 = vector.extract_strided_slice %468 {offsets = [0, 0], sizes = [16, 32], strides = [1, 1]} : vector<32x32xf32> to vector<16x32xf32>
    %cst_187 = arith.constant dense<0.000000e+00> : vector<8x32xf32>
    %470 = tpu.matmul %467, %469, %cst_187 {dimension_numbers = #tpu.dot_dimension_numbers<[1], [0], [0], [1], [0, 0, 1, 1], [], []>} : vector<8x16xf32>, vector<16x32xf32>, vector<8x32xf32> -> vector<8x32xf32>
    %471 = vector.extract_strided_slice %468 {offsets = [16, 0], sizes = [16, 32], strides = [1, 1]} : vector<32x32xf32> to vector<16x32xf32>
    %cst_188 = arith.constant dense<0.000000e+00> : vector<8x32xf32>
    %472 = tpu.matmul %3, %471, %cst_188 {dimension_numbers = #tpu.dot_dimension_numbers<[1], [0], [0], [1], [0, 0, 1, 1], [], []>} : vector<8x16xf32>, vector<16x32xf32>, vector<8x32xf32> -> vector<8x32xf32>
    %473 = arith.addf %470, %472 : vector<8x32xf32>
    %c0_189 = arith.constant 0 : index
    %c0_190 = arith.constant 0 : index
    %474 = vector.load %arg19[%c0_189, %c0_190] : memref<1x32xf32, #tpu.memory_space<vmem>>, vector<1x32xf32>
    %475 = vector.broadcast %474 : vector<1x32xf32> to vector<8x32xf32>
    %476 = arith.addf %473, %475 : vector<8x32xf32>
    %477 = arith.addf %476, %4 : vector<8x32xf32>
    %c0_191 = arith.constant 0 : index
    %c0_192 = arith.constant 0 : index
    %c0_193 = arith.constant 0 : index
    %478 = vector.load %arg20[%c0_191, %c0_192, %c0_193] : memref<2x1x32xf32, #tpu.memory_space<vmem>>, vector<1x1x32xf32>
    %479 = vector.shape_cast %478 : vector<1x1x32xf32> to vector<1x32xf32>
    %c0_194 = arith.constant 0 : index
    %c0_195 = arith.constant 0 : index
    %c0_196 = arith.constant 0 : index
    %480 = vector.load %arg21[%c0_194, %c0_195, %c0_196] : memref<2x1x32xf32, #tpu.memory_space<vmem>>, vector<1x1x32xf32>
    %481 = vector.shape_cast %480 : vector<1x1x32xf32> to vector<1x32xf32>
    %c0_197 = arith.constant 0 : index
    %c0_198 = arith.constant 0 : index
    %c0_199 = arith.constant 0 : index
    %482 = vector.load %arg22[%c0_197, %c0_198, %c0_199] : memref<2x32x96xf32, #tpu.memory_space<vmem>>, vector<1x32x96xf32>
    %483 = vector.shape_cast %482 : vector<1x32x96xf32> to vector<32x96xf32>
    %c0_200 = arith.constant 0 : index
    %c0_201 = arith.constant 0 : index
    %c0_202 = arith.constant 0 : index
    %484 = vector.load %arg23[%c0_200, %c0_201, %c0_202] : memref<2x32x32xf32, #tpu.memory_space<vmem>>, vector<1x32x32xf32>
    %485 = vector.shape_cast %484 : vector<1x32x32xf32> to vector<32x32xf32>
    %c0_203 = arith.constant 0 : index
    %c0_204 = arith.constant 0 : index
    %c0_205 = arith.constant 0 : index
    %486 = vector.load %arg24[%c0_203, %c0_204, %c0_205] : memref<2x1x32xf32, #tpu.memory_space<vmem>>, vector<1x1x32xf32>
    %487 = vector.shape_cast %486 : vector<1x1x32xf32> to vector<1x32xf32>
    %c0_206 = arith.constant 0 : index
    %c0_207 = arith.constant 0 : index
    %c0_208 = arith.constant 0 : index
    %488 = vector.load %arg25[%c0_206, %c0_207, %c0_208] : memref<2x1x32xf32, #tpu.memory_space<vmem>>, vector<1x1x32xf32>
    %489 = vector.shape_cast %488 : vector<1x1x32xf32> to vector<1x32xf32>
    %c0_209 = arith.constant 0 : index
    %c0_210 = arith.constant 0 : index
    %c0_211 = arith.constant 0 : index
    %490 = vector.load %arg26[%c0_209, %c0_210, %c0_211] : memref<2x32x64xf32, #tpu.memory_space<vmem>>, vector<1x32x64xf32>
    %491 = vector.shape_cast %490 : vector<1x32x64xf32> to vector<32x64xf32>
    %c0_212 = arith.constant 0 : index
    %c0_213 = arith.constant 0 : index
    %c0_214 = arith.constant 0 : index
    %492 = vector.load %arg27[%c0_212, %c0_213, %c0_214] : memref<2x1x64xf32, #tpu.memory_space<vmem>>, vector<1x1x64xf32>
    %493 = vector.shape_cast %492 : vector<1x1x64xf32> to vector<1x64xf32>
    %c0_215 = arith.constant 0 : index
    %c0_216 = arith.constant 0 : index
    %c0_217 = arith.constant 0 : index
    %494 = vector.load %arg28[%c0_215, %c0_216, %c0_217] : memref<2x64x32xf32, #tpu.memory_space<vmem>>, vector<1x64x32xf32>
    %495 = vector.shape_cast %494 : vector<1x64x32xf32> to vector<64x32xf32>
    %c0_218 = arith.constant 0 : index
    %c0_219 = arith.constant 0 : index
    %c0_220 = arith.constant 0 : index
    %496 = vector.load %arg29[%c0_218, %c0_219, %c0_220] : memref<2x1x32xf32, #tpu.memory_space<vmem>>, vector<1x1x32xf32>
    %497 = vector.shape_cast %496 : vector<1x1x32xf32> to vector<1x32xf32>
    %cst_221 = arith.constant dense<0.000000e+00> : vector<8xf32>
    %498 = vector.multi_reduction <add>, %477, %cst_221 [1] : vector<8x32xf32> to vector<8xf32>
    %499 = vector.shape_cast %498 : vector<8xf32> to vector<8x1xf32>
    %cst_222 = arith.constant 3.200000e+01 : f32
    %500 = vector.broadcast %cst_222 : f32 to vector<8x1xf32>
    %501 = arith.divf %499, %500 : vector<8x1xf32>
    %502 = vector.broadcast %501 : vector<8x1xf32> to vector<8x32xf32>
    %503 = arith.subf %477, %502 : vector<8x32xf32>
    %504 = arith.mulf %503, %503 : vector<8x32xf32>
    %cst_223 = arith.constant dense<0.000000e+00> : vector<8xf32>
    %505 = vector.multi_reduction <add>, %504, %cst_223 [1] : vector<8x32xf32> to vector<8xf32>
    %506 = vector.shape_cast %505 : vector<8xf32> to vector<8x1xf32>
    %cst_224 = arith.constant 3.200000e+01 : f32
    %507 = vector.broadcast %cst_224 : f32 to vector<8x1xf32>
    %508 = arith.divf %506, %507 : vector<8x1xf32>
    %509 = vector.broadcast %501 : vector<8x1xf32> to vector<8x32xf32>
    %510 = arith.subf %477, %509 : vector<8x32xf32>
    %cst_225 = arith.constant 9.99999974E-6 : f32
    %511 = vector.broadcast %cst_225 : f32 to vector<8x1xf32>
    %512 = arith.addf %508, %511 : vector<8x1xf32>
    %513 = math.rsqrt %512 : vector<8x1xf32>
    %514 = vector.broadcast %513 : vector<8x1xf32> to vector<8x32xf32>
    %515 = arith.mulf %510, %514 : vector<8x32xf32>
    %516 = vector.broadcast %479 : vector<1x32xf32> to vector<8x32xf32>
    %517 = arith.mulf %515, %516 : vector<8x32xf32>
    %518 = vector.broadcast %481 : vector<1x32xf32> to vector<8x32xf32>
    %519 = arith.addf %517, %518 : vector<8x32xf32>
    %cst_226 = arith.constant dense<0.000000e+00> : vector<8x96xf32>
    %520 = tpu.matmul %519, %483, %cst_226 {dimension_numbers = #tpu.dot_dimension_numbers<[1], [0], [0], [1], [0, 0, 1, 1], [], []>} : vector<8x32xf32>, vector<32x96xf32>, vector<8x96xf32> -> vector<8x96xf32>
    %521 = vector.extract_strided_slice %520 {offsets = [0, 0], sizes = [8, 32], strides = [1, 1]} : vector<8x96xf32> to vector<8x32xf32>
    %522 = vector.extract_strided_slice %520 {offsets = [0, 32], sizes = [8, 32], strides = [1, 1]} : vector<8x96xf32> to vector<8x32xf32>
    %523 = vector.extract_strided_slice %520 {offsets = [0, 64], sizes = [8, 32], strides = [1, 1]} : vector<8x96xf32> to vector<8x32xf32>
    %524 = vector.extract_strided_slice %521 {offsets = [0, 0], sizes = [8, 16], strides = [1, 1]} : vector<8x32xf32> to vector<8x16xf32>
    %525 = vector.extract_strided_slice %522 {offsets = [0, 0], sizes = [8, 16], strides = [1, 1]} : vector<8x32xf32> to vector<8x16xf32>
    %526 = vector.extract_strided_slice %523 {offsets = [0, 0], sizes = [8, 16], strides = [1, 1]} : vector<8x32xf32> to vector<8x16xf32>
    %cst_227 = arith.constant 2.500000e-01 : f32
    %527 = vector.broadcast %cst_227 : f32 to vector<8x16xf32>
    %528 = arith.mulf %524, %527 : vector<8x16xf32>
    %529 = tpu.transpose %525, [1, 0] : vector<8x16xf32> -> vector<16x8xf32>
    %cst_228 = arith.constant dense<0.000000e+00> : vector<8x8xf32>
    %530 = tpu.matmul %528, %529, %cst_228 {dimension_numbers = #tpu.dot_dimension_numbers<[1], [0], [0], [1], [0, 0, 1, 1], [], []>} : vector<8x16xf32>, vector<16x8xf32>, vector<8x8xf32> -> vector<8x8xf32>
    %cst_229 = arith.constant -1.000000e+09 : f32
    %531 = vector.broadcast %cst_229 : f32 to vector<8x8xf32>
    %532 = arith.select %7, %531, %530 : vector<8x8xi1>, vector<8x8xf32>
    %cst_230 = arith.constant dense<0xFF800000> : vector<8xf32>
    %533 = vector.multi_reduction <maximumf>, %532, %cst_230 [1] : vector<8x8xf32> to vector<8xf32>
    %534 = vector.shape_cast %533 : vector<8xf32> to vector<8x1xf32>
    %535 = vector.broadcast %534 : vector<8x1xf32> to vector<8x8xf32>
    %536 = arith.subf %532, %535 : vector<8x8xf32>
    %537 = math.exp %536 : vector<8x8xf32>
    %cst_231 = arith.constant dense<0.000000e+00> : vector<8xf32>
    %538 = vector.multi_reduction <add>, %537, %cst_231 [1] : vector<8x8xf32> to vector<8xf32>
    %539 = vector.shape_cast %538 : vector<8xf32> to vector<8x1xf32>
    %540 = tpu.reciprocal %539 {approx = true} : vector<8x1xf32> -> vector<8x1xf32>
    %541 = vector.broadcast %540 : vector<8x1xf32> to vector<8x8xf32>
    %542 = arith.mulf %537, %541 : vector<8x8xf32>
    %cst_232 = arith.constant dense<0.000000e+00> : vector<8x16xf32>
    %543 = tpu.matmul %542, %526, %cst_232 {dimension_numbers = #tpu.dot_dimension_numbers<[1], [0], [0], [1], [0, 0, 1, 1], [], []>} : vector<8x8xf32>, vector<8x16xf32>, vector<8x16xf32> -> vector<8x16xf32>
    %544 = vector.extract_strided_slice %521 {offsets = [0, 16], sizes = [8, 16], strides = [1, 1]} : vector<8x32xf32> to vector<8x16xf32>
    %545 = vector.extract_strided_slice %522 {offsets = [0, 16], sizes = [8, 16], strides = [1, 1]} : vector<8x32xf32> to vector<8x16xf32>
    %546 = vector.extract_strided_slice %523 {offsets = [0, 16], sizes = [8, 16], strides = [1, 1]} : vector<8x32xf32> to vector<8x16xf32>
    %cst_233 = arith.constant 2.500000e-01 : f32
    %547 = vector.broadcast %cst_233 : f32 to vector<8x16xf32>
    %548 = arith.mulf %544, %547 : vector<8x16xf32>
    %549 = tpu.transpose %545, [1, 0] : vector<8x16xf32> -> vector<16x8xf32>
    %cst_234 = arith.constant dense<0.000000e+00> : vector<8x8xf32>
    %550 = tpu.matmul %548, %549, %cst_234 {dimension_numbers = #tpu.dot_dimension_numbers<[1], [0], [0], [1], [0, 0, 1, 1], [], []>} : vector<8x16xf32>, vector<16x8xf32>, vector<8x8xf32> -> vector<8x8xf32>
    %cst_235 = arith.constant -1.000000e+09 : f32
    %551 = vector.broadcast %cst_235 : f32 to vector<8x8xf32>
    %552 = arith.select %7, %551, %550 : vector<8x8xi1>, vector<8x8xf32>
    %cst_236 = arith.constant dense<0xFF800000> : vector<8xf32>
    %553 = vector.multi_reduction <maximumf>, %552, %cst_236 [1] : vector<8x8xf32> to vector<8xf32>
    %554 = vector.shape_cast %553 : vector<8xf32> to vector<8x1xf32>
    %555 = vector.broadcast %554 : vector<8x1xf32> to vector<8x8xf32>
    %556 = arith.subf %552, %555 : vector<8x8xf32>
    %557 = math.exp %556 : vector<8x8xf32>
    %cst_237 = arith.constant dense<0.000000e+00> : vector<8xf32>
    %558 = vector.multi_reduction <add>, %557, %cst_237 [1] : vector<8x8xf32> to vector<8xf32>
    %559 = vector.shape_cast %558 : vector<8xf32> to vector<8x1xf32>
    %560 = tpu.reciprocal %559 {approx = true} : vector<8x1xf32> -> vector<8x1xf32>
    %561 = vector.broadcast %560 : vector<8x1xf32> to vector<8x8xf32>
    %562 = arith.mulf %557, %561 : vector<8x8xf32>
    %cst_238 = arith.constant dense<0.000000e+00> : vector<8x16xf32>
    %563 = tpu.matmul %562, %546, %cst_238 {dimension_numbers = #tpu.dot_dimension_numbers<[1], [0], [0], [1], [0, 0, 1, 1], [], []>} : vector<8x8xf32>, vector<8x16xf32>, vector<8x16xf32> -> vector<8x16xf32>
    %564 = tpu.concatenate %543, %563 in 1 : vector<8x16xf32>, vector<8x16xf32> -> vector<8x32xf32>
    %cst_239 = arith.constant dense<0.000000e+00> : vector<8x32xf32>
    %565 = tpu.matmul %564, %485, %cst_239 {dimension_numbers = #tpu.dot_dimension_numbers<[1], [0], [0], [1], [0, 0, 1, 1], [], []>} : vector<8x32xf32>, vector<32x32xf32>, vector<8x32xf32> -> vector<8x32xf32>
    %566 = arith.addf %565, %477 : vector<8x32xf32>
    %cst_240 = arith.constant dense<0.000000e+00> : vector<8xf32>
    %567 = vector.multi_reduction <add>, %566, %cst_240 [1] : vector<8x32xf32> to vector<8xf32>
    %568 = vector.shape_cast %567 : vector<8xf32> to vector<8x1xf32>
    %cst_241 = arith.constant 3.200000e+01 : f32
    %569 = vector.broadcast %cst_241 : f32 to vector<8x1xf32>
    %570 = arith.divf %568, %569 : vector<8x1xf32>
    %571 = vector.broadcast %570 : vector<8x1xf32> to vector<8x32xf32>
    %572 = arith.subf %566, %571 : vector<8x32xf32>
    %573 = arith.mulf %572, %572 : vector<8x32xf32>
    %cst_242 = arith.constant dense<0.000000e+00> : vector<8xf32>
    %574 = vector.multi_reduction <add>, %573, %cst_242 [1] : vector<8x32xf32> to vector<8xf32>
    %575 = vector.shape_cast %574 : vector<8xf32> to vector<8x1xf32>
    %cst_243 = arith.constant 3.200000e+01 : f32
    %576 = vector.broadcast %cst_243 : f32 to vector<8x1xf32>
    %577 = arith.divf %575, %576 : vector<8x1xf32>
    %578 = vector.broadcast %570 : vector<8x1xf32> to vector<8x32xf32>
    %579 = arith.subf %566, %578 : vector<8x32xf32>
    %cst_244 = arith.constant 9.99999997E-7 : f32
    %580 = vector.broadcast %cst_244 : f32 to vector<8x1xf32>
    %581 = arith.addf %577, %580 : vector<8x1xf32>
    %582 = math.rsqrt %581 : vector<8x1xf32>
    %583 = vector.broadcast %582 : vector<8x1xf32> to vector<8x32xf32>
    %584 = arith.mulf %579, %583 : vector<8x32xf32>
    %585 = vector.broadcast %487 : vector<1x32xf32> to vector<8x32xf32>
    %586 = arith.mulf %584, %585 : vector<8x32xf32>
    %587 = vector.broadcast %489 : vector<1x32xf32> to vector<8x32xf32>
    %588 = arith.addf %586, %587 : vector<8x32xf32>
    %cst_245 = arith.constant dense<0.000000e+00> : vector<8x64xf32>
    %589 = tpu.matmul %588, %491, %cst_245 {dimension_numbers = #tpu.dot_dimension_numbers<[1], [0], [0], [1], [0, 0, 1, 1], [], []>} : vector<8x32xf32>, vector<32x64xf32>, vector<8x64xf32> -> vector<8x64xf32>
    %590 = vector.broadcast %493 : vector<1x64xf32> to vector<8x64xf32>
    %591 = arith.addf %589, %590 : vector<8x64xf32>
    %cst_246 = arith.constant 0.000000e+00 : f32
    %592 = vector.broadcast %cst_246 : f32 to vector<8x64xf32>
    %593 = arith.maximumf %591, %592 : vector<8x64xf32>
    %cst_247 = arith.constant dense<0.000000e+00> : vector<8x32xf32>
    %594 = tpu.matmul %593, %495, %cst_247 {dimension_numbers = #tpu.dot_dimension_numbers<[1], [0], [0], [1], [0, 0, 1, 1], [], []>} : vector<8x64xf32>, vector<64x32xf32>, vector<8x32xf32> -> vector<8x32xf32>
    %595 = vector.broadcast %497 : vector<1x32xf32> to vector<8x32xf32>
    %596 = arith.addf %594, %595 : vector<8x32xf32>
    %597 = arith.addf %596, %566 : vector<8x32xf32>
    %cst_248 = arith.constant dense<0.000000e+00> : vector<8xf32>
    %598 = vector.multi_reduction <add>, %597, %cst_248 [1] : vector<8x32xf32> to vector<8xf32>
    %599 = vector.shape_cast %598 : vector<8xf32> to vector<8x1xf32>
    %cst_249 = arith.constant 3.200000e+01 : f32
    %600 = vector.broadcast %cst_249 : f32 to vector<8x1xf32>
    %601 = arith.divf %599, %600 : vector<8x1xf32>
    %602 = vector.broadcast %601 : vector<8x1xf32> to vector<8x32xf32>
    %603 = arith.subf %597, %602 : vector<8x32xf32>
    %604 = arith.mulf %603, %603 : vector<8x32xf32>
    %cst_250 = arith.constant dense<0.000000e+00> : vector<8xf32>
    %605 = vector.multi_reduction <add>, %604, %cst_250 [1] : vector<8x32xf32> to vector<8xf32>
    %606 = vector.shape_cast %605 : vector<8xf32> to vector<8x1xf32>
    %cst_251 = arith.constant 3.200000e+01 : f32
    %607 = vector.broadcast %cst_251 : f32 to vector<8x1xf32>
    %608 = arith.divf %606, %607 : vector<8x1xf32>
    %609 = vector.broadcast %601 : vector<8x1xf32> to vector<8x32xf32>
    %610 = arith.subf %597, %609 : vector<8x32xf32>
    %cst_252 = arith.constant 9.99999974E-6 : f32
    %611 = vector.broadcast %cst_252 : f32 to vector<8x1xf32>
    %612 = arith.addf %608, %611 : vector<8x1xf32>
    %613 = math.rsqrt %612 : vector<8x1xf32>
    %614 = vector.broadcast %613 : vector<8x1xf32> to vector<8x32xf32>
    %615 = arith.mulf %610, %614 : vector<8x32xf32>
    %616 = vector.broadcast %479 : vector<1x32xf32> to vector<8x32xf32>
    %617 = arith.mulf %615, %616 : vector<8x32xf32>
    %618 = vector.broadcast %481 : vector<1x32xf32> to vector<8x32xf32>
    %619 = arith.addf %617, %618 : vector<8x32xf32>
    %cst_253 = arith.constant dense<0.000000e+00> : vector<8x96xf32>
    %620 = tpu.matmul %619, %483, %cst_253 {dimension_numbers = #tpu.dot_dimension_numbers<[1], [0], [0], [1], [0, 0, 1, 1], [], []>} : vector<8x32xf32>, vector<32x96xf32>, vector<8x96xf32> -> vector<8x96xf32>
    %621 = vector.extract_strided_slice %620 {offsets = [0, 0], sizes = [8, 32], strides = [1, 1]} : vector<8x96xf32> to vector<8x32xf32>
    %622 = vector.extract_strided_slice %620 {offsets = [0, 32], sizes = [8, 32], strides = [1, 1]} : vector<8x96xf32> to vector<8x32xf32>
    %623 = vector.extract_strided_slice %620 {offsets = [0, 64], sizes = [8, 32], strides = [1, 1]} : vector<8x96xf32> to vector<8x32xf32>
    %624 = vector.extract_strided_slice %621 {offsets = [0, 0], sizes = [8, 16], strides = [1, 1]} : vector<8x32xf32> to vector<8x16xf32>
    %625 = vector.extract_strided_slice %622 {offsets = [0, 0], sizes = [8, 16], strides = [1, 1]} : vector<8x32xf32> to vector<8x16xf32>
    %626 = vector.extract_strided_slice %623 {offsets = [0, 0], sizes = [8, 16], strides = [1, 1]} : vector<8x32xf32> to vector<8x16xf32>
    %cst_254 = arith.constant 2.500000e-01 : f32
    %627 = vector.broadcast %cst_254 : f32 to vector<8x16xf32>
    %628 = arith.mulf %624, %627 : vector<8x16xf32>
    %629 = tpu.transpose %625, [1, 0] : vector<8x16xf32> -> vector<16x8xf32>
    %cst_255 = arith.constant dense<0.000000e+00> : vector<8x8xf32>
    %630 = tpu.matmul %628, %629, %cst_255 {dimension_numbers = #tpu.dot_dimension_numbers<[1], [0], [0], [1], [0, 0, 1, 1], [], []>} : vector<8x16xf32>, vector<16x8xf32>, vector<8x8xf32> -> vector<8x8xf32>
    %cst_256 = arith.constant -1.000000e+09 : f32
    %631 = vector.broadcast %cst_256 : f32 to vector<8x8xf32>
    %632 = arith.select %7, %631, %630 : vector<8x8xi1>, vector<8x8xf32>
    %cst_257 = arith.constant dense<0xFF800000> : vector<8xf32>
    %633 = vector.multi_reduction <maximumf>, %632, %cst_257 [1] : vector<8x8xf32> to vector<8xf32>
    %634 = vector.shape_cast %633 : vector<8xf32> to vector<8x1xf32>
    %635 = vector.broadcast %634 : vector<8x1xf32> to vector<8x8xf32>
    %636 = arith.subf %632, %635 : vector<8x8xf32>
    %637 = math.exp %636 : vector<8x8xf32>
    %cst_258 = arith.constant dense<0.000000e+00> : vector<8xf32>
    %638 = vector.multi_reduction <add>, %637, %cst_258 [1] : vector<8x8xf32> to vector<8xf32>
    %639 = vector.shape_cast %638 : vector<8xf32> to vector<8x1xf32>
    %640 = tpu.reciprocal %639 {approx = true} : vector<8x1xf32> -> vector<8x1xf32>
    %641 = vector.broadcast %640 : vector<8x1xf32> to vector<8x8xf32>
    %642 = arith.mulf %637, %641 : vector<8x8xf32>
    %cst_259 = arith.constant dense<0.000000e+00> : vector<8x16xf32>
    %643 = tpu.matmul %642, %626, %cst_259 {dimension_numbers = #tpu.dot_dimension_numbers<[1], [0], [0], [1], [0, 0, 1, 1], [], []>} : vector<8x8xf32>, vector<8x16xf32>, vector<8x16xf32> -> vector<8x16xf32>
    %644 = vector.extract_strided_slice %621 {offsets = [0, 16], sizes = [8, 16], strides = [1, 1]} : vector<8x32xf32> to vector<8x16xf32>
    %645 = vector.extract_strided_slice %622 {offsets = [0, 16], sizes = [8, 16], strides = [1, 1]} : vector<8x32xf32> to vector<8x16xf32>
    %646 = vector.extract_strided_slice %623 {offsets = [0, 16], sizes = [8, 16], strides = [1, 1]} : vector<8x32xf32> to vector<8x16xf32>
    %cst_260 = arith.constant 2.500000e-01 : f32
    %647 = vector.broadcast %cst_260 : f32 to vector<8x16xf32>
    %648 = arith.mulf %644, %647 : vector<8x16xf32>
    %649 = tpu.transpose %645, [1, 0] : vector<8x16xf32> -> vector<16x8xf32>
    %cst_261 = arith.constant dense<0.000000e+00> : vector<8x8xf32>
    %650 = tpu.matmul %648, %649, %cst_261 {dimension_numbers = #tpu.dot_dimension_numbers<[1], [0], [0], [1], [0, 0, 1, 1], [], []>} : vector<8x16xf32>, vector<16x8xf32>, vector<8x8xf32> -> vector<8x8xf32>
    %cst_262 = arith.constant -1.000000e+09 : f32
    %651 = vector.broadcast %cst_262 : f32 to vector<8x8xf32>
    %652 = arith.select %7, %651, %650 : vector<8x8xi1>, vector<8x8xf32>
    %cst_263 = arith.constant dense<0xFF800000> : vector<8xf32>
    %653 = vector.multi_reduction <maximumf>, %652, %cst_263 [1] : vector<8x8xf32> to vector<8xf32>
    %654 = vector.shape_cast %653 : vector<8xf32> to vector<8x1xf32>
    %655 = vector.broadcast %654 : vector<8x1xf32> to vector<8x8xf32>
    %656 = arith.subf %652, %655 : vector<8x8xf32>
    %657 = math.exp %656 : vector<8x8xf32>
    %cst_264 = arith.constant dense<0.000000e+00> : vector<8xf32>
    %658 = vector.multi_reduction <add>, %657, %cst_264 [1] : vector<8x8xf32> to vector<8xf32>
    %659 = vector.shape_cast %658 : vector<8xf32> to vector<8x1xf32>
    %660 = tpu.reciprocal %659 {approx = true} : vector<8x1xf32> -> vector<8x1xf32>
    %661 = vector.broadcast %660 : vector<8x1xf32> to vector<8x8xf32>
    %662 = arith.mulf %657, %661 : vector<8x8xf32>
    %cst_265 = arith.constant dense<0.000000e+00> : vector<8x16xf32>
    %663 = tpu.matmul %662, %646, %cst_265 {dimension_numbers = #tpu.dot_dimension_numbers<[1], [0], [0], [1], [0, 0, 1, 1], [], []>} : vector<8x8xf32>, vector<8x16xf32>, vector<8x16xf32> -> vector<8x16xf32>
    %664 = tpu.concatenate %643, %663 in 1 : vector<8x16xf32>, vector<8x16xf32> -> vector<8x32xf32>
    %cst_266 = arith.constant dense<0.000000e+00> : vector<8x32xf32>
    %665 = tpu.matmul %664, %485, %cst_266 {dimension_numbers = #tpu.dot_dimension_numbers<[1], [0], [0], [1], [0, 0, 1, 1], [], []>} : vector<8x32xf32>, vector<32x32xf32>, vector<8x32xf32> -> vector<8x32xf32>
    %666 = arith.addf %665, %597 : vector<8x32xf32>
    %cst_267 = arith.constant dense<0.000000e+00> : vector<8xf32>
    %667 = vector.multi_reduction <add>, %666, %cst_267 [1] : vector<8x32xf32> to vector<8xf32>
    %668 = vector.shape_cast %667 : vector<8xf32> to vector<8x1xf32>
    %cst_268 = arith.constant 3.200000e+01 : f32
    %669 = vector.broadcast %cst_268 : f32 to vector<8x1xf32>
    %670 = arith.divf %668, %669 : vector<8x1xf32>
    %671 = vector.broadcast %670 : vector<8x1xf32> to vector<8x32xf32>
    %672 = arith.subf %666, %671 : vector<8x32xf32>
    %673 = arith.mulf %672, %672 : vector<8x32xf32>
    %cst_269 = arith.constant dense<0.000000e+00> : vector<8xf32>
    %674 = vector.multi_reduction <add>, %673, %cst_269 [1] : vector<8x32xf32> to vector<8xf32>
    %675 = vector.shape_cast %674 : vector<8xf32> to vector<8x1xf32>
    %cst_270 = arith.constant 3.200000e+01 : f32
    %676 = vector.broadcast %cst_270 : f32 to vector<8x1xf32>
    %677 = arith.divf %675, %676 : vector<8x1xf32>
    %678 = vector.broadcast %670 : vector<8x1xf32> to vector<8x32xf32>
    %679 = arith.subf %666, %678 : vector<8x32xf32>
    %cst_271 = arith.constant 9.99999997E-7 : f32
    %680 = vector.broadcast %cst_271 : f32 to vector<8x1xf32>
    %681 = arith.addf %677, %680 : vector<8x1xf32>
    %682 = math.rsqrt %681 : vector<8x1xf32>
    %683 = vector.broadcast %682 : vector<8x1xf32> to vector<8x32xf32>
    %684 = arith.mulf %679, %683 : vector<8x32xf32>
    %685 = vector.broadcast %487 : vector<1x32xf32> to vector<8x32xf32>
    %686 = arith.mulf %684, %685 : vector<8x32xf32>
    %687 = vector.broadcast %489 : vector<1x32xf32> to vector<8x32xf32>
    %688 = arith.addf %686, %687 : vector<8x32xf32>
    %cst_272 = arith.constant dense<0.000000e+00> : vector<8x64xf32>
    %689 = tpu.matmul %688, %491, %cst_272 {dimension_numbers = #tpu.dot_dimension_numbers<[1], [0], [0], [1], [0, 0, 1, 1], [], []>} : vector<8x32xf32>, vector<32x64xf32>, vector<8x64xf32> -> vector<8x64xf32>
    %690 = vector.broadcast %493 : vector<1x64xf32> to vector<8x64xf32>
    %691 = arith.addf %689, %690 : vector<8x64xf32>
    %cst_273 = arith.constant 0.000000e+00 : f32
    %692 = vector.broadcast %cst_273 : f32 to vector<8x64xf32>
    %693 = arith.maximumf %691, %692 : vector<8x64xf32>
    %cst_274 = arith.constant dense<0.000000e+00> : vector<8x32xf32>
    %694 = tpu.matmul %693, %495, %cst_274 {dimension_numbers = #tpu.dot_dimension_numbers<[1], [0], [0], [1], [0, 0, 1, 1], [], []>} : vector<8x64xf32>, vector<64x32xf32>, vector<8x32xf32> -> vector<8x32xf32>
    %695 = vector.broadcast %497 : vector<1x32xf32> to vector<8x32xf32>
    %696 = arith.addf %694, %695 : vector<8x32xf32>
    %697 = arith.addf %696, %666 : vector<8x32xf32>
    %c1_275 = arith.constant 1 : index
    %c0_276 = arith.constant 0 : index
    %c0_277 = arith.constant 0 : index
    %698 = vector.load %arg20[%c1_275, %c0_276, %c0_277] : memref<2x1x32xf32, #tpu.memory_space<vmem>>, vector<1x1x32xf32>
    %699 = vector.shape_cast %698 : vector<1x1x32xf32> to vector<1x32xf32>
    %c1_278 = arith.constant 1 : index
    %c0_279 = arith.constant 0 : index
    %c0_280 = arith.constant 0 : index
    %700 = vector.load %arg21[%c1_278, %c0_279, %c0_280] : memref<2x1x32xf32, #tpu.memory_space<vmem>>, vector<1x1x32xf32>
    %701 = vector.shape_cast %700 : vector<1x1x32xf32> to vector<1x32xf32>
    %c1_281 = arith.constant 1 : index
    %c0_282 = arith.constant 0 : index
    %c0_283 = arith.constant 0 : index
    %702 = vector.load %arg22[%c1_281, %c0_282, %c0_283] : memref<2x32x96xf32, #tpu.memory_space<vmem>>, vector<1x32x96xf32>
    %703 = vector.shape_cast %702 : vector<1x32x96xf32> to vector<32x96xf32>
    %c1_284 = arith.constant 1 : index
    %c0_285 = arith.constant 0 : index
    %c0_286 = arith.constant 0 : index
    %704 = vector.load %arg23[%c1_284, %c0_285, %c0_286] : memref<2x32x32xf32, #tpu.memory_space<vmem>>, vector<1x32x32xf32>
    %705 = vector.shape_cast %704 : vector<1x32x32xf32> to vector<32x32xf32>
    %c1_287 = arith.constant 1 : index
    %c0_288 = arith.constant 0 : index
    %c0_289 = arith.constant 0 : index
    %706 = vector.load %arg24[%c1_287, %c0_288, %c0_289] : memref<2x1x32xf32, #tpu.memory_space<vmem>>, vector<1x1x32xf32>
    %707 = vector.shape_cast %706 : vector<1x1x32xf32> to vector<1x32xf32>
    %c1_290 = arith.constant 1 : index
    %c0_291 = arith.constant 0 : index
    %c0_292 = arith.constant 0 : index
    %708 = vector.load %arg25[%c1_290, %c0_291, %c0_292] : memref<2x1x32xf32, #tpu.memory_space<vmem>>, vector<1x1x32xf32>
    %709 = vector.shape_cast %708 : vector<1x1x32xf32> to vector<1x32xf32>
    %c1_293 = arith.constant 1 : index
    %c0_294 = arith.constant 0 : index
    %c0_295 = arith.constant 0 : index
    %710 = vector.load %arg26[%c1_293, %c0_294, %c0_295] : memref<2x32x64xf32, #tpu.memory_space<vmem>>, vector<1x32x64xf32>
    %711 = vector.shape_cast %710 : vector<1x32x64xf32> to vector<32x64xf32>
    %c1_296 = arith.constant 1 : index
    %c0_297 = arith.constant 0 : index
    %c0_298 = arith.constant 0 : index
    %712 = vector.load %arg27[%c1_296, %c0_297, %c0_298] : memref<2x1x64xf32, #tpu.memory_space<vmem>>, vector<1x1x64xf32>
    %713 = vector.shape_cast %712 : vector<1x1x64xf32> to vector<1x64xf32>
    %c1_299 = arith.constant 1 : index
    %c0_300 = arith.constant 0 : index
    %c0_301 = arith.constant 0 : index
    %714 = vector.load %arg28[%c1_299, %c0_300, %c0_301] : memref<2x64x32xf32, #tpu.memory_space<vmem>>, vector<1x64x32xf32>
    %715 = vector.shape_cast %714 : vector<1x64x32xf32> to vector<64x32xf32>
    %c1_302 = arith.constant 1 : index
    %c0_303 = arith.constant 0 : index
    %c0_304 = arith.constant 0 : index
    %716 = vector.load %arg29[%c1_302, %c0_303, %c0_304] : memref<2x1x32xf32, #tpu.memory_space<vmem>>, vector<1x1x32xf32>
    %717 = vector.shape_cast %716 : vector<1x1x32xf32> to vector<1x32xf32>
    %cst_305 = arith.constant dense<0.000000e+00> : vector<8xf32>
    %718 = vector.multi_reduction <add>, %697, %cst_305 [1] : vector<8x32xf32> to vector<8xf32>
    %719 = vector.shape_cast %718 : vector<8xf32> to vector<8x1xf32>
    %cst_306 = arith.constant 3.200000e+01 : f32
    %720 = vector.broadcast %cst_306 : f32 to vector<8x1xf32>
    %721 = arith.divf %719, %720 : vector<8x1xf32>
    %722 = vector.broadcast %721 : vector<8x1xf32> to vector<8x32xf32>
    %723 = arith.subf %697, %722 : vector<8x32xf32>
    %724 = arith.mulf %723, %723 : vector<8x32xf32>
    %cst_307 = arith.constant dense<0.000000e+00> : vector<8xf32>
    %725 = vector.multi_reduction <add>, %724, %cst_307 [1] : vector<8x32xf32> to vector<8xf32>
    %726 = vector.shape_cast %725 : vector<8xf32> to vector<8x1xf32>
    %cst_308 = arith.constant 3.200000e+01 : f32
    %727 = vector.broadcast %cst_308 : f32 to vector<8x1xf32>
    %728 = arith.divf %726, %727 : vector<8x1xf32>
    %729 = vector.broadcast %721 : vector<8x1xf32> to vector<8x32xf32>
    %730 = arith.subf %697, %729 : vector<8x32xf32>
    %cst_309 = arith.constant 9.99999974E-6 : f32
    %731 = vector.broadcast %cst_309 : f32 to vector<8x1xf32>
    %732 = arith.addf %728, %731 : vector<8x1xf32>
    %733 = math.rsqrt %732 : vector<8x1xf32>
    %734 = vector.broadcast %733 : vector<8x1xf32> to vector<8x32xf32>
    %735 = arith.mulf %730, %734 : vector<8x32xf32>
    %736 = vector.broadcast %699 : vector<1x32xf32> to vector<8x32xf32>
    %737 = arith.mulf %735, %736 : vector<8x32xf32>
    %738 = vector.broadcast %701 : vector<1x32xf32> to vector<8x32xf32>
    %739 = arith.addf %737, %738 : vector<8x32xf32>
    %cst_310 = arith.constant dense<0.000000e+00> : vector<8x96xf32>
    %740 = tpu.matmul %739, %703, %cst_310 {dimension_numbers = #tpu.dot_dimension_numbers<[1], [0], [0], [1], [0, 0, 1, 1], [], []>} : vector<8x32xf32>, vector<32x96xf32>, vector<8x96xf32> -> vector<8x96xf32>
    %741 = vector.extract_strided_slice %740 {offsets = [0, 0], sizes = [8, 32], strides = [1, 1]} : vector<8x96xf32> to vector<8x32xf32>
    %742 = vector.extract_strided_slice %740 {offsets = [0, 32], sizes = [8, 32], strides = [1, 1]} : vector<8x96xf32> to vector<8x32xf32>
    %743 = vector.extract_strided_slice %740 {offsets = [0, 64], sizes = [8, 32], strides = [1, 1]} : vector<8x96xf32> to vector<8x32xf32>
    %744 = vector.extract_strided_slice %741 {offsets = [0, 0], sizes = [8, 16], strides = [1, 1]} : vector<8x32xf32> to vector<8x16xf32>
    %745 = vector.extract_strided_slice %742 {offsets = [0, 0], sizes = [8, 16], strides = [1, 1]} : vector<8x32xf32> to vector<8x16xf32>
    %746 = vector.extract_strided_slice %743 {offsets = [0, 0], sizes = [8, 16], strides = [1, 1]} : vector<8x32xf32> to vector<8x16xf32>
    %cst_311 = arith.constant 2.500000e-01 : f32
    %747 = vector.broadcast %cst_311 : f32 to vector<8x16xf32>
    %748 = arith.mulf %744, %747 : vector<8x16xf32>
    %749 = tpu.transpose %745, [1, 0] : vector<8x16xf32> -> vector<16x8xf32>
    %cst_312 = arith.constant dense<0.000000e+00> : vector<8x8xf32>
    %750 = tpu.matmul %748, %749, %cst_312 {dimension_numbers = #tpu.dot_dimension_numbers<[1], [0], [0], [1], [0, 0, 1, 1], [], []>} : vector<8x16xf32>, vector<16x8xf32>, vector<8x8xf32> -> vector<8x8xf32>
    %cst_313 = arith.constant -1.000000e+09 : f32
    %751 = vector.broadcast %cst_313 : f32 to vector<8x8xf32>
    %752 = arith.select %7, %751, %750 : vector<8x8xi1>, vector<8x8xf32>
    %cst_314 = arith.constant dense<0xFF800000> : vector<8xf32>
    %753 = vector.multi_reduction <maximumf>, %752, %cst_314 [1] : vector<8x8xf32> to vector<8xf32>
    %754 = vector.shape_cast %753 : vector<8xf32> to vector<8x1xf32>
    %755 = vector.broadcast %754 : vector<8x1xf32> to vector<8x8xf32>
    %756 = arith.subf %752, %755 : vector<8x8xf32>
    %757 = math.exp %756 : vector<8x8xf32>
    %cst_315 = arith.constant dense<0.000000e+00> : vector<8xf32>
    %758 = vector.multi_reduction <add>, %757, %cst_315 [1] : vector<8x8xf32> to vector<8xf32>
    %759 = vector.shape_cast %758 : vector<8xf32> to vector<8x1xf32>
    %760 = tpu.reciprocal %759 {approx = true} : vector<8x1xf32> -> vector<8x1xf32>
    %761 = vector.broadcast %760 : vector<8x1xf32> to vector<8x8xf32>
    %762 = arith.mulf %757, %761 : vector<8x8xf32>
    %cst_316 = arith.constant dense<0.000000e+00> : vector<8x16xf32>
    %763 = tpu.matmul %762, %746, %cst_316 {dimension_numbers = #tpu.dot_dimension_numbers<[1], [0], [0], [1], [0, 0, 1, 1], [], []>} : vector<8x8xf32>, vector<8x16xf32>, vector<8x16xf32> -> vector<8x16xf32>
    %764 = vector.extract_strided_slice %741 {offsets = [0, 16], sizes = [8, 16], strides = [1, 1]} : vector<8x32xf32> to vector<8x16xf32>
    %765 = vector.extract_strided_slice %742 {offsets = [0, 16], sizes = [8, 16], strides = [1, 1]} : vector<8x32xf32> to vector<8x16xf32>
    %766 = vector.extract_strided_slice %743 {offsets = [0, 16], sizes = [8, 16], strides = [1, 1]} : vector<8x32xf32> to vector<8x16xf32>
    %cst_317 = arith.constant 2.500000e-01 : f32
    %767 = vector.broadcast %cst_317 : f32 to vector<8x16xf32>
    %768 = arith.mulf %764, %767 : vector<8x16xf32>
    %769 = tpu.transpose %765, [1, 0] : vector<8x16xf32> -> vector<16x8xf32>
    %cst_318 = arith.constant dense<0.000000e+00> : vector<8x8xf32>
    %770 = tpu.matmul %768, %769, %cst_318 {dimension_numbers = #tpu.dot_dimension_numbers<[1], [0], [0], [1], [0, 0, 1, 1], [], []>} : vector<8x16xf32>, vector<16x8xf32>, vector<8x8xf32> -> vector<8x8xf32>
    %cst_319 = arith.constant -1.000000e+09 : f32
    %771 = vector.broadcast %cst_319 : f32 to vector<8x8xf32>
    %772 = arith.select %7, %771, %770 : vector<8x8xi1>, vector<8x8xf32>
    %cst_320 = arith.constant dense<0xFF800000> : vector<8xf32>
    %773 = vector.multi_reduction <maximumf>, %772, %cst_320 [1] : vector<8x8xf32> to vector<8xf32>
    %774 = vector.shape_cast %773 : vector<8xf32> to vector<8x1xf32>
    %775 = vector.broadcast %774 : vector<8x1xf32> to vector<8x8xf32>
    %776 = arith.subf %772, %775 : vector<8x8xf32>
    %777 = math.exp %776 : vector<8x8xf32>
    %cst_321 = arith.constant dense<0.000000e+00> : vector<8xf32>
    %778 = vector.multi_reduction <add>, %777, %cst_321 [1] : vector<8x8xf32> to vector<8xf32>
    %779 = vector.shape_cast %778 : vector<8xf32> to vector<8x1xf32>
    %780 = tpu.reciprocal %779 {approx = true} : vector<8x1xf32> -> vector<8x1xf32>
    %781 = vector.broadcast %780 : vector<8x1xf32> to vector<8x8xf32>
    %782 = arith.mulf %777, %781 : vector<8x8xf32>
    %cst_322 = arith.constant dense<0.000000e+00> : vector<8x16xf32>
    %783 = tpu.matmul %782, %766, %cst_322 {dimension_numbers = #tpu.dot_dimension_numbers<[1], [0], [0], [1], [0, 0, 1, 1], [], []>} : vector<8x8xf32>, vector<8x16xf32>, vector<8x16xf32> -> vector<8x16xf32>
    %784 = tpu.concatenate %763, %783 in 1 : vector<8x16xf32>, vector<8x16xf32> -> vector<8x32xf32>
    %cst_323 = arith.constant dense<0.000000e+00> : vector<8x32xf32>
    %785 = tpu.matmul %784, %705, %cst_323 {dimension_numbers = #tpu.dot_dimension_numbers<[1], [0], [0], [1], [0, 0, 1, 1], [], []>} : vector<8x32xf32>, vector<32x32xf32>, vector<8x32xf32> -> vector<8x32xf32>
    %786 = arith.addf %785, %697 : vector<8x32xf32>
    %cst_324 = arith.constant dense<0.000000e+00> : vector<8xf32>
    %787 = vector.multi_reduction <add>, %786, %cst_324 [1] : vector<8x32xf32> to vector<8xf32>
    %788 = vector.shape_cast %787 : vector<8xf32> to vector<8x1xf32>
    %cst_325 = arith.constant 3.200000e+01 : f32
    %789 = vector.broadcast %cst_325 : f32 to vector<8x1xf32>
    %790 = arith.divf %788, %789 : vector<8x1xf32>
    %791 = vector.broadcast %790 : vector<8x1xf32> to vector<8x32xf32>
    %792 = arith.subf %786, %791 : vector<8x32xf32>
    %793 = arith.mulf %792, %792 : vector<8x32xf32>
    %cst_326 = arith.constant dense<0.000000e+00> : vector<8xf32>
    %794 = vector.multi_reduction <add>, %793, %cst_326 [1] : vector<8x32xf32> to vector<8xf32>
    %795 = vector.shape_cast %794 : vector<8xf32> to vector<8x1xf32>
    %cst_327 = arith.constant 3.200000e+01 : f32
    %796 = vector.broadcast %cst_327 : f32 to vector<8x1xf32>
    %797 = arith.divf %795, %796 : vector<8x1xf32>
    %798 = vector.broadcast %790 : vector<8x1xf32> to vector<8x32xf32>
    %799 = arith.subf %786, %798 : vector<8x32xf32>
    %cst_328 = arith.constant 9.99999997E-7 : f32
    %800 = vector.broadcast %cst_328 : f32 to vector<8x1xf32>
    %801 = arith.addf %797, %800 : vector<8x1xf32>
    %802 = math.rsqrt %801 : vector<8x1xf32>
    %803 = vector.broadcast %802 : vector<8x1xf32> to vector<8x32xf32>
    %804 = arith.mulf %799, %803 : vector<8x32xf32>
    %805 = vector.broadcast %707 : vector<1x32xf32> to vector<8x32xf32>
    %806 = arith.mulf %804, %805 : vector<8x32xf32>
    %807 = vector.broadcast %709 : vector<1x32xf32> to vector<8x32xf32>
    %808 = arith.addf %806, %807 : vector<8x32xf32>
    %cst_329 = arith.constant dense<0.000000e+00> : vector<8x64xf32>
    %809 = tpu.matmul %808, %711, %cst_329 {dimension_numbers = #tpu.dot_dimension_numbers<[1], [0], [0], [1], [0, 0, 1, 1], [], []>} : vector<8x32xf32>, vector<32x64xf32>, vector<8x64xf32> -> vector<8x64xf32>
    %810 = vector.broadcast %713 : vector<1x64xf32> to vector<8x64xf32>
    %811 = arith.addf %809, %810 : vector<8x64xf32>
    %cst_330 = arith.constant 0.000000e+00 : f32
    %812 = vector.broadcast %cst_330 : f32 to vector<8x64xf32>
    %813 = arith.maximumf %811, %812 : vector<8x64xf32>
    %cst_331 = arith.constant dense<0.000000e+00> : vector<8x32xf32>
    %814 = tpu.matmul %813, %715, %cst_331 {dimension_numbers = #tpu.dot_dimension_numbers<[1], [0], [0], [1], [0, 0, 1, 1], [], []>} : vector<8x64xf32>, vector<64x32xf32>, vector<8x32xf32> -> vector<8x32xf32>
    %815 = vector.broadcast %717 : vector<1x32xf32> to vector<8x32xf32>
    %816 = arith.addf %814, %815 : vector<8x32xf32>
    %817 = arith.addf %816, %786 : vector<8x32xf32>
    %cst_332 = arith.constant dense<0.000000e+00> : vector<8xf32>
    %818 = vector.multi_reduction <add>, %817, %cst_332 [1] : vector<8x32xf32> to vector<8xf32>
    %819 = vector.shape_cast %818 : vector<8xf32> to vector<8x1xf32>
    %cst_333 = arith.constant 3.200000e+01 : f32
    %820 = vector.broadcast %cst_333 : f32 to vector<8x1xf32>
    %821 = arith.divf %819, %820 : vector<8x1xf32>
    %822 = vector.broadcast %821 : vector<8x1xf32> to vector<8x32xf32>
    %823 = arith.subf %817, %822 : vector<8x32xf32>
    %824 = arith.mulf %823, %823 : vector<8x32xf32>
    %cst_334 = arith.constant dense<0.000000e+00> : vector<8xf32>
    %825 = vector.multi_reduction <add>, %824, %cst_334 [1] : vector<8x32xf32> to vector<8xf32>
    %826 = vector.shape_cast %825 : vector<8xf32> to vector<8x1xf32>
    %cst_335 = arith.constant 3.200000e+01 : f32
    %827 = vector.broadcast %cst_335 : f32 to vector<8x1xf32>
    %828 = arith.divf %826, %827 : vector<8x1xf32>
    %829 = vector.broadcast %821 : vector<8x1xf32> to vector<8x32xf32>
    %830 = arith.subf %817, %829 : vector<8x32xf32>
    %cst_336 = arith.constant 9.99999974E-6 : f32
    %831 = vector.broadcast %cst_336 : f32 to vector<8x1xf32>
    %832 = arith.addf %828, %831 : vector<8x1xf32>
    %833 = math.rsqrt %832 : vector<8x1xf32>
    %834 = vector.broadcast %833 : vector<8x1xf32> to vector<8x32xf32>
    %835 = arith.mulf %830, %834 : vector<8x32xf32>
    %836 = vector.broadcast %699 : vector<1x32xf32> to vector<8x32xf32>
    %837 = arith.mulf %835, %836 : vector<8x32xf32>
    %838 = vector.broadcast %701 : vector<1x32xf32> to vector<8x32xf32>
    %839 = arith.addf %837, %838 : vector<8x32xf32>
    %cst_337 = arith.constant dense<0.000000e+00> : vector<8x96xf32>
    %840 = tpu.matmul %839, %703, %cst_337 {dimension_numbers = #tpu.dot_dimension_numbers<[1], [0], [0], [1], [0, 0, 1, 1], [], []>} : vector<8x32xf32>, vector<32x96xf32>, vector<8x96xf32> -> vector<8x96xf32>
    %841 = vector.extract_strided_slice %840 {offsets = [0, 0], sizes = [8, 32], strides = [1, 1]} : vector<8x96xf32> to vector<8x32xf32>
    %842 = vector.extract_strided_slice %840 {offsets = [0, 32], sizes = [8, 32], strides = [1, 1]} : vector<8x96xf32> to vector<8x32xf32>
    %843 = vector.extract_strided_slice %840 {offsets = [0, 64], sizes = [8, 32], strides = [1, 1]} : vector<8x96xf32> to vector<8x32xf32>
    %844 = vector.extract_strided_slice %841 {offsets = [0, 0], sizes = [8, 16], strides = [1, 1]} : vector<8x32xf32> to vector<8x16xf32>
    %845 = vector.extract_strided_slice %842 {offsets = [0, 0], sizes = [8, 16], strides = [1, 1]} : vector<8x32xf32> to vector<8x16xf32>
    %846 = vector.extract_strided_slice %843 {offsets = [0, 0], sizes = [8, 16], strides = [1, 1]} : vector<8x32xf32> to vector<8x16xf32>
    %cst_338 = arith.constant 2.500000e-01 : f32
    %847 = vector.broadcast %cst_338 : f32 to vector<8x16xf32>
    %848 = arith.mulf %844, %847 : vector<8x16xf32>
    %849 = tpu.transpose %845, [1, 0] : vector<8x16xf32> -> vector<16x8xf32>
    %cst_339 = arith.constant dense<0.000000e+00> : vector<8x8xf32>
    %850 = tpu.matmul %848, %849, %cst_339 {dimension_numbers = #tpu.dot_dimension_numbers<[1], [0], [0], [1], [0, 0, 1, 1], [], []>} : vector<8x16xf32>, vector<16x8xf32>, vector<8x8xf32> -> vector<8x8xf32>
    %cst_340 = arith.constant -1.000000e+09 : f32
    %851 = vector.broadcast %cst_340 : f32 to vector<8x8xf32>
    %852 = arith.select %7, %851, %850 : vector<8x8xi1>, vector<8x8xf32>
    %cst_341 = arith.constant dense<0xFF800000> : vector<8xf32>
    %853 = vector.multi_reduction <maximumf>, %852, %cst_341 [1] : vector<8x8xf32> to vector<8xf32>
    %854 = vector.shape_cast %853 : vector<8xf32> to vector<8x1xf32>
    %855 = vector.broadcast %854 : vector<8x1xf32> to vector<8x8xf32>
    %856 = arith.subf %852, %855 : vector<8x8xf32>
    %857 = math.exp %856 : vector<8x8xf32>
    %cst_342 = arith.constant dense<0.000000e+00> : vector<8xf32>
    %858 = vector.multi_reduction <add>, %857, %cst_342 [1] : vector<8x8xf32> to vector<8xf32>
    %859 = vector.shape_cast %858 : vector<8xf32> to vector<8x1xf32>
    %860 = tpu.reciprocal %859 {approx = true} : vector<8x1xf32> -> vector<8x1xf32>
    %861 = vector.broadcast %860 : vector<8x1xf32> to vector<8x8xf32>
    %862 = arith.mulf %857, %861 : vector<8x8xf32>
    %cst_343 = arith.constant dense<0.000000e+00> : vector<8x16xf32>
    %863 = tpu.matmul %862, %846, %cst_343 {dimension_numbers = #tpu.dot_dimension_numbers<[1], [0], [0], [1], [0, 0, 1, 1], [], []>} : vector<8x8xf32>, vector<8x16xf32>, vector<8x16xf32> -> vector<8x16xf32>
    %864 = vector.extract_strided_slice %841 {offsets = [0, 16], sizes = [8, 16], strides = [1, 1]} : vector<8x32xf32> to vector<8x16xf32>
    %865 = vector.extract_strided_slice %842 {offsets = [0, 16], sizes = [8, 16], strides = [1, 1]} : vector<8x32xf32> to vector<8x16xf32>
    %866 = vector.extract_strided_slice %843 {offsets = [0, 16], sizes = [8, 16], strides = [1, 1]} : vector<8x32xf32> to vector<8x16xf32>
    %cst_344 = arith.constant 2.500000e-01 : f32
    %867 = vector.broadcast %cst_344 : f32 to vector<8x16xf32>
    %868 = arith.mulf %864, %867 : vector<8x16xf32>
    %869 = tpu.transpose %865, [1, 0] : vector<8x16xf32> -> vector<16x8xf32>
    %cst_345 = arith.constant dense<0.000000e+00> : vector<8x8xf32>
    %870 = tpu.matmul %868, %869, %cst_345 {dimension_numbers = #tpu.dot_dimension_numbers<[1], [0], [0], [1], [0, 0, 1, 1], [], []>} : vector<8x16xf32>, vector<16x8xf32>, vector<8x8xf32> -> vector<8x8xf32>
    %cst_346 = arith.constant -1.000000e+09 : f32
    %871 = vector.broadcast %cst_346 : f32 to vector<8x8xf32>
    %872 = arith.select %7, %871, %870 : vector<8x8xi1>, vector<8x8xf32>
    %cst_347 = arith.constant dense<0xFF800000> : vector<8xf32>
    %873 = vector.multi_reduction <maximumf>, %872, %cst_347 [1] : vector<8x8xf32> to vector<8xf32>
    %874 = vector.shape_cast %873 : vector<8xf32> to vector<8x1xf32>
    %875 = vector.broadcast %874 : vector<8x1xf32> to vector<8x8xf32>
    %876 = arith.subf %872, %875 : vector<8x8xf32>
    %877 = math.exp %876 : vector<8x8xf32>
    %cst_348 = arith.constant dense<0.000000e+00> : vector<8xf32>
    %878 = vector.multi_reduction <add>, %877, %cst_348 [1] : vector<8x8xf32> to vector<8xf32>
    %879 = vector.shape_cast %878 : vector<8xf32> to vector<8x1xf32>
    %880 = tpu.reciprocal %879 {approx = true} : vector<8x1xf32> -> vector<8x1xf32>
    %881 = vector.broadcast %880 : vector<8x1xf32> to vector<8x8xf32>
    %882 = arith.mulf %877, %881 : vector<8x8xf32>
    %cst_349 = arith.constant dense<0.000000e+00> : vector<8x16xf32>
    %883 = tpu.matmul %882, %866, %cst_349 {dimension_numbers = #tpu.dot_dimension_numbers<[1], [0], [0], [1], [0, 0, 1, 1], [], []>} : vector<8x8xf32>, vector<8x16xf32>, vector<8x16xf32> -> vector<8x16xf32>
    %884 = arith.addf %862, %882 : vector<8x8xf32>
    %885 = tpu.concatenate %863, %883 in 1 : vector<8x16xf32>, vector<8x16xf32> -> vector<8x32xf32>
    %cst_350 = arith.constant dense<0.000000e+00> : vector<8x32xf32>
    %886 = tpu.matmul %885, %705, %cst_350 {dimension_numbers = #tpu.dot_dimension_numbers<[1], [0], [0], [1], [0, 0, 1, 1], [], []>} : vector<8x32xf32>, vector<32x32xf32>, vector<8x32xf32> -> vector<8x32xf32>
    %887 = arith.addf %886, %817 : vector<8x32xf32>
    %cst_351 = arith.constant dense<0.000000e+00> : vector<8xf32>
    %888 = vector.multi_reduction <add>, %887, %cst_351 [1] : vector<8x32xf32> to vector<8xf32>
    %889 = vector.shape_cast %888 : vector<8xf32> to vector<8x1xf32>
    %cst_352 = arith.constant 3.200000e+01 : f32
    %890 = vector.broadcast %cst_352 : f32 to vector<8x1xf32>
    %891 = arith.divf %889, %890 : vector<8x1xf32>
    %892 = vector.broadcast %891 : vector<8x1xf32> to vector<8x32xf32>
    %893 = arith.subf %887, %892 : vector<8x32xf32>
    %894 = arith.mulf %893, %893 : vector<8x32xf32>
    %cst_353 = arith.constant dense<0.000000e+00> : vector<8xf32>
    %895 = vector.multi_reduction <add>, %894, %cst_353 [1] : vector<8x32xf32> to vector<8xf32>
    %896 = vector.shape_cast %895 : vector<8xf32> to vector<8x1xf32>
    %cst_354 = arith.constant 3.200000e+01 : f32
    %897 = vector.broadcast %cst_354 : f32 to vector<8x1xf32>
    %898 = arith.divf %896, %897 : vector<8x1xf32>
    %899 = vector.broadcast %891 : vector<8x1xf32> to vector<8x32xf32>
    %900 = arith.subf %887, %899 : vector<8x32xf32>
    %cst_355 = arith.constant 9.99999997E-7 : f32
    %901 = vector.broadcast %cst_355 : f32 to vector<8x1xf32>
    %902 = arith.addf %898, %901 : vector<8x1xf32>
    %903 = math.rsqrt %902 : vector<8x1xf32>
    %904 = vector.broadcast %903 : vector<8x1xf32> to vector<8x32xf32>
    %905 = arith.mulf %900, %904 : vector<8x32xf32>
    %906 = vector.broadcast %707 : vector<1x32xf32> to vector<8x32xf32>
    %907 = arith.mulf %905, %906 : vector<8x32xf32>
    %908 = vector.broadcast %709 : vector<1x32xf32> to vector<8x32xf32>
    %909 = arith.addf %907, %908 : vector<8x32xf32>
    %cst_356 = arith.constant dense<0.000000e+00> : vector<8x64xf32>
    %910 = tpu.matmul %909, %711, %cst_356 {dimension_numbers = #tpu.dot_dimension_numbers<[1], [0], [0], [1], [0, 0, 1, 1], [], []>} : vector<8x32xf32>, vector<32x64xf32>, vector<8x64xf32> -> vector<8x64xf32>
    %911 = vector.broadcast %713 : vector<1x64xf32> to vector<8x64xf32>
    %912 = arith.addf %910, %911 : vector<8x64xf32>
    %cst_357 = arith.constant 0.000000e+00 : f32
    %913 = vector.broadcast %cst_357 : f32 to vector<8x64xf32>
    %914 = arith.maximumf %912, %913 : vector<8x64xf32>
    %cst_358 = arith.constant dense<0.000000e+00> : vector<8x32xf32>
    %915 = tpu.matmul %914, %715, %cst_358 {dimension_numbers = #tpu.dot_dimension_numbers<[1], [0], [0], [1], [0, 0, 1, 1], [], []>} : vector<8x64xf32>, vector<64x32xf32>, vector<8x32xf32> -> vector<8x32xf32>
    %916 = vector.broadcast %717 : vector<1x32xf32> to vector<8x32xf32>
    %917 = arith.addf %915, %916 : vector<8x32xf32>
    %918 = arith.addf %917, %887 : vector<8x32xf32>
    %cst_359 = arith.constant 5.000000e-01 : f32
    %919 = vector.broadcast %cst_359 : f32 to vector<8x8xf32>
    %920 = arith.mulf %884, %919 : vector<8x8xf32>
    %c0_360 = arith.constant 0 : index
    %c0_361 = arith.constant 0 : index
    %921 = vector.load %arg30[%c0_360, %c0_361] : memref<32x16xf32, #tpu.memory_space<vmem>>, vector<32x16xf32>
    %cst_362 = arith.constant dense<0.000000e+00> : vector<8x16xf32>
    %922 = tpu.matmul %918, %921, %cst_362 {dimension_numbers = #tpu.dot_dimension_numbers<[1], [0], [0], [1], [0, 0, 1, 1], [], []>} : vector<8x32xf32>, vector<32x16xf32>, vector<8x16xf32> -> vector<8x16xf32>
    %c0_363 = arith.constant 0 : index
    %c0_364 = arith.constant 0 : index
    %923 = vector.load %arg31[%c0_363, %c0_364] : memref<1x16xf32, #tpu.memory_space<vmem>>, vector<1x16xf32>
    %924 = vector.broadcast %923 : vector<1x16xf32> to vector<8x16xf32>
    %925 = arith.addf %922, %924 : vector<8x16xf32>
    %cst_365 = arith.constant 0.000000e+00 : f32
    %926 = vector.broadcast %cst_365 : f32 to vector<8x16xf32>
    %927 = arith.maximumf %925, %926 : vector<8x16xf32>
    %c0_366 = arith.constant 0 : index
    %c0_367 = arith.constant 0 : index
    %928 = vector.load %arg32[%c0_366, %c0_367] : memref<16x16xf32, #tpu.memory_space<vmem>>, vector<16x16xf32>
    %cst_368 = arith.constant dense<0.000000e+00> : vector<8x16xf32>
    %929 = tpu.matmul %927, %928, %cst_368 {dimension_numbers = #tpu.dot_dimension_numbers<[1], [0], [0], [1], [0, 0, 1, 1], [], []>} : vector<8x16xf32>, vector<16x16xf32>, vector<8x16xf32> -> vector<8x16xf32>
    %c0_369 = arith.constant 0 : index
    %c0_370 = arith.constant 0 : index
    %930 = vector.load %arg33[%c0_369, %c0_370] : memref<1x16xf32, #tpu.memory_space<vmem>>, vector<1x16xf32>
    %931 = vector.broadcast %930 : vector<1x16xf32> to vector<8x16xf32>
    %932 = arith.addf %929, %931 : vector<8x16xf32>
    %c0_371 = arith.constant 0 : index
    %c0_372 = arith.constant 0 : index
    %933 = vector.load %arg34[%c0_371, %c0_372] : memref<24x16xf32, #tpu.memory_space<vmem>>, vector<24x16xf32>
    %934 = vector.extract_strided_slice %933 {offsets = [0, 0], sizes = [16, 16], strides = [1, 1]} : vector<24x16xf32> to vector<16x16xf32>
    %cst_373 = arith.constant dense<0.000000e+00> : vector<8x16xf32>
    %935 = tpu.matmul %3, %934, %cst_373 {dimension_numbers = #tpu.dot_dimension_numbers<[1], [0], [0], [1], [0, 0, 1, 1], [], []>} : vector<8x16xf32>, vector<16x16xf32>, vector<8x16xf32> -> vector<8x16xf32>
    %936 = vector.extract_strided_slice %933 {offsets = [16, 0], sizes = [8, 16], strides = [1, 1]} : vector<24x16xf32> to vector<8x16xf32>
    %cst_374 = arith.constant dense<0.000000e+00> : vector<8x16xf32>
    %937 = tpu.matmul %920, %936, %cst_374 {dimension_numbers = #tpu.dot_dimension_numbers<[1], [0], [0], [1], [0, 0, 1, 1], [], []>} : vector<8x8xf32>, vector<8x16xf32>, vector<8x16xf32> -> vector<8x16xf32>
    %938 = arith.addf %935, %937 : vector<8x16xf32>
    %c0_375 = arith.constant 0 : index
    %c0_376 = arith.constant 0 : index
    %939 = vector.load %arg35[%c0_375, %c0_376] : memref<1x16xf32, #tpu.memory_space<vmem>>, vector<1x16xf32>
    %940 = vector.broadcast %939 : vector<1x16xf32> to vector<8x16xf32>
    %941 = arith.addf %938, %940 : vector<8x16xf32>
    %942 = arith.negf %941 : vector<8x16xf32>
    %943 = math.exp %942 : vector<8x16xf32>
    %cst_377 = arith.constant 1.000000e+00 : f32
    %944 = vector.broadcast %cst_377 : f32 to vector<8x16xf32>
    %945 = arith.addf %944, %943 : vector<8x16xf32>
    %946 = arith.divf %944, %945 : vector<8x16xf32>
    %cst_378 = arith.constant 1.000000e+00 : f32
    %947 = vector.broadcast %cst_378 : f32 to vector<8x16xf32>
    %948 = arith.subf %947, %946 : vector<8x16xf32>
    %949 = arith.mulf %948, %932 : vector<8x16xf32>
    %950 = arith.mulf %946, %462 : vector<8x16xf32>
    %951 = arith.addf %949, %950 : vector<8x16xf32>
    %952 = arith.mulf %3, %1 : vector<8x16xf32>
    %cst_379 = arith.constant 1.000000e+00 : f32
    %953 = vector.broadcast %cst_379 : f32 to vector<8x16xf32>
    %954 = arith.subf %953, %3 : vector<8x16xf32>
    %955 = arith.mulf %954, %951 : vector<8x16xf32>
    %956 = arith.addf %952, %955 : vector<8x16xf32>
    %c0_380 = arith.constant 0 : index
    %c0_381 = arith.constant 0 : index
    %c0_382 = arith.constant 0 : index
    %957 = vector.load %arg36[%c0_380, %c0_381, %c0_382] : memref<1x8x16xf32, #tpu.memory_space<vmem>>, vector<1x8x16xf32>
    %958 = vector.shape_cast %957 : vector<1x8x16xf32> to vector<8x16xf32>
    %959 = vector.shape_cast %956 : vector<8x16xf32> to vector<1x8x16xf32>
    tpu.vector_store %arg36[%c0_380, %c0_381, %c0_382], %959 {strides = array<i32>} : memref<1x8x16xf32, #tpu.memory_space<vmem>>, vector<1x8x16xf32>,
    %960 = arith.subf %462, %1 : vector<8x16xf32>
    %961 = math.absf %960 : vector<8x16xf32>
    %962 = arith.mulf %961, %3 : vector<8x16xf32>
    %963 = vector.shape_cast %962 : vector<8x16xf32> to vector<1x8x16xf32>
    %cst_383 = arith.constant dense<0.000000e+00> : vector<1xf32>
    %964 = vector.multi_reduction <add>, %963, %cst_383 [1, 2] : vector<1x8x16xf32> to vector<1xf32>
    %965 = vector.shape_cast %964 : vector<1xf32> to vector<1x1x1xf32>
    %966 = vector.extract %965[0, 0, 0] : f32 from vector<1x1x1xf32>
    %967 = arith.subf %932, %1 : vector<8x16xf32>
    %968 = math.absf %967 : vector<8x16xf32>
    %969 = arith.mulf %968, %3 : vector<8x16xf32>
    %970 = vector.shape_cast %969 : vector<8x16xf32> to vector<1x8x16xf32>
    %cst_384 = arith.constant dense<0.000000e+00> : vector<1xf32>
    %971 = vector.multi_reduction <add>, %970, %cst_384 [1, 2] : vector<1x8x16xf32> to vector<1xf32>
    %972 = vector.shape_cast %971 : vector<1xf32> to vector<1x1x1xf32>
    %973 = vector.extract %972[0, 0, 0] : f32 from vector<1x1x1xf32>
    %974 = arith.subf %951, %1 : vector<8x16xf32>
    %975 = math.absf %974 : vector<8x16xf32>
    %976 = arith.mulf %975, %3 : vector<8x16xf32>
    %977 = vector.shape_cast %976 : vector<8x16xf32> to vector<1x8x16xf32>
    %cst_385 = arith.constant dense<0.000000e+00> : vector<1xf32>
    %978 = vector.multi_reduction <add>, %977, %cst_385 [1, 2] : vector<1x8x16xf32> to vector<1xf32>
    %979 = vector.shape_cast %978 : vector<1xf32> to vector<1x1x1xf32>
    %980 = vector.extract %979[0, 0, 0] : f32 from vector<1x1x1xf32>
    %981 = vector.shape_cast %3 : vector<8x16xf32> to vector<1x8x16xf32>
    %cst_386 = arith.constant dense<0.000000e+00> : vector<1xf32>
    %982 = vector.multi_reduction <add>, %981, %cst_386 [1, 2] : vector<1x8x16xf32> to vector<1xf32>
    %983 = vector.shape_cast %982 : vector<1xf32> to vector<1x1x1xf32>
    %984 = vector.extract %983[0, 0, 0] : f32 from vector<1x1x1xf32>
    %985 = tpu.iota {dimensions = array<i32: 2>} : vector<1x1x4xi32>
    %c0_i32 = arith.constant 0 : i32
    %986 = vector.broadcast %c0_i32 : i32 to vector<1x1x4xi32>
    %987 = arith.cmpi eq, %985, %986 : vector<1x1x4xi32>
    %cst_387 = arith.constant 0.000000e+00 : f32
    %988 = vector.broadcast %966 : f32 to vector<1x1x4xf32>
    %989 = vector.broadcast %cst_387 : f32 to vector<1x1x4xf32>
    %990 = arith.select %987, %988, %989 : vector<1x1x4xi1>, vector<1x1x4xf32>
    %c1_i32 = arith.constant 1 : i32
    %991 = vector.broadcast %c1_i32 : i32 to vector<1x1x4xi32>
    %992 = arith.cmpi eq, %985, %991 : vector<1x1x4xi32>
    %cst_388 = arith.constant 0.000000e+00 : f32
    %993 = vector.broadcast %973 : f32 to vector<1x1x4xf32>
    %994 = vector.broadcast %cst_388 : f32 to vector<1x1x4xf32>
    %995 = arith.select %992, %993, %994 : vector<1x1x4xi1>, vector<1x1x4xf32>
    %996 = arith.addf %990, %995 : vector<1x1x4xf32>
    %c2_i32 = arith.constant 2 : i32
    %997 = vector.broadcast %c2_i32 : i32 to vector<1x1x4xi32>
    %998 = arith.cmpi eq, %985, %997 : vector<1x1x4xi32>
    %cst_389 = arith.constant 0.000000e+00 : f32
    %999 = vector.broadcast %980 : f32 to vector<1x1x4xf32>
    %1000 = vector.broadcast %cst_389 : f32 to vector<1x1x4xf32>
    %1001 = arith.select %998, %999, %1000 : vector<1x1x4xi1>, vector<1x1x4xf32>
    %1002 = arith.addf %996, %1001 : vector<1x1x4xf32>
    %c3_i32 = arith.constant 3 : i32
    %1003 = vector.broadcast %c3_i32 : i32 to vector<1x1x4xi32>
    %1004 = arith.cmpi eq, %985, %1003 : vector<1x1x4xi32>
    %cst_390 = arith.constant 0.000000e+00 : f32
    %1005 = vector.broadcast %984 : f32 to vector<1x1x4xf32>
    %1006 = vector.broadcast %cst_390 : f32 to vector<1x1x4xf32>
    %1007 = arith.select %1004, %1005, %1006 : vector<1x1x4xi1>, vector<1x1x4xf32>
    %1008 = arith.addf %1002, %1007 : vector<1x1x4xf32>
    %c0_391 = arith.constant 0 : index
    %c0_392 = arith.constant 0 : index
    %c0_393 = arith.constant 0 : index
    %1009 = vector.load %arg37[%c0_391, %c0_392, %c0_393] : memref<1x1x4xf32, #tpu.memory_space<vmem>>, vector<1x1x4xf32>
    tpu.vector_store %arg37[%c0_391, %c0_392, %c0_393], %1008 {strides = array<i32>} : memref<1x1x4xf32, #tpu.memory_space<vmem>>, vector<1x1x4xf32>,
    return
  }
  func.func @transform_0(%arg0: i32) -> (i32, i32, i32) {
    %c0_i32 = arith.constant 0 : i32
    %c0_i32_0 = arith.constant 0 : i32
    %c0_i32_1 = arith.constant 0 : i32
    return %arg0, %c0_i32, %c0_i32_0 : i32, i32, i32
  }
  func.func @transform_1(%arg0: i32) -> (i32, i32, i32) {
    %c0_i32 = arith.constant 0 : i32
    %c0_i32_0 = arith.constant 0 : i32
    %c0_i32_1 = arith.constant 0 : i32
    return %arg0, %c0_i32, %c0_i32_0 : i32, i32, i32
  }
  func.func @transform_2(%arg0: i32) -> (i32, i32) {
    %c0_i32 = arith.constant 0 : i32
    %c0_i32_0 = arith.constant 0 : i32
    %c0_i32_1 = arith.constant 0 : i32
    return %c0_i32, %c0_i32_0 : i32, i32
  }
  func.func @transform_3(%arg0: i32) -> (i32, i32) {
    %c0_i32 = arith.constant 0 : i32
    %c0_i32_0 = arith.constant 0 : i32
    %c0_i32_1 = arith.constant 0 : i32
    return %c0_i32, %c0_i32_0 : i32, i32
  }
  func.func @transform_4(%arg0: i32) -> (i32, i32) {
    %c0_i32 = arith.constant 0 : i32
    %c0_i32_0 = arith.constant 0 : i32
    %c0_i32_1 = arith.constant 0 : i32
    return %c0_i32, %c0_i32_0 : i32, i32
  }
  func.func @transform_5(%arg0: i32) -> (i32, i32, i32) {
    %c0_i32 = arith.constant 0 : i32
    %c0_i32_0 = arith.constant 0 : i32
    %c0_i32_1 = arith.constant 0 : i32
    %c0_i32_2 = arith.constant 0 : i32
    return %c0_i32, %c0_i32_0, %c0_i32_1 : i32, i32, i32
  }
  func.func @transform_6(%arg0: i32) -> (i32, i32, i32) {
    %c0_i32 = arith.constant 0 : i32
    %c0_i32_0 = arith.constant 0 : i32
    %c0_i32_1 = arith.constant 0 : i32
    %c0_i32_2 = arith.constant 0 : i32
    return %c0_i32, %c0_i32_0, %c0_i32_1 : i32, i32, i32
  }
  func.func @transform_7(%arg0: i32) -> (i32, i32, i32) {
    %c0_i32 = arith.constant 0 : i32
    %c0_i32_0 = arith.constant 0 : i32
    %c0_i32_1 = arith.constant 0 : i32
    %c0_i32_2 = arith.constant 0 : i32
    return %c0_i32, %c0_i32_0, %c0_i32_1 : i32, i32, i32
  }
  func.func @transform_8(%arg0: i32) -> (i32, i32, i32) {
    %c0_i32 = arith.constant 0 : i32
    %c0_i32_0 = arith.constant 0 : i32
    %c0_i32_1 = arith.constant 0 : i32
    %c0_i32_2 = arith.constant 0 : i32
    return %c0_i32, %c0_i32_0, %c0_i32_1 : i32, i32, i32
  }
  func.func @transform_9(%arg0: i32) -> (i32, i32, i32) {
    %c0_i32 = arith.constant 0 : i32
    %c0_i32_0 = arith.constant 0 : i32
    %c0_i32_1 = arith.constant 0 : i32
    %c0_i32_2 = arith.constant 0 : i32
    return %c0_i32, %c0_i32_0, %c0_i32_1 : i32, i32, i32
  }
  func.func @transform_10(%arg0: i32) -> (i32, i32, i32) {
    %c0_i32 = arith.constant 0 : i32
    %c0_i32_0 = arith.constant 0 : i32
    %c0_i32_1 = arith.constant 0 : i32
    %c0_i32_2 = arith.constant 0 : i32
    return %c0_i32, %c0_i32_0, %c0_i32_1 : i32, i32, i32
  }
  func.func @transform_11(%arg0: i32) -> (i32, i32, i32) {
    %c0_i32 = arith.constant 0 : i32
    %c0_i32_0 = arith.constant 0 : i32
    %c0_i32_1 = arith.constant 0 : i32
    %c0_i32_2 = arith.constant 0 : i32
    return %c0_i32, %c0_i32_0, %c0_i32_1 : i32, i32, i32
  }
  func.func @transform_12(%arg0: i32) -> (i32, i32, i32) {
    %c0_i32 = arith.constant 0 : i32
    %c0_i32_0 = arith.constant 0 : i32
    %c0_i32_1 = arith.constant 0 : i32
    %c0_i32_2 = arith.constant 0 : i32
    return %c0_i32, %c0_i32_0, %c0_i32_1 : i32, i32, i32
  }
  func.func @transform_13(%arg0: i32) -> (i32, i32, i32) {
    %c0_i32 = arith.constant 0 : i32
    %c0_i32_0 = arith.constant 0 : i32
    %c0_i32_1 = arith.constant 0 : i32
    %c0_i32_2 = arith.constant 0 : i32
    return %c0_i32, %c0_i32_0, %c0_i32_1 : i32, i32, i32
  }
  func.func @transform_14(%arg0: i32) -> (i32, i32, i32) {
    %c0_i32 = arith.constant 0 : i32
    %c0_i32_0 = arith.constant 0 : i32
    %c0_i32_1 = arith.constant 0 : i32
    %c0_i32_2 = arith.constant 0 : i32
    return %c0_i32, %c0_i32_0, %c0_i32_1 : i32, i32, i32
  }
  func.func @transform_15(%arg0: i32) -> (i32, i32) {
    %c0_i32 = arith.constant 0 : i32
    %c0_i32_0 = arith.constant 0 : i32
    %c0_i32_1 = arith.constant 0 : i32
    return %c0_i32, %c0_i32_0 : i32, i32
  }
  func.func @transform_16(%arg0: i32) -> (i32, i32) {
    %c0_i32 = arith.constant 0 : i32
    %c0_i32_0 = arith.constant 0 : i32
    %c0_i32_1 = arith.constant 0 : i32
    return %c0_i32, %c0_i32_0 : i32, i32
  }
  func.func @transform_17(%arg0: i32) -> (i32, i32) {
    %c0_i32 = arith.constant 0 : i32
    %c0_i32_0 = arith.constant 0 : i32
    %c0_i32_1 = arith.constant 0 : i32
    return %c0_i32, %c0_i32_0 : i32, i32
  }
  func.func @transform_18(%arg0: i32) -> (i32, i32) {
    %c0_i32 = arith.constant 0 : i32
    %c0_i32_0 = arith.constant 0 : i32
    %c0_i32_1 = arith.constant 0 : i32
    return %c0_i32, %c0_i32_0 : i32, i32
  }
  func.func @transform_19(%arg0: i32) -> (i32, i32, i32) {
    %c0_i32 = arith.constant 0 : i32
    %c0_i32_0 = arith.constant 0 : i32
    %c0_i32_1 = arith.constant 0 : i32
    %c0_i32_2 = arith.constant 0 : i32
    return %c0_i32, %c0_i32_0, %c0_i32_1 : i32, i32, i32
  }
  func.func @transform_20(%arg0: i32) -> (i32, i32, i32) {
    %c0_i32 = arith.constant 0 : i32
    %c0_i32_0 = arith.constant 0 : i32
    %c0_i32_1 = arith.constant 0 : i32
    %c0_i32_2 = arith.constant 0 : i32
    return %c0_i32, %c0_i32_0, %c0_i32_1 : i32, i32, i32
  }
  func.func @transform_21(%arg0: i32) -> (i32, i32, i32) {
    %c0_i32 = arith.constant 0 : i32
    %c0_i32_0 = arith.constant 0 : i32
    %c0_i32_1 = arith.constant 0 : i32
    %c0_i32_2 = arith.constant 0 : i32
    return %c0_i32, %c0_i32_0, %c0_i32_1 : i32, i32, i32
  }
  func.func @transform_22(%arg0: i32) -> (i32, i32, i32) {
    %c0_i32 = arith.constant 0 : i32
    %c0_i32_0 = arith.constant 0 : i32
    %c0_i32_1 = arith.constant 0 : i32
    %c0_i32_2 = arith.constant 0 : i32
    return %c0_i32, %c0_i32_0, %c0_i32_1 : i32, i32, i32
  }
  func.func @transform_23(%arg0: i32) -> (i32, i32, i32) {
    %c0_i32 = arith.constant 0 : i32
    %c0_i32_0 = arith.constant 0 : i32
    %c0_i32_1 = arith.constant 0 : i32
    %c0_i32_2 = arith.constant 0 : i32
    return %c0_i32, %c0_i32_0, %c0_i32_1 : i32, i32, i32
  }
  func.func @transform_24(%arg0: i32) -> (i32, i32, i32) {
    %c0_i32 = arith.constant 0 : i32
    %c0_i32_0 = arith.constant 0 : i32
    %c0_i32_1 = arith.constant 0 : i32
    %c0_i32_2 = arith.constant 0 : i32
    return %c0_i32, %c0_i32_0, %c0_i32_1 : i32, i32, i32
  }
  func.func @transform_25(%arg0: i32) -> (i32, i32, i32) {
    %c0_i32 = arith.constant 0 : i32
    %c0_i32_0 = arith.constant 0 : i32
    %c0_i32_1 = arith.constant 0 : i32
    %c0_i32_2 = arith.constant 0 : i32
    return %c0_i32, %c0_i32_0, %c0_i32_1 : i32, i32, i32
  }
  func.func @transform_26(%arg0: i32) -> (i32, i32, i32) {
    %c0_i32 = arith.constant 0 : i32
    %c0_i32_0 = arith.constant 0 : i32
    %c0_i32_1 = arith.constant 0 : i32
    %c0_i32_2 = arith.constant 0 : i32
    return %c0_i32, %c0_i32_0, %c0_i32_1 : i32, i32, i32
  }
  func.func @transform_27(%arg0: i32) -> (i32, i32, i32) {
    %c0_i32 = arith.constant 0 : i32
    %c0_i32_0 = arith.constant 0 : i32
    %c0_i32_1 = arith.constant 0 : i32
    %c0_i32_2 = arith.constant 0 : i32
    return %c0_i32, %c0_i32_0, %c0_i32_1 : i32, i32, i32
  }
  func.func @transform_28(%arg0: i32) -> (i32, i32, i32) {
    %c0_i32 = arith.constant 0 : i32
    %c0_i32_0 = arith.constant 0 : i32
    %c0_i32_1 = arith.constant 0 : i32
    %c0_i32_2 = arith.constant 0 : i32
    return %c0_i32, %c0_i32_0, %c0_i32_1 : i32, i32, i32
  }
  func.func @transform_29(%arg0: i32) -> (i32, i32) {
    %c0_i32 = arith.constant 0 : i32
    %c0_i32_0 = arith.constant 0 : i32
    %c0_i32_1 = arith.constant 0 : i32
    return %c0_i32, %c0_i32_0 : i32, i32
  }
  func.func @transform_30(%arg0: i32) -> (i32, i32) {
    %c0_i32 = arith.constant 0 : i32
    %c0_i32_0 = arith.constant 0 : i32
    %c0_i32_1 = arith.constant 0 : i32
    return %c0_i32, %c0_i32_0 : i32, i32
  }
  func.func @transform_31(%arg0: i32) -> (i32, i32) {
    %c0_i32 = arith.constant 0 : i32
    %c0_i32_0 = arith.constant 0 : i32
    %c0_i32_1 = arith.constant 0 : i32
    return %c0_i32, %c0_i32_0 : i32, i32
  }
  func.func @transform_32(%arg0: i32) -> (i32, i32) {
    %c0_i32 = arith.constant 0 : i32
    %c0_i32_0 = arith.constant 0 : i32
    %c0_i32_1 = arith.constant 0 : i32
    return %c0_i32, %c0_i32_0 : i32, i32
  }
  func.func @transform_33(%arg0: i32) -> (i32, i32) {
    %c0_i32 = arith.constant 0 : i32
    %c0_i32_0 = arith.constant 0 : i32
    %c0_i32_1 = arith.constant 0 : i32
    return %c0_i32, %c0_i32_0 : i32, i32
  }
  func.func @transform_34(%arg0: i32) -> (i32, i32) {
    %c0_i32 = arith.constant 0 : i32
    %c0_i32_0 = arith.constant 0 : i32
    %c0_i32_1 = arith.constant 0 : i32
    return %c0_i32, %c0_i32_0 : i32, i32
  }
  func.func @transform_35(%arg0: i32) -> (i32, i32, i32) {
    %c0_i32 = arith.constant 0 : i32
    %c0_i32_0 = arith.constant 0 : i32
    %c0_i32_1 = arith.constant 0 : i32
    return %arg0, %c0_i32, %c0_i32_0 : i32, i32, i32
  }
  func.func @transform_36(%arg0: i32) -> (i32, i32, i32) {
    %c0_i32 = arith.constant 0 : i32
    %c0_i32_0 = arith.constant 0 : i32
    %c0_i32_1 = arith.constant 0 : i32
    return %arg0, %c0_i32, %c0_i32_0 : i32, i32, i32
  }
}

</mosaic_0001>

<bundles_post_ra>
// kernel: _lambda_.1
= control target key start
LH: loop header
LB: loop body
LE: loop exit
PB: predicated region body
PF: predicated region fallthrough
CT: control target
= control target key end

     0   :  { %s10406_s6 = smov 1   ;;  %s10407_s10 = smov 2   ;;  %s12059_s0 = inlined_call_operand.smem [shape: u32[37], index: -1, kind: input, shape index: {}] }
   0x1   :  { %s10481_s5 = sld [smem:[%s12059_s0]]   ;;  %s10408_s14 = smov 3  }
   0x2   :  { %s10486_s9 = sld [smem:[%s12059_s0 + %s10406_s6]]   ;;  %s10409_s18 = smov 4  }
   0x3   :  { %s10491_s13 = sld [smem:[%s12059_s0 + %s10407_s10]]   ;;  %s10410_s22 = smov 5  }
   0x4   :  { %s10496_s17 = sld [smem:[%s12059_s0 + %s10408_s14]]   ;;  %s10411_s26 = smov 6  }
   0x5   :  { %s10501_s21 = sld [smem:[%s12059_s0 + %s10409_s18]]   ;;  %s10412_s30 = smov 7  }
   0x6   :  { %s10506_s25 = sld [smem:[%s12059_s0 + %s10410_s22]]   ;;  %s10413_s4 = smov 8  }
   0x7   :  { %12123 = sst [smem:[#allocation40_spill]] %s10481_s5  ;;  %s10414_s10 = smov 9  }
   0x8   :  { %12124 = sst [smem:[#allocation41_spill]] %s10486_s9  ;;  %s10415_s15 = smov 10  }
   0x9   :  { %12125 = sst [smem:[#allocation42_spill]] %s10491_s13  ;;  %s10416_s20 = smov 11  }
   0xa   :  { %12126 = sst [smem:[#allocation43_spill]] %s10496_s17  ;;  %s10418_s1 = smov 13  }
   0xb   :  { %12127 = sst [smem:[#allocation44_spill]] %s10501_s21  ;;  %s10419_s7 = smov 14  }
   0xc   :  { %12128 = sst [smem:[#allocation45_spill]] %s10506_s25  ;;  %s10421_s22 = smov 16  }
   0xd   :  { %s10511_s29 = sld [smem:[%s12059_s0 + %s10411_s26]]   ;;  %s10417_s26 = smov 12  }
   0xe   :  { %s10516_s3 = sld [smem:[%s12059_s0 + %s10412_s30]]   ;;  %s10422_s28 = smov 17  }
   0xf   :  { %s10521_s8 = sld [smem:[%s12059_s0 + %s10413_s4]]  }
  0x10   :  { %s10526_s14 = sld [smem:[%s12059_s0 + %s10414_s10]]  }
  0x11   :  { %s10531_s19 = sld [smem:[%s12059_s0 + %s10415_s15]]   ;;  %s10420_s15 = smov 15  }
  0x12   :  { %s10536_s24 = sld [smem:[%s12059_s0 + %s10416_s20]]  }
  0x13   :  { %12129 = sst [smem:[#allocation46_spill]] %s10511_s29 }
  0x14   :  { %12130 = sst [smem:[#allocation47_spill]] %s10516_s3 }
  0x15   :  { %12131 = sst [smem:[#allocation48_spill]] %s10521_s8 }
  0x16   :  { %12132 = sst [smem:[#allocation49_spill]] %s10526_s14 }
  0x17   :  { %12133 = sst [smem:[#allocation50_spill]] %s10531_s19 }
  0x18   :  { %12134 = sst [smem:[#allocation51_spill]] %s10536_s24 }
  0x19   :  { %s10541_s30 = sld [smem:[%s12059_s0 + %s10417_s26]]  }
  0x1a   :  { %s10546_s6 = sld [smem:[%s12059_s0 + %s10418_s1]]  }
  0x1b   :  { %s10551_s12 = sld [smem:[%s12059_s0 + %s10419_s7]]   ;;  %s10423_s7 = smov 18  }
  0x1c   :  { %s10556_s20 = sld [smem:[%s12059_s0 + %s10420_s15]]   ;;  %s10424_s15 = smov 19  }
  0x1d   :  { %s10561_s27 = sld [smem:[%s12059_s0 + %s10421_s22]]   ;;  %s10425_s22 = smov 20  }
  0x1e   :  { %s10566_s4 = sld [smem:[%s12059_s0 + %s10422_s28]]   ;;  %s10426_s28 = smov 21  }
  0x1f   :  { %12135 = sst [smem:[#allocation52_spill]] %s10541_s30 }
  0x20   :  { %12136 = sst [smem:[#allocation53_spill]] %s10546_s6 }
  0x21   :  { %12137 = sst [smem:[#allocation54_spill]] %s10551_s12 }
  0x22   :  { %12138 = sst [smem:[#allocation55_spill]] %s10556_s20 }
  0x23   :  { %s10571_s19 = sld [smem:[%s12059_s0 + %s10423_s7]]   ;;  %s10427_s7 = smov 22  }
  0x24   :  { %12139 = sst [smem:[#allocation56_spill]] %s10566_s4 }
  0x25   :  { %s10576_s20 = sld [smem:[%s12059_s0 + %s10424_s15]]   ;;  %s10428_s15 = smov 23  }
  0x26   :  { %s10581_s14 = sld [smem:[%s12059_s0 + %s10425_s22]]   ;;  %s10429_s22 = smov 24  }
  0x27   :  { %s10586_s4 = sld [smem:[%s12059_s0 + %s10426_s28]]   ;;  %s10430_s28 = smov 25  }
  0x28   :  { %s10591_s6 = sld [smem:[%s12059_s0 + %s10427_s7]]   ;;  %s10431_s7 = smov 26  }
  0x29   :  { %12140 = sst [smem:[#allocation57_spill]] %s10571_s19 }
  0x2a   :  { %s10596_s24 = sld [smem:[%s12059_s0 + %s10428_s15]]   ;;  %s10432_s15 = smov 27  }
  0x2b   :  { %12141 = sst [smem:[#allocation58_spill]] %s10576_s20 }
  0x2c   :  { %12142 = sst [smem:[#allocation59_spill]] %s10581_s14 }
  0x2d   :  { %12143 = sst [smem:[#allocation60_spill]] %s10586_s4 }
  0x2e   :  { %12144 = sst [smem:[#allocation61_spill]] %s10591_s6 }
  0x2f   :  { %s10601_s8 = sld [smem:[%s12059_s0 + %s10429_s22]]   ;;  %s10433_s22 = smov 28  }
  0x30   :  { %12145 = sst [smem:[#allocation62_spill]] %s10596_s24 }
  0x31   :  { %s10606_s4 = sld [smem:[%s12059_s0 + %s10430_s28]]   ;;  %s10434_s28 = smov 29  }
  0x32   :  { %s10611_s6 = sld [smem:[%s12059_s0 + %s10431_s7]]   ;;  %s10435_s7 = smov 30  }
  0x33   :  { %s10616_s29 = sld [smem:[%s12059_s0 + %s10432_s15]]   ;;  %s10436_s15 = smov 31  }
  0x34   :  { %s10621_s25 = sld [smem:[%s12059_s0 + %s10433_s22]]   ;;  %s10437_s22 = smov 32  }
  0x35   :  { %12146 = sst [smem:[#allocation63_spill]] %s10601_s8 }
  0x36   :  { %s10631_s3 = sld [smem:[%s12059_s0 + %s10435_s7]]   ;;  %s10439_s7 = smov 34  }
  0x37   :  { %12147 = sst [smem:[#allocation64_spill]] %s10606_s4 }
  0x38   :  { %12148 = sst [smem:[#allocation65_spill]] %s10611_s6 }
  0x39   :  { %12149 = sst [smem:[#allocation66_spill]] %s10616_s29 }
  0x3a   :  { %12150 = sst [smem:[#allocation67_spill]] %s10621_s25 }
  0x3b   :  { %s10626_s4 = sld [smem:[%s12059_s0 + %s10434_s28]]   ;;  %s10438_s28 = smov 33  }
  0x3c   :  { %12152 = sst [smem:[#allocation69_spill]] %s10631_s3 }
  0x3d   :  { %s10636_s29 = sld [smem:[%s12059_s0 + %s10436_s15]]   ;;  %s10440_s15 = smov 35  }
  0x3e   :  { %s10641_s9 = sld [smem:[%s12059_s0 + %s10437_s22]]   ;;  %s10441_s22 = smov 36  }
  0x3f   :  { %s10651_s17 = sld [smem:[%s12059_s0 + %s10439_s7]]  }
  0x40   :  { %s10656_s5 = sld [smem:[%s12059_s0 + %s10440_s15]]  }
  0x41   :  { %12151 = sst [smem:[#allocation68_spill]] %s10626_s4 }
  0x42   :  { %s10646_s4 = sld [smem:[%s12059_s0 + %s10438_s28]]  }
  0x43   :  { %12153 = sst [smem:[#allocation70_spill]] %s10636_s29 }
  0x44   :  { %12154 = sst [smem:[#allocation71_spill]] %s10641_s9 }
  0x45   :  { %12156 = sst [smem:[#allocation73_spill]] %s10651_s17 }
  0x46   :  { %s10661_s29 = sld [smem:[%s12059_s0 + %s10441_s22]]  }
  0x48   :  { %12155 = sst [smem:[#allocation72_spill]] %s10646_s4 }
  0x4c   :  { %12157 = sst [smem:[#allocation74_spill]] %s10661_s29 }
  0x4d   :  { %79 = vsyncpa [#allocation3], 0 }
  0x4e   :  { %81 = vsyncpa [#allocation3 + $0x1], 0 }
  0x4f   :  { %82 = vsyncpa [#allocation6], 0 }
  0x50   :  { %83 = vsyncpa [#allocation9], 0 }
  0x51   :  { %84 = vsyncpa [#allocation12], 0 }
  0x52   :  { %85 = vsyncpa [#allocation15], 0 }
  0x53   :  { %86 = vsyncpa [#allocation18], 0 }
  0x54   :  { %87 = vsyncpa [#allocation21], 0 }
  0x55   :  { %88 = vsyncpa [#allocation24], 0 }
  0x56   :  { %89 = vsyncpa [#allocation27], 0 }
  0x57   :  { %90 = vsyncpa [#allocation4], 0 }
  0x58   :  { %92 = vsyncpa [#allocation4 + $0x1], 0  ;;  %s10663_s28 = smov 0   ;;  %s10665_s1 = smov 0  }
  0x59   :  { %s10667_s2 = smov 0   ;;  %s10669_s0 = smov 0  }
  0x5a LB: > { %s12158_s4 = sld [smem:[#allocation72_spill]]  ;;  %s12159_s25 = sld [smem:[#allocation67_spill]]  ;;  %s10400_s2 = sphi %s10667_s2, %s12235_s2   ;;  %s10396_s1 = sphi %s10665_s1, %s12234_s1   ;;  %s10392_s28 = sphi %s10663_s28, %s12233_s28   ;;  %s10404_s0 = sphi %s10669_s0, %s12236_s0  }
  0x5b   : > { %s12160_s24 = sld [smem:[#allocation62_spill]]  ;;  %s12161_s21 = sld [smem:[#allocation44_spill]] }
  0x5c   : > { %s12162_s19 = sld [smem:[#allocation57_spill]]  ;;  %s12164_s14 = sld [smem:[#allocation59_spill]] }
  0x5d   : > { %s12163_s17 = sld [smem:[#allocation73_spill]]  ;;  %s12165_s12 = sld [smem:[#allocation54_spill]] }
  0x5e   : > { %s12166_s9 = sld [smem:[#allocation71_spill]]  ;;  %s12168_s3 = sld [smem:[#allocation69_spill]] }
  0x5f   : > { %s12167_s8 = sld [smem:[#allocation63_spill]]  ;;  %s12169_s6 = sld [smem:[#allocation65_spill]] }
  0x60   : > { %s12170_s20 = sld [smem:[#allocation58_spill]]  ;;  %s12171_s30 = sld [smem:[#allocation52_spill]] }
  0x61   : > { %s12172_s13 = sld [smem:[#allocation42_spill]]  ;;  %s10442_s7 = smov [#allocation5]  }
  0x62   : > { %s913_s10 = sshll.u32 %s10442_s7, 4  ;;  %s10684_s11 = sadd.s32 4294967295, %s10404_s0   ;;  %s914_s10 = int_to_ptr.vmem [resolvable:$true] %s913_s10 }
  0x63   : > { %p8050_p0 = scmp.ge.s32.totalorder %s10404_s0, 1  ;;  %p12078_p1 = scmp.eq.s32.totalorder %s10684_s11, 0 }
  0x64   : > { %p900_p2 = scmp.lt.s32.totalorder %s10404_s0, 3  ;;  %s10443_s16 = smov [#allocation8]  }
  0x65   : > { %s958_s18 = sshll.u32 %s10443_s16, 4  ;;  %s10444_s23 = smov [#allocation11]   ;;  %s10696_s18 = int_to_ptr.vmem [resolvable:$true] %s958_s18 }
  0x66   : > { %p10689_p3 = pnand %p8050_p0, %p900_p2  ;;  %s991_s26 = sshll.u32 %s10444_s23, 4  ;;  %s10704_s26 = int_to_ptr.vmem [resolvable:$true] %s991_s26 }
  0x67   : > { %s9828_s7 = scalar_lea.hbm %s12172_s13, 128 }
  0x68   : > { %s12173_s15 = scalar_select %p10689_p3, 1, 0 }
  0x69   : > { %p9535_p5 = pneg %p10689_p3  ;;  %p9829_p7 = scmp.ne.s32.totalorder %s12172_s13, %s9828_s7 }
  0x6a   : > { %p9835_p11 = scmp.lt.u32.totalorder %s9828_s7, %s12172_s13 }
  0x6b   : > { %p10700_p6 = pnand %p9535_p5, %p12078_p1 }
  0x6d   : > { %p10710_p8 = pneg %p10700_p6 }
  0x6f   : > { %p9831_p9 = pnand %p10710_p8, %p9829_p7 }
  0x71   : > { %p9832_p10 = pneg %p9831_p9 }
  0x73   : > { %p9837_p12 = pnand %p9835_p11, %p9832_p10 }
  0x75   : > { %9840 = shalt.err (!%p9837_p12)
}
  0x76   : > { %s9841_s16 = scalar_lea.vmem %s914_s10, 128  ;;  %p9849_p5 = scmp.lt.s32.totalorder %s914_s10, %s914_s10 }
  0x77   : > { %p9842_p13 = scmp.ne.s32.totalorder %s914_s10, %s9841_s16  ;;  %p9850_p4 = scmp.lt.s32.totalorder %s9841_s16, %s9841_s16 }
  0x79   : > { %p9844_p0 = pnand %p9842_p13, %p10710_p8  ;;  %p9851_p1 = por %p9850_p4, %p9849_p5 }
  0x7b   : > { %p9845_p2 = pneg %p9844_p0 }
  0x7d   : > { %p9852_p3 = pnand %p9851_p1, %p9845_p2 }
  0x7f   : > { %9855 = shalt.err (!%p9852_p3)
}
  0x80   : > { %9538 = dma.hbm_to_vmem [thread:$0]  (!%p10700_p6), %s12172_s13, 128, %s914_s10, [#allocation6]  }
  0x81   : > { %s9856_s23 = scalar_lea.hbm %s12171_s30, 32 }
  0x82   : > { %p9857_p7 = scmp.ne.s32.totalorder %s12171_s30, %s9856_s23  ;;  %p9863_p11 = scmp.lt.u32.totalorder %s9856_s23, %s12171_s30 }
  0x84   : > { %p9859_p9 = pnand %p9857_p7, %p10710_p8 }
  0x86   : > { %p9860_p10 = pneg %p9859_p9 }
  0x88   : > { %p9865_p12 = pnand %p9863_p11, %p9860_p10 }
  0x8a   : > { %9868 = shalt.err (!%p9865_p12)
}
  0x8b   : > { %s9869_s7 = scalar_lea.vmem %s10696_s18, 32  ;;  %p9877_p13 = scmp.lt.s32.totalorder %s10696_s18, %s10696_s18 }
  0x8c   : > { %p9870_p1 = scmp.ne.s32.totalorder %s10696_s18, %s9869_s7  ;;  %p9878_p0 = scmp.lt.s32.totalorder %s9869_s7, %s9869_s7 }
  0x8e   : > { %p9872_p3 = pnand %p9870_p1, %p10710_p8  ;;  %p9879_p2 = por %p9878_p0, %p9877_p13 }
  0x90   : > { %p9873_p4 = pneg %p9872_p3 }
  0x92   : > { %p9880_p5 = pnand %p9879_p2, %p9873_p4 }
  0x94   : > { %9883 = shalt.err (!%p9880_p5)
}
  0x95   : > { %s12081_s10 = smov 16   ;;  %s12083_s16 = smov 1  }
  0x96   : > { %9544 = dma.hbm_to_vmem [thread:$0]  (!%p10700_p6), %s12171_s30, 32, %s10696_s18, [#allocation9], %s12081_s10, %s12081_s10, %s12083_s16  }
  0x97   : > { %s9884_s23 = scalar_lea.hbm %s10561_s27, 16 }
  0x98   : > { %p9885_p7 = scmp.ne.s32.totalorder %s10561_s27, %s9884_s23  ;;  %p9891_p11 = scmp.lt.u32.totalorder %s9884_s23, %s10561_s27 }
  0x9a   : > { %p9887_p9 = pnand %p9885_p7, %p10710_p8 }
  0x9c   : > { %p9888_p10 = pneg %p9887_p9 }
  0x9e   : > { %p9893_p12 = pnand %p9891_p11, %p9888_p10 }
  0xa0   : > { %9896 = shalt.err (!%p9893_p12)
}
  0xa1   : > { %s9897_s7 = scalar_lea.vmem %s10704_s26, 16  ;;  %s9904_s13 = scalar_lea.vmem %s10704_s26, 32 }
  0xa2   : > { %p9898_p1 = scmp.ne.s32.totalorder %s10704_s26, %s9897_s7  ;;  %p9905_p13 = scmp.lt.s32.totalorder %s10704_s26, %s10704_s26 }
  0xa3   : > { %p9906_p0 = scmp.lt.s32.totalorder %s9904_s13, %s9897_s7 }
  0xa4   : > { %p9900_p3 = pnand %p9898_p1, %p10710_p8 }
  0xa5   : > { %p9907_p2 = por %p9906_p0, %p9905_p13 }
  0xa6   : > { %p9901_p4 = pneg %p9900_p3 }
  0xa8   : > { %p9908_p5 = pnand %p9907_p2, %p9901_p4 }
  0xaa   : > { %9911 = shalt.err (!%p9908_p5)
}
  0xab   : > { %9550 = dma.hbm_to_vmem [thread:$0]  (!%p10700_p6), %s10561_s27, 16, %s10704_s26, [#allocation12]  }
  0xac   : > { %s10447_s18 = smov [#allocation14]   ;;  %s10448_s10 = smov [#allocation17]  }
  0xad   : > { %s1015_s23 = sshll.u32 %s10447_s18, 4  ;;  %s1047_s16 = sshll.u32 %s10448_s10, 4  ;;  %s1016_s23 = int_to_ptr.vmem [resolvable:$true] %s1015_s23  ;;  %s1048_s16 = int_to_ptr.vmem [resolvable:$true] %s1047_s16 }
  0xae   : > { %s9912_s30 = scalar_lea.hbm %s12170_s20, 32 }
  0xaf   : > { %p9913_p7 = scmp.ne.s32.totalorder %s12170_s20, %s9912_s30  ;;  %p9919_p11 = scmp.lt.u32.totalorder %s9912_s30, %s12170_s20 }
  0xb1   : > { %p9915_p9 = pnand %p9913_p7, %p10710_p8 }
  0xb3   : > { %p9916_p10 = pneg %p9915_p9 }
  0xb5   : > { %p9921_p12 = pnand %p9919_p11, %p9916_p10 }
  0xb7   : > { %9924 = shalt.err (!%p9921_p12)
}
  0xb8   : > { %s9925_s13 = scalar_lea.vmem %s1016_s23, 32  ;;  %p9933_p13 = scmp.lt.s32.totalorder %s1016_s23, %s1016_s23 }
  0xb9   : > { %p9926_p1 = scmp.ne.s32.totalorder %s1016_s23, %s9925_s13  ;;  %p9934_p0 = scmp.lt.s32.totalorder %s9925_s13, %s9925_s13 }
  0xbb   : > { %p9928_p3 = pnand %p9926_p1, %p10710_p8  ;;  %p9935_p2 = por %p9934_p0, %p9933_p13 }
  0xbd   : > { %p9929_p4 = pneg %p9928_p3 }
  0xbf   : > { %p9936_p5 = pnand %p9935_p2, %p9929_p4 }
  0xc1   : > { %9939 = shalt.err (!%p9936_p5)
}
  0xc2   : > { %s12176_s26 = smov 1   ;;  %s12177_s10 = smov 16  }
  0xc3   : > { %9556 = dma.hbm_to_vmem [thread:$0]  (!%p10700_p6), %s12170_s20, 32, %s1016_s23, [#allocation15], %s12177_s10, %s12177_s10, %s12176_s26  }
  0xc4   : > { %s9940_s30 = scalar_lea.hbm %s12160_s24, 32 }
  0xc5   : > { %p9941_p7 = scmp.ne.s32.totalorder %s12160_s24, %s9940_s30  ;;  %p9947_p11 = scmp.lt.u32.totalorder %s9940_s30, %s12160_s24 }
  0xc7   : > { %p9943_p9 = pnand %p9941_p7, %p10710_p8 }
  0xc9   : > { %p9944_p10 = pneg %p9943_p9 }
  0xcb   : > { %p9949_p12 = pnand %p9947_p11, %p9944_p10 }
  0xcd   : > { %9952 = shalt.err (!%p9949_p12)
}
  0xce   : > { %s9953_s7 = scalar_lea.vmem %s1048_s16, 32  ;;  %p9961_p13 = scmp.lt.s32.totalorder %s1048_s16, %s1048_s16 }
  0xcf   : > { %p9954_p1 = scmp.ne.s32.totalorder %s1048_s16, %s9953_s7  ;;  %p9962_p0 = scmp.lt.s32.totalorder %s9953_s7, %s9953_s7 }
  0xd1   : > { %p9956_p3 = pnand %p9954_p1, %p10710_p8  ;;  %p9963_p2 = por %p9962_p0, %p9961_p13 }
  0xd3   : > { %p9957_p4 = pneg %p9956_p3 }
  0xd5   : > { %p9964_p5 = pnand %p9963_p2, %p9957_p4 }
  0xd7   : > { %9967 = shalt.err (!%p9964_p5)
}
  0xd8   : > { %9562 = dma.hbm_to_vmem [thread:$0]  (!%p10700_p6), %s12160_s24, 32, %s1048_s16, [#allocation18], %s12177_s10, %s12177_s10, %s12176_s26  }
  0xd9   : > { %s10449_s18 = smov [#allocation20]   ;;  %s10450_s13 = smov [#allocation23]  }
  0xda   : > { %s1076_s23 = sshll.u32 %s10449_s18, 4  ;;  %s1109_s30 = sshll.u32 %s10450_s13, 4  ;;  %s1077_s23 = int_to_ptr.vmem [resolvable:$true] %s1076_s23  ;;  %s1110_s30 = int_to_ptr.vmem [resolvable:$true] %s1109_s30 }
  0xdb   : > { %s9968_s7 = scalar_lea.hbm %s12169_s6, 32 }
  0xdc   : > { %p9969_p7 = scmp.ne.s32.totalorder %s12169_s6, %s9968_s7  ;;  %p9975_p11 = scmp.lt.u32.totalorder %s9968_s7, %s12169_s6 }
  0xde   : > { %p9971_p9 = pnand %p9969_p7, %p10710_p8 }
  0xe0   : > { %p9972_p10 = pneg %p9971_p9 }
  0xe2   : > { %p9977_p12 = pnand %p9975_p11, %p9972_p10 }
  0xe4   : > { %9980 = shalt.err (!%p9977_p12)
}
  0xe5   : > { %s9981_s20 = scalar_lea.vmem %s1077_s23, 32  ;;  %p9989_p13 = scmp.lt.s32.totalorder %s1077_s23, %s1077_s23 }
  0xe6   : > { %p9982_p1 = scmp.ne.s32.totalorder %s1077_s23, %s9981_s20  ;;  %p9990_p0 = scmp.lt.s32.totalorder %s9981_s20, %s9981_s20 }
  0xe8   : > { %p9984_p3 = pnand %p9982_p1, %p10710_p8  ;;  %p9991_p2 = por %p9990_p0, %p9989_p13 }
  0xea   : > { %p9985_p4 = pneg %p9984_p3 }
  0xec   : > { %p9992_p5 = pnand %p9991_p2, %p9985_p4 }
  0xee   : > { %9995 = shalt.err (!%p9992_p5)
}
  0xef   : > { %9568 = dma.hbm_to_vmem [thread:$0]  (!%p10700_p6), %s12169_s6, 32, %s1077_s23, [#allocation21], %s12177_s10, %s12177_s10, %s12176_s26  }
  0xf0   : > { %s9996_s16 = scalar_lea.hbm %s12168_s3, 16 }
  0xf1   : > { %p9997_p7 = scmp.ne.s32.totalorder %s12168_s3, %s9996_s16  ;;  %p10003_p11 = scmp.lt.u32.totalorder %s9996_s16, %s12168_s3 }
  0xf3   : > { %p9999_p9 = pnand %p9997_p7, %p10710_p8 }
  0xf5   : > { %p10000_p10 = pneg %p9999_p9 }
  0xf7   : > { %p10005_p12 = pnand %p10003_p11, %p10000_p10 }
  0xf9   : > { %10008 = shalt.err (!%p10005_p12)
}
  0xfa   : > { %s10009_s20 = scalar_lea.vmem %s1110_s30, 16  ;;  %s10016_s18 = scalar_lea.vmem %s1110_s30, 32 }
  0xfb   : > { %p10010_p1 = scmp.ne.s32.totalorder %s1110_s30, %s10009_s20  ;;  %p10017_p13 = scmp.lt.s32.totalorder %s1110_s30, %s1110_s30 }
  0xfc   : > { %p10018_p0 = scmp.lt.s32.totalorder %s10016_s18, %s10009_s20 }
  0xfd   : > { %p10012_p3 = pnand %p10010_p1, %p10710_p8 }
  0xfe   : > { %p10019_p2 = por %p10018_p0, %p10017_p13 }
  0xff   : > { %p10013_p4 = pneg %p10012_p3 }
 0x101   : > { %p10020_p5 = pnand %p10019_p2, %p10013_p4 }
 0x103   : > { %10023 = shalt.err (!%p10020_p5)
}
 0x104   : > { %9574 = dma.hbm_to_vmem [thread:$0]  (!%p10700_p6), %s12168_s3, 16, %s1110_s30, [#allocation24]  }
 0x105   : > { %s10451_s23 = smov [#allocation26]   ;;  %s10452_s7 = smov [#allocation7]  }
 0x106   : > { %s1133_s13 = sshll.u32 %s10451_s23, 4  ;;  %s927_s16 = sshll.u32 %s10452_s7, 4  ;;  %s1134_s13 = int_to_ptr.vmem [resolvable:$true] %s1133_s13  ;;  %s928_s16 = int_to_ptr.vmem [resolvable:$true] %s927_s16 }
 0x107   : > { %s10024_s6 = scalar_lea.hbm %s12166_s9, 16 }
 0x108   : > { %p10025_p7 = scmp.ne.s32.totalorder %s12166_s9, %s10024_s6  ;;  %p10031_p11 = scmp.lt.u32.totalorder %s10024_s6, %s12166_s9 }
 0x10a   : > { %p10027_p9 = pnand %p10025_p7, %p10710_p8 }
 0x10c   : > { %p10028_p10 = pneg %p10027_p9 }
 0x10e   : > { %p10033_p12 = pnand %p10031_p11, %p10028_p10 }
 0x110   : > { %10036 = shalt.err (!%p10033_p12)
}
 0x111   : > { %s10037_s20 = scalar_lea.vmem %s1134_s13, 16  ;;  %s10044_s30 = scalar_lea.vmem %s1134_s13, 32 }
 0x112   : > { %p10038_p1 = scmp.ne.s32.totalorder %s1134_s13, %s10037_s20  ;;  %p10045_p13 = scmp.lt.s32.totalorder %s1134_s13, %s1134_s13 }
 0x113   : > { %p10046_p0 = scmp.lt.s32.totalorder %s10044_s30, %s10037_s20 }
 0x114   : > { %p10040_p3 = pnand %p10038_p1, %p10710_p8 }
 0x115   : > { %p10047_p2 = por %p10046_p0, %p10045_p13 }
 0x116   : > { %p10041_p4 = pneg %p10040_p3 }
 0x118   : > { %p10048_p5 = pnand %p10047_p2, %p10041_p4 }
 0x11a   : > { %10051 = shalt.err (!%p10048_p5)
}
 0x11b   : > { %9580 = dma.hbm_to_vmem [thread:$0]  (!%p10700_p6), %s12166_s9, 16, %s1134_s13, [#allocation27]  }
 0x11c   : > { %s10052_s6 = scalar_lea.hbm %s12161_s21, 16 }
 0x11d   : > { %p10053_p7 = scmp.ne.s32.totalorder %s12161_s21, %s10052_s6  ;;  %p10059_p11 = scmp.lt.u32.totalorder %s10052_s6, %s12161_s21 }
 0x11f   : > { %p10055_p9 = pnand %p10053_p7, %p10710_p8 }
 0x121   : > { %p10056_p10 = pneg %p10055_p9 }
 0x123   : > { %p10061_p12 = pnand %p10059_p11, %p10056_p10 }
 0x125   : > { %10064 = shalt.err (!%p10061_p12)
}
 0x126   : > { %s10065_s18 = scalar_lea.vmem %s928_s16, 16  ;;  %s10072_s23 = scalar_lea.vmem %s928_s16, 32 }
 0x127   : > { %p10066_p1 = scmp.ne.s32.totalorder %s928_s16, %s10065_s18  ;;  %p10073_p13 = scmp.lt.s32.totalorder %s928_s16, %s928_s16 }
 0x128   : > { %p10074_p0 = scmp.lt.s32.totalorder %s10072_s23, %s10065_s18 }
 0x129   : > { %p10068_p3 = pnand %p10066_p1, %p10710_p8 }
 0x12a   : > { %p10075_p2 = por %p10074_p0, %p10073_p13 }
 0x12b   : > { %p10069_p4 = pneg %p10068_p3 }
 0x12d   : > { %p10076_p5 = pnand %p10075_p2, %p10069_p4 }
 0x12f   : > { %10079 = shalt.err (!%p10076_p5)
}
 0x130   : > { %9541 = dma.hbm_to_vmem [thread:$0]  (!%p10700_p6), %s12161_s21, 16, %s928_s16, [#allocation6]  }
 0x131   : > { %s10453_s13 = smov [#allocation10]   ;;  %s10454_s20 = smov [#allocation13]  }
 0x132   : > { %s974_s7 = sshll.u32 %s10453_s13, 4  ;;  %s1005_s30 = sshll.u32 %s10454_s20, 4  ;;  %s975_s7 = int_to_ptr.vmem [resolvable:$true] %s974_s7  ;;  %s1006_s30 = int_to_ptr.vmem [resolvable:$true] %s1005_s30 }
 0x133   : > { %s10080_s6 = scalar_lea.hbm %s12165_s12, 32 }
 0x134   : > { %p10081_p7 = scmp.ne.s32.totalorder %s12165_s12, %s10080_s6  ;;  %p10087_p11 = scmp.lt.u32.totalorder %s10080_s6, %s12165_s12 }
 0x136   : > { %p10083_p9 = pnand %p10081_p7, %p10710_p8 }
 0x138   : > { %p10084_p10 = pneg %p10083_p9 }
 0x13a   : > { %p10089_p12 = pnand %p10087_p11, %p10084_p10 }
 0x13c   : > { %10092 = shalt.err (!%p10089_p12)
}
 0x13d   : > { %s10093_s18 = scalar_lea.vmem %s975_s7, 32  ;;  %p10101_p13 = scmp.lt.s32.totalorder %s975_s7, %s975_s7 }
 0x13e   : > { %p10094_p1 = scmp.ne.s32.totalorder %s975_s7, %s10093_s18  ;;  %p10102_p0 = scmp.lt.s32.totalorder %s10093_s18, %s10093_s18 }
 0x140   : > { %p10096_p3 = pnand %p10094_p1, %p10710_p8  ;;  %p10103_p2 = por %p10102_p0, %p10101_p13 }
 0x142   : > { %p10097_p4 = pneg %p10096_p3 }
 0x144   : > { %p10104_p5 = pnand %p10103_p2, %p10097_p4 }
 0x146   : > { %10107 = shalt.err (!%p10104_p5)
}
 0x147   : > { %9547 = dma.hbm_to_vmem [thread:$0]  (!%p10700_p6), %s12165_s12, 32, %s975_s7, [#allocation9], %s12177_s10, %s12177_s10, %s12176_s26  }
 0x148   : > { %s10108_s16 = scalar_lea.hbm %s12162_s19, 16 }
 0x149   : > { %p10109_p7 = scmp.ne.s32.totalorder %s12162_s19, %s10108_s16  ;;  %p10115_p11 = scmp.lt.u32.totalorder %s10108_s16, %s12162_s19 }
 0x14b   : > { %p10111_p9 = pnand %p10109_p7, %p10710_p8 }
 0x14d   : > { %p10112_p10 = pneg %p10111_p9 }
 0x14f   : > { %p10117_p12 = pnand %p10115_p11, %p10112_p10 }
 0x151   : > { %10120 = shalt.err (!%p10117_p12)
}
 0x152   : > { %s10121_s23 = scalar_lea.vmem %s1006_s30, 16  ;;  %s10128_s13 = scalar_lea.vmem %s1006_s30, 32 }
 0x153   : > { %p10122_p1 = scmp.ne.s32.totalorder %s1006_s30, %s10121_s23  ;;  %p10129_p13 = scmp.lt.s32.totalorder %s1006_s30, %s1006_s30 }
 0x154   : > { %p10130_p0 = scmp.lt.s32.totalorder %s10128_s13, %s10121_s23 }
 0x155   : > { %p10124_p3 = pnand %p10122_p1, %p10710_p8 }
 0x156   : > { %p10131_p2 = por %p10130_p0, %p10129_p13 }
 0x157   : > { %p10125_p4 = pneg %p10124_p3 }
 0x159   : > { %p10132_p5 = pnand %p10131_p2, %p10125_p4 }
 0x15b   : > { %10135 = shalt.err (!%p10132_p5)
}
 0x15c   : > { %9553 = dma.hbm_to_vmem [thread:$0]  (!%p10700_p6), %s12162_s19, 16, %s1006_s30, [#allocation12]  }
 0x15d   : > { %s10455_s7 = smov [#allocation16]   ;;  %s10456_s6 = smov [#allocation19]  }
 0x15e   : > { %s1028_s20 = sshll.u32 %s10455_s7, 4  ;;  %s1060_s18 = sshll.u32 %s10456_s6, 4  ;;  %s1029_s20 = int_to_ptr.vmem [resolvable:$true] %s1028_s20  ;;  %s1061_s18 = int_to_ptr.vmem [resolvable:$true] %s1060_s18 }
 0x15f   : > { %s10136_s16 = scalar_lea.hbm %s12164_s14, 32 }
 0x160   : > { %p10137_p7 = scmp.ne.s32.totalorder %s12164_s14, %s10136_s16  ;;  %p10143_p11 = scmp.lt.u32.totalorder %s10136_s16, %s12164_s14 }
 0x162   : > { %p10139_p9 = pnand %p10137_p7, %p10710_p8 }
 0x164   : > { %p10140_p10 = pneg %p10139_p9 }
 0x166   : > { %p10145_p12 = pnand %p10143_p11, %p10140_p10 }
 0x168   : > { %10148 = shalt.err (!%p10145_p12)
}
 0x169   : > { %s10149_s23 = scalar_lea.vmem %s1029_s20, 32  ;;  %p10157_p13 = scmp.lt.s32.totalorder %s1029_s20, %s1029_s20 }
 0x16a   : > { %p10150_p1 = scmp.ne.s32.totalorder %s1029_s20, %s10149_s23  ;;  %p10158_p0 = scmp.lt.s32.totalorder %s10149_s23, %s10149_s23 }
 0x16c   : > { %p10152_p3 = pnand %p10150_p1, %p10710_p8  ;;  %p10159_p2 = por %p10158_p0, %p10157_p13 }
 0x16e   : > { %p10153_p4 = pneg %p10152_p3 }
 0x170   : > { %p10160_p5 = pnand %p10159_p2, %p10153_p4 }
 0x172   : > { %10163 = shalt.err (!%p10160_p5)
}
 0x173   : > { %9559 = dma.hbm_to_vmem [thread:$0]  (!%p10700_p6), %s12164_s14, 32, %s1029_s20, [#allocation15], %s12177_s10, %s12177_s10, %s12176_s26  }
 0x174   : > { %s10164_s30 = scalar_lea.hbm %s12167_s8, 32 }
 0x175   : > { %p10165_p7 = scmp.ne.s32.totalorder %s12167_s8, %s10164_s30  ;;  %p10171_p11 = scmp.lt.u32.totalorder %s10164_s30, %s12167_s8 }
 0x177   : > { %p10167_p9 = pnand %p10165_p7, %p10710_p8 }
 0x179   : > { %p10168_p10 = pneg %p10167_p9 }
 0x17b   : > { %p10173_p12 = pnand %p10171_p11, %p10168_p10 }
 0x17d   : > { %10176 = shalt.err (!%p10173_p12)
}
 0x17e   : > { %s10177_s13 = scalar_lea.vmem %s1061_s18, 32  ;;  %p10185_p13 = scmp.lt.s32.totalorder %s1061_s18, %s1061_s18 }
 0x17f   : > { %p10178_p1 = scmp.ne.s32.totalorder %s1061_s18, %s10177_s13  ;;  %p10186_p0 = scmp.lt.s32.totalorder %s10177_s13, %s10177_s13 }
 0x181   : > { %p10180_p3 = pnand %p10178_p1, %p10710_p8  ;;  %p10187_p2 = por %p10186_p0, %p10185_p13 }
 0x183   : > { %p10181_p4 = pneg %p10180_p3 }
 0x185   : > { %p10188_p5 = pnand %p10187_p2, %p10181_p4 }
 0x187   : > { %10191 = shalt.err (!%p10188_p5)
}
 0x188   : > { %9565 = dma.hbm_to_vmem [thread:$0]  (!%p10700_p6), %s12167_s8, 32, %s1061_s18, [#allocation18], %s12177_s10, %s12177_s10, %s12176_s26  }
 0x189   : > { %s10457_s7 = smov [#allocation22]   ;;  %s10458_s6 = smov [#allocation25]  }
 0x18a   : > { %s1092_s20 = sshll.u32 %s10457_s7, 4  ;;  %s1119_s16 = sshll.u32 %s10458_s6, 4  ;;  %s1093_s20 = int_to_ptr.vmem [resolvable:$true] %s1092_s20  ;;  %s1120_s16 = int_to_ptr.vmem [resolvable:$true] %s1119_s16 }
 0x18b   : > { %s10192_s23 = scalar_lea.hbm %s12159_s25, 32 }
 0x18c   : > { %p10193_p7 = scmp.ne.s32.totalorder %s12159_s25, %s10192_s23  ;;  %p10199_p11 = scmp.lt.u32.totalorder %s10192_s23, %s12159_s25 }
 0x18e   : > { %p10195_p9 = pnand %p10193_p7, %p10710_p8 }
 0x190   : > { %p10196_p10 = pneg %p10195_p9 }
 0x192   : > { %p10201_p12 = pnand %p10199_p11, %p10196_p10 }
 0x194   : > { %10204 = shalt.err (!%p10201_p12)
}
 0x195   : > { %s10205_s30 = scalar_lea.vmem %s1093_s20, 32  ;;  %p10213_p13 = scmp.lt.s32.totalorder %s1093_s20, %s1093_s20 }
 0x196   : > { %p10206_p1 = scmp.ne.s32.totalorder %s1093_s20, %s10205_s30  ;;  %p10214_p0 = scmp.lt.s32.totalorder %s10205_s30, %s10205_s30 }
 0x198   : > { %p10208_p3 = pnand %p10206_p1, %p10710_p8  ;;  %p10215_p2 = por %p10214_p0, %p10213_p13 }
 0x19a   : > { %p10209_p4 = pneg %p10208_p3 }
 0x19c   : > { %p10216_p5 = pnand %p10215_p2, %p10209_p4 }
 0x19e   : > { %10219 = shalt.err (!%p10216_p5)
}
 0x19f   : > { %s12178_s18 = sld [smem:[#allocation70_spill]] }
 0x1a0   : > { %9571 = dma.hbm_to_vmem [thread:$0]  (!%p10700_p6), %s12159_s25, 32, %s1093_s20, [#allocation21], %s12177_s10, %s12177_s10, %s12176_s26  }
 0x1a5   : > { %s10220_s13 = scalar_lea.hbm %s12178_s18, 256 }
 0x1a6   : > { %p10221_p7 = scmp.ne.s32.totalorder %s12178_s18, %s10220_s13  ;;  %p10227_p11 = scmp.lt.u32.totalorder %s10220_s13, %s12178_s18 }
 0x1a8   : > { %p10223_p9 = pnand %p10221_p7, %p10710_p8 }
 0x1aa   : > { %p10224_p10 = pneg %p10223_p9 }
 0x1ac   : > { %p10229_p12 = pnand %p10227_p11, %p10224_p10 }
 0x1ae   : > { %10232 = shalt.err (!%p10229_p12)
}
 0x1af   : > { %s10233_s7 = scalar_lea.vmem %s1120_s16, 256  ;;  %p10241_p13 = scmp.lt.s32.totalorder %s1120_s16, %s1120_s16 }
 0x1b0   : > { %p10234_p1 = scmp.ne.s32.totalorder %s1120_s16, %s10233_s7  ;;  %p10242_p0 = scmp.lt.s32.totalorder %s10233_s7, %s10233_s7 }
 0x1b2   : > { %p10236_p3 = pnand %p10234_p1, %p10710_p8  ;;  %p10243_p2 = por %p10242_p0, %p10241_p13 }
 0x1b4   : > { %p10237_p4 = pneg %p10236_p3 }
 0x1b6   : > { %p10244_p5 = pnand %p10243_p2, %p10237_p4 }
 0x1b8   : > { %10247 = shalt.err (!%p10244_p5)
}
 0x1b9   : > { %s10459_s26 = smov 128   ;;  %s10460_s10 = smov 8  }
 0x1ba   : > { %9577 = dma.hbm_to_vmem [thread:$0]  (!%p10700_p6), %s12178_s18, 256, %s1120_s16, [#allocation24], %s10459_s26, %s10459_s26, %s10460_s10  }
 0x1bb   : > { %s10461_s20 = smov [#allocation28]   ;;  %s10248_s23 = scalar_lea.hbm %s12163_s17, 16 }
 0x1bc   : > { %s1147_s6 = sshll.u32 %s10461_s20, 4  ;;  %p10249_p7 = scmp.ne.s32.totalorder %s12163_s17, %s10248_s23  ;;  %s1148_s6 = int_to_ptr.vmem [resolvable:$true] %s1147_s6 }
 0x1bd   : > { %p10255_p11 = scmp.lt.u32.totalorder %s10248_s23, %s12163_s17 }
 0x1be   : > { %p10251_p9 = pnand %p10249_p7, %p10710_p8 }
 0x1c0   : > { %p10252_p10 = pneg %p10251_p9 }
 0x1c2   : > { %p10257_p12 = pnand %p10255_p11, %p10252_p10 }
 0x1c4   : > { %10260 = shalt.err (!%p10257_p12)
}
 0x1c5   : > { %s10261_s30 = scalar_lea.vmem %s1148_s6, 16  ;;  %s10268_s13 = scalar_lea.vmem %s1148_s6, 32 }
 0x1c6   : > { %p10262_p1 = scmp.ne.s32.totalorder %s1148_s6, %s10261_s30  ;;  %p10269_p13 = scmp.lt.s32.totalorder %s1148_s6, %s1148_s6 }
 0x1c7   : > { %p10270_p0 = scmp.lt.s32.totalorder %s10268_s13, %s10261_s30 }
 0x1c8   : > { %p10264_p3 = pnand %p10262_p1, %p10710_p8 }
 0x1c9   : > { %p10271_p2 = por %p10270_p0, %p10269_p13 }
 0x1ca   : > { %p10265_p4 = pneg %p10264_p3 }
 0x1cc   : > { %p10272_p5 = pnand %p10271_p2, %p10265_p4 }
 0x1ce   : > { %10275 = shalt.err (!%p10272_p5)
}
 0x1cf   : > { %9583 = dma.hbm_to_vmem [thread:$0]  (!%p10700_p6), %s12163_s17, 16, %s1148_s6, [#allocation27]  }
 0x1d0   : > { %s8049_s29 = sadd.s32 4294967294, %s10404_s0   ;;  %s10909_s16 = sadd.s32 1, %s10404_s0  }
 0x1d1   : > { %s102_s22 = ssub.s32 %s10404_s0, %s10909_s16  ;;  %s105_s7 = sadd.s32 1, %s10400_s2 }
 0x1d2   : > { %s12179_s26 = sld [smem:[#allocation40_spill]]  ;;  %p103_p8 = scmp.eq.s32.totalorder %s102_s22, 0 }
 0x1d3   : > { %p112_p7 = scmp.ne.s32.totalorder %s10400_s2, %s10396_s1  ;;  %p113_p9 = scmp.eq.s32.totalorder %s10404_s0, 0 }
 0x1d4   : > { %p118_p10 = scmp.ne.s32.totalorder %s10396_s1, %s10392_s28  ;;  %p12181_p12 = scmp.eq.s32.totalorder %s10684_s11, 0 }
 0x1d5   : > { %s10920_s10 = scalar_select %p103_p8, %s10400_s2, %s105_s7  }
 0x1d6   : > { %p10922_p11 = por %p113_p9, %p112_p7  ;;  %p10928_p6 = por %p12181_p12, %p118_p10 }
 0x1d7   : > { %p861_p1 = scmp.eq.s32.totalorder %s10684_s11, 1  ;;  %p867_p3 = scmp.eq.s32.totalorder %s8049_s29, 1 }
 0x1d8   : > { %s12182_s6 = scalar_select %p10928_p6, 1, 0 }
 0x1d9   : > { %p9608_p4 = scmp.lt.s32.totalorder %s10404_s0, 2  ;;  %s1158_s23 = sand.u32 1, %s10400_s2  }
 0x1da   : > { %p10935_p13 = por %p861_p1, %p112_p7  ;;  %p10939_p0 = por %p867_p3, %p118_p10 }
 0x1db   : > { %s8068_s22 = sshll.u32 %s1158_s23, 3  ;;  %s8069_s7 = sshll.u32 %s10404_s0, 7 }
 0x1dc   : > { %s12183_s30 = scalar_select %p10935_p13, 1, 0 }
 0x1dd   : > { %s12184_s13 = scalar_select %p10939_p0, 1, 0 }
 0x1de   : > { %s10945_s3 = scalar_lea.hbm %s12179_s26, %s8069_s7  ;;  %s1162_s29 = scalar_lea.vmem [#allocation2], %s8068_s22 }
 0x1df   : > { %s1169_s8 = sshll.u32 %s1162_s29, 4  ;;  %p10951_p2 = pnand %p9608_p4, %p10922_p11  ;;  %s10947_s8 = int_to_ptr.vmem [resolvable:$true] %s1169_s8 }
 0x1e0   : > { %s1159_s12 = scalar_lea.sflag [#allocation3], %s1158_s23  ;;  %s10276_s14 = scalar_lea.hbm %s10945_s3, 128 }
 0x1e1   : > { %p10277_p5 = scmp.ne.s32.totalorder %s10945_s3, %s10276_s14  ;;  %p10278_p8 = pneg %p10951_p2 }
 0x1e2   : > { %s10281_s22 = scalar_lea.hbm %s12179_s26, 256  ;;  %p10282_p10 = scmp.lt.u32.totalorder %s10945_s3, %s12179_s26 }
 0x1e3   : > { %p10279_p7 = pnand %p10278_p8, %p10277_p5  ;;  %p10283_p12 = scmp.lt.u32.totalorder %s10281_s22, %s10276_s14 }
 0x1e4   : > { %p10285_p3 = scmp.lt.u32.totalorder %s10276_s14, %s10945_s3 }
 0x1e5   : > { %p10280_p9 = pneg %p10279_p7  ;;  %p10284_p1 = por %p10283_p12, %p10282_p10 }
 0x1e7   : > { %p10286_p11 = por %p10285_p3, %p10284_p1 }
 0x1e9   : > { %p10287_p4 = pnand %p10286_p11, %p10280_p9 }
 0x1eb   : > { %10290 = shalt.err (!%p10287_p4)
}
 0x1ec   : > { %s10291_s20 = scalar_lea.vmem %s10947_s8, 128  ;;  %s10462_s23 = smov [#allocation2]  }
 0x1ed   : > { %p10292_p0 = scmp.ne.s32.totalorder %s10947_s8, %s10291_s20  ;;  %s10296_s7 = sshll.u32 %s10462_s23, 4  ;;  %s10297_s7 = int_to_ptr.vmem [resolvable:$false] %s10296_s7 }
 0x1ee   : > { %s10298_s29 = scalar_lea.vmem %s10297_s7, 256  ;;  %p10299_p5 = scmp.lt.s32.totalorder %s10947_s8, %s10297_s7 }
 0x1ef   : > { %p10294_p13 = pnand %p10292_p0, %p10278_p8  ;;  %p10300_p7 = scmp.lt.s32.totalorder %s10298_s29, %s10291_s20 }
 0x1f1   : > { %p10295_p6 = pneg %p10294_p13  ;;  %p10301_p10 = por %p10300_p7, %p10299_p5 }
 0x1f3   : > { %p10302_p12 = pnand %p10301_p10, %p10295_p6 }
 0x1f5   : > { %10305 = shalt.err (!%p10302_p12)
}
 0x1f6   : > { %9587 = dma.hbm_to_vmem [thread:$0]  (!%p10951_p2), %s10945_s3, 128, %s10947_s8, %s1159_s12  }
 0x1f7   : > { %p12186_p9 = scmp.ne.s32.totalorder %s12173_s15, 0 }
 0x1f8   : > { %s10979_s14 = sand.u32 (!%p12186_p9), 1, %s10396_s1   ;;  %p12187_p6 = scmp.ne.s32.totalorder (!%p12186_p9), %s12182_s6, 0 }
 0x1f9   : > { %1185 = sbr.rel (%p12186_p9) target bundleno = 21579 (0x544b), region = 160  ;;  %s12095_s22 = sshll.u32 (!%p12186_p9), %s10979_s14, 3 }
 0x1fa   : > { %s1188_s20 = scalar_lea.sflag (!%p12186_p9), [#allocation3], %s10979_s14  ;;  %s10985_s23 = scalar_lea.vmem (!%p12186_p9), [#allocation2], %s12095_s22 }
 0x200   : > { %10351 = dma.done.wait (%p12187_p6), %s1188_s20, 128  }
 0x201   : > { %10353 = vsyncadd (%p12187_p6), %s1188_s20, 4294967168  ;;  %p12188_p13 = scmp.eq.s32.totalorder %s10684_s11, 0 }
 0x203   : > { %10355 = dma.done.wait (%p12188_p13), [#allocation6], 144   ;;  %p12189_p0 = pmov %p12188_p13 }
 0x205   : > { %10357 = vsyncadd (%p12189_p0), [#allocation6], 4294967152  ;;  %p12190_p2 = pmov %p12189_p0 }
 0x206   : > { %p12191_p8 = pmov %p12189_p0 }
 0x207   : > { %10359 = dma.done.wait (%p12190_p2), [#allocation9], 64  }
 0x208   : > { %10361 = vsyncadd (%p12191_p8), [#allocation9], 4294967232  ;;  %p12192_p1 = pmov %p12189_p0 }
 0x209   : > { %p12193_p3 = pmov %p12189_p0 }
 0x20a   : > { %10363 = dma.done.wait (%p12192_p1), [#allocation12], 32  }
 0x20b   : > { %10365 = vsyncadd (%p12193_p3), [#allocation12], 4294967264  ;;  %p12194_p11 = pmov %p12189_p0 }
 0x20c   : > { %p12195_p4 = pmov %p12189_p0 }
 0x20d   : > { %10367 = dma.done.wait (%p12194_p11), [#allocation15], 64  }
 0x20e   : > { %10369 = vsyncadd (%p12195_p4), [#allocation15], 4294967232  ;;  %p12196_p5 = pmov %p12189_p0 }
 0x20f   : > { %p12197_p7 = pmov %p12189_p0 }
 0x210   : > { %10371 = dma.done.wait (%p12196_p5), [#allocation18], 64  }
 0x211   : > { %10373 = vsyncadd (%p12197_p7), [#allocation18], 4294967232  ;;  %p12198_p10 = pmov %p12189_p0 }
 0x212   : > { %p12199_p12 = pmov %p12189_p0 }
 0x213   : > { %10375 = dma.done.wait (%p12198_p10), [#allocation21], 64  }
 0x214   : > { %10377 = vsyncadd (%p12199_p12), [#allocation21], 4294967232  ;;  %p12200_p9 = pmov %p12189_p0 }
 0x215   : > { %p12201_p6 = pmov %p12189_p0 }
 0x216   : > { %10379 = dma.done.wait (%p12200_p9), [#allocation24], 272  }
 0x217   : > { %10381 = vsyncadd (%p12201_p6), [#allocation24], 4294967024  ;;  %p12202_p13 = pmov %p12189_p0 }
 0x219   : > { %10383 = dma.done.wait (%p12202_p13), [#allocation27], 32  }
 0x21a   : > { %10385 = vsyncadd (%p12189_p0), [#allocation27], 4294967264  ;;  %s12203_s9 = sld [smem:[#allocation43_spill]]  ;;  %s12204_s3 = sld [smem:[#allocation41_spill]]  ;;  %v10463_v0 = vmov 0.0|0.0   ;;  %vm10464_vm0 = vmmov 0   ;;  %v1361_v46 = vlaneseq }
 0x21b   : > { %p1351_p2 = scmp.lt.s32.totalorder %s10684_s11, 1  ;;  %9189 = vmatprep.subr.bf16.mxu0 %v10463_v0  ;;  %9192 = vmatprep.subr.bf16.mxu1 %v10463_v0  ;;  %v10465_v1 = vmov 0.0   ;;  %vm1370_vm1 = vcmask 130048   ;;  %v1358_v9 = vld [vmem:[%s10985_s23] sm:$0xff]  ;;  %v8092_v12 = vld [vmem:[#allocation7] ss:$0 sm:$0xff] }
 0x21c   : > { %8548 = vmatprep.mubr.msk.f32.mxu0 %vm10464_vm0, %v10465_v1  ;;  %8555 = vmatprep.mubr.msk.f32.mxu1 %vm10464_vm0, %v10465_v1  ;;  %s12205_s6 = sld [smem:[#allocation47_spill]]  ;;  %v1360_v16 = vld [vmem:[#allocation5] sm:$0xff]  ;;  %vm1552_vm2 = vcmask 261120   ;;  %s12206_s7 = sld [smem:[#allocation45_spill]]  ;;  %v1362_v47 = vshrl.u32 %v1361_v46, 7  ;;  %v11093_v48 = vand.u32 127, %v1361_v46 }
 0x21d   : > { %s11031_s8 = scalar_select %p1351_p2, %s10684_s11, 1  ;;  %vm1734_vm4 = vcmask 64512   ;;  %vm2179_vm5 = vcmask 523264  }
 0x21e   : > { %s12207_s29 = sld [smem:[#allocation46_spill]]  ;;  %s12102_s20 = smov 96   ;;  %vm11096_vm3 = vcmp.eq.s32.totalorder %v1362_v47, %v11093_v48 }
 0x21f   : > { %s8089_s12 = sshll.u32 %s11031_s8, 3  ;;  %s12098_s22 = smov 48  }
 0x220   : > { %v1368_v2 = vld [vmem:[%s12203_s9 + $0x10] sm:$0xff]  ;;  %v1369_v3 = vld [vmem:[%s12203_s9 + $0x18] sm:$0xff]  ;;  %v1366_v4 = vld [vmem:[%s12203_s9] sm:$0xff]  ;;  %s11038_s15 = scalar_lea.vmem %s12204_s3, %s8089_s12  ;;  %s12096_s3 = smov 112  }
 0x221   : > { %v9190_v5 = vpack.c.bf16 %v1369_v3, %v1368_v2  ;;  %v1367_v6 = vld [vmem:[%s12203_s9 + $0x8] sm:$0xff]  ;;  %v1359_v8 = vld [vmem:[%s11038_s15] sm:$0xff]  ;;  %s12106_s12 = smov 80   ;;  %s12214_s9 = sld [smem:[#allocation50_spill]] }
 0x222   : > { %v9193_v7 = vpack.c.bf16 %v1367_v6, %v1366_v4  ;;  %v1528_v25 = vld [vmem:[%s12205_s6] sm:$0xff]  ;;  %v1529_v26 = vld [vmem:[%s12205_s6 + $0x8] sm:$0xff]  ;;  %v1530_v28 = vld [vmem:[%s12205_s6 + $0x10] sm:$0xff]  ;;  %s12215_s17 = smov 80   ;;  %s12216_s18 = smov 96  }
 0x223   : > { %9191 = vmatpush3.bf16.msra.mxu0 %v9190_v5  ;;  %v11059_v27 = vpack.c.bf16 %v1529_v26, %v1528_v25  ;;  %v1531_v29 = vld [vmem:[%s12205_s6 + $0x18] sm:$0xff]  ;;  %v11070_v35 = vld [vmem:[%s12206_s7] ss:$0 sm:$0xff]  ;;  %s12217_s19 = smov 112   ;;  %s12218_s21 = smov 64  }
 0x224   : > { %9194 = vmatpush3.bf16.msra.mxu1 %v9193_v7  ;;  %9195 = vmatprep.subr.bf16.mxu0 %v10463_v0  ;;  %v11065_v30 = vpack.c.bf16 %v1531_v29, %v1530_v28  ;;  %v11073_v37 = vld [vmem:[%s12207_s29] ss:$0 sm:$0xff]  ;;  %s12219_s24 = smov 48   ;;  %s12220_s25 = smov 16  }
 0x225   : > { %8569 = vmatprep.subr.mxu1 %v10465_v1  ;;  %p12229_p1 = scmp.ne.s32.totalorder %s12183_s30, 0 }
 0x226   : > { %8549 = vmatmul.mubr.msk.f32.vlgmr.msra.gmra.mrb[0].mxu0 %vm1370_vm1, %v1359_v8 }
 0x227   : > { %8556 = vmatmul.mubr.msk.f32.vlgmr.msra.gmra.mrb[0].mxu1 %vm1370_vm1, %v1358_v9  ;;  %8566 = vmatprep.mubr.msk.f32.mxu0 %vm10464_vm0, %v10465_v1 }
 0x228   : > { %8571 = vmatprep.mubr.msk.f32.mxu1 %vm10464_vm0, %v10465_v1  ;;  %9197 = vmatpush3.bf16.msra.mxu0 %v11059_v27 }
 0x229   : > { %9198 = vmatprep.subr.bf16.mxu0 %v10463_v0 }
 0x22c   : > { %9200 = vmatpush3.bf16.msra.mxu0 %v11065_v30 }
 0x22d   : > { %8579 = vmatprep.subr.mxu0 %v10465_v1 }
 0x2f9   : > { %v1440_v10 = vpop.f32.mrb[0].mxu0 }
 0x2fa   : > { %v1513_v11 = vpop.f32.mrb[0].mxu1  ;;  %v8550_v13 = vpop.f32.mrb[1].mxu0 }
 0x2fb   : > { %v1514_v14 = vadd.f32 %v1513_v11, %v1440_v10  ;;  %v8557_v15 = vpop.f32.mrb[1].mxu1 }
 0x2fd   : > { %v1524_v17 = vadd.f32 %v8092_v12, %v1514_v14 }
 0x2ff   : > { %v11051_v18 = vadd.f32 %v1524_v17, %v1360_v16 }
 0x301   : > { %v1553_v19 = vsel %vm1552_vm2, %v11051_v18, 0.0 }
 0x302   : > { %1554 = vadd.xlane.f32.xlu0 %v1553_v19 }
 0x38f   : > { %v1555_v20 = vpop.xlane.xlu0 %1554 }
 0x390   : > { %v1557_v21 = vmul.f32 0.03125, %v1555_v20 }
 0x392   : > { %v1558_v22 = vsub.f32 %v11051_v18, %v1557_v21 }
 0x394   : > { %v1559_v23 = vmul.f32 %v1558_v22, %v1558_v22 }
 0x396   : > { %v1560_v24 = vsel %vm1552_vm2, %v1559_v23, 0.0 }
 0x397   : > { %1561 = vadd.xlane.f32.xlu0 %v1560_v24 }
 0x424   : > { %v1562_v31 = vpop.xlane.xlu0 %1561 }
 0x425   : > { %v1563_v32 = vmul.f32 0.03125, %v1562_v31 }
 0x427   : > { %v1564_v33 = vadd.f32 1e-05, %v1563_v32 }
 0x429   : > { %9723 = vrsqrt.f32 %v1564_v33 }
 0x433   : > { %v9724_v34 = vpop.eup %9723 }
 0x434   : > { %v1566_v36 = vmul.f32 %v9724_v34, %v1558_v22 }
 0x436   : > { %v1573_v38 = vmul.f32 %v11070_v35, %v1566_v36 }
 0x438   : > { %v1580_v39 = vadd.f32 %v11073_v37, %v1573_v38 }
 0x43a   : > { %8567 = vmatmul.mubr.msk.f32.vlgmr.msra.gmra.mrb[2].mxu0 %vm1552_vm2, %v1580_v39 }
 0x43b   : > { %8581 = vmatprep.mubr.msk.f32.mxu0 %vm10464_vm0, %v10465_v1 }
 0x50d   : > { %v1650_v40 = vpop.f32.mrb[2].mxu0 }
 0x50e   : > { %1656 = vrot.lane.b32.xlu1 %v1650_v40, %s12102_s20  ;;  %v8568_v41 = vpop.f32.mrb[3].mxu0  ;;  %v1654_v42 = vmul.f32 0.25, %v1650_v40  ;;  %s12211_s20 = sld [smem:[#allocation51_spill]] }
 0x510   : > { %1822 = vrot.lane.b32.xlu0 %v1654_v42, %s12096_s3  ;;  %s12100_s3 = smov 64  }
 0x512   : > { %1824 = vrot.lane.b32.xlu1 %v1650_v40, %s12106_s12  ;;  %s12213_s12 = sld [smem:[#allocation49_spill]] }
 0x580   : > { %v1657_v43 = vpop.permute.xlu1 %1656 }
 0x581   : > { %8570 = vmatpush3.xpose.msk.msra.mxu1 %vm1370_vm1, %v1657_v43  ;;  %v1541_v43 = vld [vmem:[%s12211_s20 + $0x18] sm:$0xff] }
 0x582   : > { %8574 = vmatprep.subr.mxu1 %v10465_v1  ;;  %v1823_v45 = vpop.permute.xlu0 %1822 }
 0x584   : > { %v1825_v44 = vpop.permute.xlu1 %1824  ;;  %8572 = vmatmul.mubr.msk.f32.vlgmr.msra.gmra.mrb[2].mxu1 %vm1370_vm1, %v1654_v42  ;;  %v1540_v42 = vld [vmem:[%s12211_s20 + $0x10] sm:$0xff] }
 0x585   : > { %8580 = vmatpush3.xpose.msk.msra.mxu0 %vm1370_vm1, %v1825_v44  ;;  %8576 = vmatprep.mubr.msk.f32.mxu1 %vm10464_vm0, %v10465_v1  ;;  %v11150_v44 = vpack.c.bf16 %v1541_v43, %v1540_v42 }
 0x586   : > { %9201 = vmatprep.subr.bf16.mxu0 %v10463_v0 }
 0x588   : > { %8582 = vmatmul.mubr.msk.f32.vlgmr.msra.gmra.mrb[4].mxu0 %vm1370_vm1, %v1823_v45 }
 0x589   : > { %8597 = vmatprep.mubr.msk.f32.mxu0 %vm10464_vm0, %v10465_v1 }
 0x657   : > { %v1729_v50 = vpop.f32.mrb[2].mxu1 }
 0x658   : > { %v1733_v51 = vsel %vm11096_vm3, -1e+09, %v1729_v50  ;;  %v8573_v52 = vpop.f32.mrb[3].mxu1 }
 0x659   : > { %v1735_v53 = vsel %vm1734_vm4, %v1733_v51, -inf }
 0x65a   : > { %1736 = vmax.xlane.f32.xlu1 %v1735_v53 }
 0x65b   : > { %v1896_v54 = vpop.f32.mrb[4].mxu0 }
 0x65c   : > { %v1900_v55 = vsel %vm11096_vm3, -1e+09, %v1896_v54  ;;  %v8583_v56 = vpop.f32.mrb[5].mxu0 }
 0x65d   : > { %v1901_v57 = vsel %vm1734_vm4, %v1900_v55, -inf }
 0x65e   : > { %1902 = vmax.xlane.f32.xlu0 %v1901_v57 }
 0x674   : > { %1912 = vrot.lane.b32.xlu0 %v1650_v40, %s12098_s22  ;;  %s12210_s22 = sld [smem:[#allocation48_spill]] }
 0x67a   : > { %v1532_v14 = vld [vmem:[%s12210_s22] sm:$0xff]  ;;  %v1533_v15 = vld [vmem:[%s12210_s22 + $0x8] sm:$0xff]  ;;  %v1534_v16 = vld [vmem:[%s12210_s22 + $0x10] sm:$0xff] }
 0x67b   : > { %v11121_v17 = vpack.c.bf16 %v1533_v15, %v1532_v14  ;;  %v1535_v19 = vld [vmem:[%s12210_s22 + $0x18] sm:$0xff] }
 0x67c   : > { %v11125_v20 = vpack.c.bf16 %v1535_v19, %v1534_v16 }
 0x67d   : > { %9203 = vmatpush3.bf16.msra.mxu0 %v11121_v17 }
 0x67e   : > { %9204 = vmatprep.subr.bf16.mxu0 %v10463_v0 }
 0x681   : > { %9206 = vmatpush3.bf16.msra.mxu0 %v11125_v20 }
 0x682   : > { %9213 = vmatprep.subr.bf16.mxu0 %v10463_v0 }
 0x6e7   : > { %v1737_v58 = vpop.xlane.xlu1 %1736 }
 0x6e8   : > { %v1738_v59 = vsub.f32 %v1733_v51, %v1737_v58 }
 0x6ea   : > { %v1739_v60 = vmul.f32 1.442695, %v1738_v59 }
 0x6eb   : > { %v1903_v61 = vpop.xlane.xlu0 %1902 }
 0x6ec   : > { %9725 = vpow2.f32 %v1739_v60  ;;  %v1904_v62 = vsub.f32 %v1900_v55, %v1903_v61  ;;  %v11173_v60 = vld [vmem:[%s12213_s12] ss:$0 sm:$0xff] }
 0x6ee   : > { %v1905_v63 = vmul.f32 1.442695, %v1904_v62  ;;  %v11176_v62 = vld [vmem:[%s12214_s9] ss:$0 sm:$0xff] }
 0x6ef   : > { %v1913_v11 = vpop.permute.xlu0 %1912 }
 0x6f0   : > { %9727 = vpow2.f32 %v1905_v63 }
 0x6f6   : > { %v9726_v2 = vpop.eup %9725 }
 0x6f7   : > { %v1741_v3 = vsel %vm1734_vm4, %v9726_v2, 0.0 }
 0x6f8   : > { %1742 = vadd.xlane.f32.xlu1 %v1741_v3 }
 0x6fa   : > { %v9728_v4 = vpop.eup %9727 }
 0x6fb   : > { %v1907_v5 = vsel %vm1734_vm4, %v9728_v4, 0.0 }
 0x6fc   : > { %1908 = vadd.xlane.f32.xlu1 %v1907_v5 }
 0x70d   : > { %1746 = vrot.lane.b32.xlu1 %v1650_v40, %s12100_s3  ;;  %s12104_s3 = smov 16   ;;  %v1538_v40 = vld [vmem:[%s12211_s20] sm:$0xff] }
 0x785   : > { %v1743_v6 = vpop.xlane.xlu1 %1742 }
 0x786   : > { %9729 = vrcp.f32 %v1743_v6  ;;  %v11193_v6 = vld [vmem:[#allocation8] ss:$0 sm:$0xff] }
 0x789   : > { %v1909_v7 = vpop.xlane.xlu1 %1908 }
 0x78a   : > { %9731 = vrcp.f32 %v1909_v7 }
 0x78d   : > { %v1747_v8 = vpop.permute.xlu1 %1746 }
 0x78e   : > { %8575 = vmatpush3.msra.mxu1 %v1747_v8 }
 0x78f   : > { %8584 = vmatprep.subr.mxu1 %v10465_v1 }
 0x790   : > { %v9730_v9 = vpop.eup %9729 }
 0x791   : > { %v1745_v10 = vmul.f32 %v9730_v9, %v9726_v2 }
 0x793   : > { %8577 = vmatmul.mubr.msk.f32.vlgmr.msra.gmra.mrb[4].mxu1 %vm1734_vm4, %v1745_v10 }
 0x794   : > { %v9732_v12 = vpop.eup %9731  ;;  %8585 = vmatpush3.msra.mxu1 %v1913_v11  ;;  %8586 = vmatprep.mubr.msk.f32.mxu1 %vm10464_vm0, %v10465_v1 }
 0x795   : > { %v1911_v13 = vmul.f32 %v9732_v12, %v9728_v4  ;;  %9207 = vmatprep.subr.bf16.mxu1 %v10463_v0 }
 0x797   : > { %8587 = vmatmul.mubr.msk.f32.vlgmr.msra.gmra.mrb[6].mxu1 %vm1734_vm4, %v1911_v13 }
 0x798   : > { %8608 = vmatprep.mubr.msk.f32.mxu1 %vm10464_vm0, %v10465_v1 }
 0x866   : > { %v1818_v21 = vpop.f32.mrb[4].mxu1 }
 0x867   : > { %v8578_v22 = vpop.f32.mrb[5].mxu1 }
 0x86a   : > { %v1984_v23 = vpop.f32.mrb[6].mxu1 }
 0x86b   : > { %1989 = vrot.lane.b32.xlu1 %v1984_v23, %s12104_s3  ;;  %v8588_v24 = vpop.f32.mrb[7].mxu1  ;;  %s12212_s3 = sld [smem:[#allocation53_spill]] }
 0x871   : > { %v1543_v45 = vld [vmem:[%s12212_s3] sm:$0xff]  ;;  %v1544_v46 = vld [vmem:[%s12212_s3 + $0x8] sm:$0xff]  ;;  %v1545_v47 = vld [vmem:[%s12212_s3 + $0x10] sm:$0xff] }
 0x872   : > { %v11157_v50 = vpack.c.bf16 %v1544_v46, %v1543_v45  ;;  %v1546_v51 = vld [vmem:[%s12212_s3 + $0x18] sm:$0xff]  ;;  %v1547_v53 = vld [vmem:[%s12212_s3 + $0x20] sm:$0xff]  ;;  %v1548_v54 = vld [vmem:[%s12212_s3 + $0x28] sm:$0xff] }
 0x873   : > { %v11161_v52 = vpack.c.bf16 %v1546_v51, %v1545_v47  ;;  %v11167_v55 = vpack.c.bf16 %v1548_v54, %v1547_v53  ;;  %v1549_v3 = vld [vmem:[%s12212_s3 + $0x30] sm:$0xff]  ;;  %v1550_v4 = vld [vmem:[%s12212_s3 + $0x38] sm:$0xff] }
 0x874   : > { %v11189_v5 = vpack.c.bf16 %v1550_v4, %v1549_v3 }
 0x8dd   : > { %v1990_v25 = vpop.permute.xlu1 %1989 }
 0x8de   : > { %v1992_v26 = vsel %vm1370_vm1, %v1818_v21, %v1990_v25 }
 0x8df   : > { %8598 = vmatmul.mubr.msk.f32.vlgmr.msra.gmra.mrb[6].mxu0 %vm1552_vm2, %v1992_v26 }
 0x8e0   : > { %8627 = vmatprep.mubr.msk.f32.mxu0 %vm10464_vm0, %v10465_v1  ;;  %9215 = vmatpush3.bf16.msra.mxu0 %v11157_v50 }
 0x8e1   : > { %9216 = vmatprep.subr.bf16.mxu0 %v10463_v0 }
 0x8e4   : > { %9218 = vmatpush3.bf16.msra.mxu0 %v11161_v52 }
 0x8e5   : > { %9219 = vmatprep.subr.bf16.mxu0 %v10463_v0 }
 0x8e8   : > { %9221 = vmatpush3.bf16.msra.mxu0 %v11167_v55 }
 0x8e9   : > { %9222 = vmatprep.subr.bf16.mxu0 %v10463_v0 }
 0x8ec   : > { %9224 = vmatpush3.bf16.msra.mxu0 %v11189_v5 }
 0x8ed   : > { %8651 = vmatprep.subr.mxu0 %v10465_v1 }
 0x9b2   : > { %v2062_v28 = vpop.f32.mrb[6].mxu0 }
 0x9b3   : > { %v11136_v29 = vadd.f32 %v2062_v28, %v11051_v18  ;;  %v8599_v31 = vpop.f32.mrb[7].mxu0  ;;  %v1539_v18 = vld [vmem:[%s12211_s20 + $0x8] sm:$0xff] }
 0x9b4   : > { %v11144_v41 = vpack.c.bf16 %v1539_v18, %v1538_v40 }
 0x9b5   : > { %v2066_v32 = vsel %vm1552_vm2, %v11136_v29, 0.0 }
 0x9b6   : > { %2067 = vadd.xlane.f32.xlu1 %v2066_v32  ;;  %9209 = vmatpush3.bf16.msra.mxu1 %v11144_v41 }
 0x9b7   : > { %9210 = vmatprep.subr.bf16.mxu1 %v10463_v0 }
 0x9ba   : > { %9212 = vmatpush3.bf16.msra.mxu1 %v11150_v44 }
 0x9bb   : > { %9225 = vmatprep.subr.bf16.mxu1 %v10463_v0 }
 0xa43   : > { %v2068_v33 = vpop.xlane.xlu1 %2067 }
 0xa44   : > { %v2069_v34 = vmul.f32 0.03125, %v2068_v33 }
 0xa46   : > { %v2070_v36 = vsub.f32 %v11136_v29, %v2069_v34 }
 0xa48   : > { %v2071_v38 = vmul.f32 %v2070_v36, %v2070_v36 }
 0xa4a   : > { %v2072_v39 = vsel %vm1552_vm2, %v2071_v38, 0.0 }
 0xa4b   : > { %2073 = vadd.xlane.f32.xlu0 %v2072_v39 }
 0xad8   : > { %v2074_v56 = vpop.xlane.xlu0 %2073 }
 0xad9   : > { %v2075_v57 = vmul.f32 0.03125, %v2074_v56 }
 0xadb   : > { %v2076_v58 = vadd.f32 1e-06, %v2075_v57 }
 0xadd   : > { %9733 = vrsqrt.f32 %v2076_v58 }
 0xae7   : > { %v9734_v59 = vpop.eup %9733 }
 0xae8   : > { %v2078_v61 = vmul.f32 %v9734_v59, %v2070_v36 }
 0xaea   : > { %v2085_v63 = vmul.f32 %v11173_v60, %v2078_v61 }
 0xaec   : > { %v2092_v2 = vadd.f32 %v11176_v62, %v2085_v63 }
 0xaee   : > { %8609 = vmatmul.mubr.msk.f32.vlgmr.msra.gmra.mrb[8].mxu1 %vm1552_vm2, %v2092_v2 }
 0xaef   : > { %9227 = vmatpush3.bf16.msra.mxu1 %v11059_v27  ;;  %8638 = vmatprep.mubr.msk.f32.mxu1 %vm10464_vm0, %v10465_v1 }
 0xaf0   : > { %9228 = vmatprep.subr.bf16.mxu1 %v10463_v0 }
 0xaf3   : > { %9230 = vmatpush3.bf16.msra.mxu1 %v11065_v30  ;;  %v11199_v30 = vld [vmem:[#allocation10] ss:$0 sm:$0xff] }
 0xaf4   : > { %8641 = vmatprep.subr.mxu1 %v10465_v1 }
 0xbc1   : > { %v2168_v27 = vpop.f32.mrb[8].mxu1 }
 0xbc2   : > { %v2169_v7 = vadd.f32 %v11193_v6, %v2168_v27  ;;  %v8610_v8 = vpop.f32.mrb[9].mxu1 }
 0xbc4   : > { %v2172_v9 = vmax.f32 %v2169_v7, 0.0 }
 0xbc6   : > { %8628 = vmatmul.mubr.msk.f32.vlgmr.msra.gmra.mrb[8].mxu0 %vm2179_vm5, %v2172_v9 }
 0xbc7   : > { %8653 = vmatprep.mubr.msk.f32.mxu0 %vm10464_vm0, %v10465_v1 }
 0xc99   : > { %v2249_v10 = vpop.f32.mrb[8].mxu0 }
 0xc9a   : > { %v2250_v11 = vadd.f32 %v11199_v30, %v2249_v10  ;;  %v8629_v12 = vpop.f32.mrb[9].mxu0 }
 0xc9c   : > { %v11203_v13 = vadd.f32 %v2250_v11, %v11136_v29 }
 0xc9e   : > { %v2254_v14 = vsel %vm1552_vm2, %v11203_v13, 0.0 }
 0xc9f   : > { %2255 = vadd.xlane.f32.xlu1 %v2254_v14 }
 0xd2c   : > { %v2256_v15 = vpop.xlane.xlu1 %2255 }
 0xd2d   : > { %v2257_v16 = vmul.f32 0.03125, %v2256_v15 }
 0xd2f   : > { %v2258_v19 = vsub.f32 %v11203_v13, %v2257_v16 }
 0xd31   : > { %v2259_v21 = vmul.f32 %v2258_v19, %v2258_v19 }
 0xd33   : > { %v2260_v22 = vsel %vm1552_vm2, %v2259_v21, 0.0 }
 0xd34   : > { %2261 = vadd.xlane.f32.xlu1 %v2260_v22 }
 0xdc1   : > { %v2262_v23 = vpop.xlane.xlu1 %2261 }
 0xdc2   : > { %v2263_v24 = vmul.f32 0.03125, %v2262_v23 }
 0xdc4   : > { %v2264_v25 = vadd.f32 1e-05, %v2263_v24 }
 0xdc6   : > { %9735 = vrsqrt.f32 %v2264_v25 }
 0xdd0   : > { %v9736_v26 = vpop.eup %9735 }
 0xdd1   : > { %v2266_v28 = vmul.f32 %v9736_v26, %v2258_v19 }
 0xdd3   : > { %v2267_v29 = vmul.f32 %v11070_v35, %v2266_v28 }
 0xdd5   : > { %v2268_v31 = vadd.f32 %v11073_v37, %v2267_v29 }
 0xdd7   : > { %8639 = vmatmul.mubr.msk.f32.vlgmr.msra.gmra.mrb[10].mxu1 %vm1552_vm2, %v2268_v31 }
 0xdd8   : > { %8643 = vmatprep.mubr.msk.f32.mxu1 %vm10464_vm0, %v10465_v1 }
 0xeaa   : > { %v2338_v32 = vpop.f32.mrb[10].mxu1 }
 0xeab   : > { %2511 = vrot.lane.b32.xlu1 %v2338_v32, %s12215_s17  ;;  %2344 = vrot.lane.b32.xlu0 %v2338_v32, %s12216_s18  ;;  %v8640_v33 = vpop.f32.mrb[11].mxu1  ;;  %v2342_v34 = vmul.f32 0.25, %v2338_v32 }
 0xeaf   : > { %2509 = vrot.lane.b32.xlu1 %v2342_v34, %s12217_s19 }
 0xf1d   : > { %v2512_v36 = vpop.permute.xlu1 %2511  ;;  %v2345_v38 = vpop.permute.xlu0 %2344 }
 0xf1e   : > { %8642 = vmatpush3.xpose.msk.msra.mxu1 %vm1370_vm1, %v2345_v38  ;;  %8652 = vmatpush3.xpose.msk.msra.mxu0 %vm1370_vm1, %v2512_v36 }
 0xf1f   : > { %8646 = vmatprep.subr.mxu1 %v10465_v1  ;;  %9231 = vmatprep.subr.bf16.mxu0 %v10463_v0 }
 0xf21   : > { %v2510_v35 = vpop.permute.xlu1 %2509  ;;  %8644 = vmatmul.mubr.msk.f32.vlgmr.msra.gmra.mrb[12].mxu1 %vm1370_vm1, %v2342_v34 }
 0xf22   : > { %8654 = vmatmul.mubr.msk.f32.vlgmr.msra.gmra.mrb[10].mxu0 %vm1370_vm1, %v2510_v35  ;;  %8648 = vmatprep.mubr.msk.f32.mxu1 %vm10464_vm0, %v10465_v1 }
 0xf23   : > { %9233 = vmatpush3.bf16.msra.mxu0 %v11121_v17  ;;  %8669 = vmatprep.mubr.msk.f32.mxu0 %vm10464_vm0, %v10465_v1 }
 0xf24   : > { %9234 = vmatprep.subr.bf16.mxu0 %v10463_v0 }
 0xf27   : > { %9236 = vmatpush3.bf16.msra.mxu0 %v11125_v20 }
 0xf28   : > { %9243 = vmatprep.subr.bf16.mxu0 %v10463_v0 }
 0xff4   : > { %v2417_v37 = vpop.f32.mrb[12].mxu1 }
 0xff5   : > { %v2421_v39 = vsel %vm11096_vm3, -1e+09, %v2417_v37  ;;  %v8645_v40 = vpop.f32.mrb[13].mxu1  ;;  %v2583_v18 = vpop.f32.mrb[10].mxu0 }
 0xff6   : > { %v2587_v42 = vsel %vm11096_vm3, -1e+09, %v2583_v18  ;;  %v8655_v43 = vpop.f32.mrb[11].mxu0  ;;  %v2422_v17 = vsel %vm1734_vm4, %v2421_v39, -inf  ;;  %v8121_v18 = vld [vmem:[%s12205_s6 + $0x20] sm:$0xff] }
 0xff7   : > { %2423 = vmax.xlane.f32.xlu0 %v2422_v17  ;;  %v2588_v45 = vsel %vm1734_vm4, %v2587_v42, -inf  ;;  %v8123_v43 = vld [vmem:[%s12205_s6 + $0x30] sm:$0xff]  ;;  %v8124_v17 = vld [vmem:[%s12205_s6 + $0x38] sm:$0xff] }
 0xff8   : > { %2589 = vmax.xlane.f32.xlu1 %v2588_v45  ;;  %v11293_v45 = vpack.c.bf16 %v8124_v17, %v8123_v43 }
0x1009   : > { %2433 = vrot.lane.b32.xlu1 %v2338_v32, %s12218_s21 }
0x1084   : > { %v2424_v20 = vpop.xlane.xlu0 %2423 }
0x1085   : > { %v2425_v46 = vsub.f32 %v2421_v39, %v2424_v20  ;;  %v2590_v47 = vpop.xlane.xlu1 %2589 }
0x1086   : > { %v2591_v51 = vsub.f32 %v2587_v42, %v2590_v47  ;;  %v8122_v42 = vld [vmem:[%s12205_s6 + $0x28] sm:$0xff]  ;;  %s12222_s6 = sld [smem:[#allocation56_spill]] }
0x1087   : > { %v2426_v53 = vmul.f32 1.442695, %v2425_v46 }
0x1088   : > { %v2592_v54 = vmul.f32 1.442695, %v2591_v51 }
0x1089   : > { %9737 = vpow2.f32 %v2426_v53  ;;  %v2434_v56 = vpop.permute.xlu1 %2433  ;;  %v11298_v53 = vld [vmem:[%s12206_s7 + $0x1] ss:$0 sm:$0xff]  ;;  %s12225_s7 = sld [smem:[#allocation64_spill]] }
0x108a   : > { %8647 = vmatpush3.msra.mxu1 %v2434_v56  ;;  %9739 = vpow2.f32 %v2592_v54  ;;  %v11301_v56 = vld [vmem:[%s12207_s29 + $0x1] ss:$0 sm:$0xff] }
0x108b   : > { %8656 = vmatprep.subr.mxu1 %v10465_v1 }
0x1093   : > { %v9738_v57 = vpop.eup %9737 }
0x1094   : > { %v2428_v58 = vsel %vm1734_vm4, %v9738_v57, 0.0  ;;  %v9740_v59 = vpop.eup %9739 }
0x1095   : > { %2429 = vadd.xlane.f32.xlu0 %v2428_v58  ;;  %v2594_v61 = vsel %vm1734_vm4, %v9740_v59, 0.0 }
0x1099   : > { %2595 = vadd.xlane.f32.xlu0 %v2594_v61 }
0x10af   : > { %2599 = vrot.lane.b32.xlu0 %v2338_v32, %s12219_s24 }
0x1122   : > { %v2430_v63 = vpop.xlane.xlu0 %2429 }
0x1123   : > { %9741 = vrcp.f32 %v2430_v63 }
0x1126   : > { %v2596_v2 = vpop.xlane.xlu0 %2595 }
0x1127   : > { %9743 = vrcp.f32 %v2596_v2 }
0x112a   : > { %v2600_v27 = vpop.permute.xlu0 %2599 }
0x112d   : > { %v9742_v3 = vpop.eup %9741 }
0x112e   : > { %v2432_v4 = vmul.f32 %v9742_v3, %v9738_v57 }
0x1130   : > { %8649 = vmatmul.mubr.msk.f32.vlgmr.msra.gmra.mrb[14].mxu1 %vm1734_vm4, %v2432_v4 }
0x1131   : > { %v9744_v7 = vpop.eup %9743  ;;  %8657 = vmatpush3.msra.mxu1 %v2600_v27  ;;  %8658 = vmatprep.mubr.msk.f32.mxu1 %vm10464_vm0, %v10465_v1 }
0x1132   : > { %v2598_v8 = vmul.f32 %v9744_v7, %v9740_v59  ;;  %9237 = vmatprep.subr.bf16.mxu1 %v10463_v0 }
0x1134   : > { %8659 = vmatmul.mubr.msk.f32.vlgmr.msra.gmra.mrb[16].mxu1 %vm1734_vm4, %v2598_v8 }
0x1135   : > { %9239 = vmatpush3.bf16.msra.mxu1 %v11144_v41  ;;  %8680 = vmatprep.mubr.msk.f32.mxu1 %vm10464_vm0, %v10465_v1 }
0x1136   : > { %9240 = vmatprep.subr.bf16.mxu1 %v10463_v0 }
0x1139   : > { %9242 = vmatpush3.bf16.msra.mxu1 %v11150_v44 }
0x113a   : > { %9255 = vmatprep.subr.bf16.mxu1 %v10463_v0 }
0x1203   : > { %v2505_v9 = vpop.f32.mrb[14].mxu1 }
0x1204   : > { %v8650_v10 = vpop.f32.mrb[15].mxu1 }
0x1207   : > { %v2671_v11 = vpop.f32.mrb[16].mxu1 }
0x1208   : > { %2676 = vrot.lane.b32.xlu1 %v2671_v11, %s12220_s25  ;;  %v8660_v12 = vpop.f32.mrb[17].mxu1 }
0x127a   : > { %v2677_v14 = vpop.permute.xlu1 %2676 }
0x127b   : > { %v2679_v15 = vsel %vm1370_vm1, %v2505_v9, %v2677_v14 }
0x127c   : > { %8670 = vmatmul.mubr.msk.f32.vlgmr.msra.gmra.mrb[12].mxu0 %vm1552_vm2, %v2679_v15 }
0x127d   : > { %9245 = vmatpush3.bf16.msra.mxu0 %v11157_v50  ;;  %8699 = vmatprep.mubr.msk.f32.mxu0 %vm10464_vm0, %v10465_v1 }
0x127e   : > { %9246 = vmatprep.subr.bf16.mxu0 %v10463_v0 }
0x1281   : > { %9248 = vmatpush3.bf16.msra.mxu0 %v11161_v52 }
0x1282   : > { %9249 = vmatprep.subr.bf16.mxu0 %v10463_v0 }
0x1285   : > { %9251 = vmatpush3.bf16.msra.mxu0 %v11167_v55 }
0x1286   : > { %9252 = vmatprep.subr.bf16.mxu0 %v10463_v0 }
0x1289   : > { %9254 = vmatpush3.bf16.msra.mxu0 %v11189_v5 }
0x128a   : > { %8723 = vmatprep.subr.mxu0 %v10465_v1 }
0x134f   : > { %v2749_v41 = vpop.f32.mrb[12].mxu0 }
0x1350   : > { %v2750_v44 = vadd.f32 %v2749_v41, %v11203_v13  ;;  %v8671_v50 = vpop.f32.mrb[13].mxu0 }
0x1352   : > { %v2753_v16 = vsel %vm1552_vm2, %v2750_v44, 0.0 }
0x1353   : > { %2754 = vadd.xlane.f32.xlu1 %v2753_v16 }
0x13e0   : > { %v2755_v19 = vpop.xlane.xlu1 %2754 }
0x13e1   : > { %v2756_v21 = vmul.f32 0.03125, %v2755_v19 }
0x13e3   : > { %v2757_v52 = vsub.f32 %v2750_v44, %v2756_v21 }
0x13e5   : > { %v2758_v22 = vmul.f32 %v2757_v52, %v2757_v52 }
0x13e7   : > { %v2759_v23 = vsel %vm1552_vm2, %v2758_v22, 0.0 }
0x13e8   : > { %2760 = vadd.xlane.f32.xlu0 %v2759_v23 }
0x1475   : > { %v2761_v55 = vpop.xlane.xlu0 %2760 }
0x1476   : > { %v2762_v24 = vmul.f32 0.03125, %v2761_v55 }
0x1478   : > { %v2763_v25 = vadd.f32 1e-06, %v2762_v24 }
0x147a   : > { %9745 = vrsqrt.f32 %v2763_v25 }
0x1484   : > { %v9746_v5 = vpop.eup %9745 }
0x1485   : > { %v2765_v26 = vmul.f32 %v9746_v5, %v2757_v52 }
0x1487   : > { %v2766_v28 = vmul.f32 %v11173_v60, %v2765_v26 }
0x1489   : > { %v2767_v13 = vadd.f32 %v11176_v62, %v2766_v28 }
0x148b   : > { %8681 = vmatmul.mubr.msk.f32.vlgmr.msra.gmra.mrb[18].mxu1 %vm1552_vm2, %v2767_v13 }
0x148c   : > { %8710 = vmatprep.mubr.msk.f32.mxu1 %vm10464_vm0, %v10465_v1 }
0x155e   : > { %v2837_v29 = vpop.f32.mrb[18].mxu1 }
0x155f   : > { %v2838_v31 = vadd.f32 %v11193_v6, %v2837_v29  ;;  %v8682_v32 = vpop.f32.mrb[19].mxu1 }
0x1560   : > { %v8126_v32 = vld [vmem:[%s12210_s22 + $0x28] sm:$0xff] }
0x1561   : > { %v2841_v33 = vmax.f32 %v2838_v31, 0.0  ;;  %v8125_v31 = vld [vmem:[%s12210_s22 + $0x20] sm:$0xff] }
0x1563   : > { %8700 = vmatmul.mubr.msk.f32.vlgmr.msra.gmra.mrb[14].mxu0 %vm2179_vm5, %v2841_v33  ;;  %v8127_v33 = vld [vmem:[%s12210_s22 + $0x30] sm:$0xff] }
0x1564   : > { %8725 = vmatprep.mubr.msk.f32.mxu0 %vm10464_vm0, %v10465_v1 }
0x1636   : > { %v2911_v60 = vpop.f32.mrb[14].mxu0 }
0x1637   : > { %v2912_v62 = vadd.f32 %v11199_v30, %v2911_v60  ;;  %v8701_v34 = vpop.f32.mrb[15].mxu0  ;;  %v11287_v30 = vpack.c.bf16 %v8122_v42, %v8121_v18  ;;  %v11342_v60 = vpack.c.bf16 %v8126_v32, %v8125_v31 }
0x1639   : > { %v11279_v36 = vadd.f32 %v2912_v62, %v2750_v44  ;;  %9257 = vmatpush3.bf16.msra.mxu1 %v11287_v30  ;;  %v8128_v62 = vld [vmem:[%s12210_s22 + $0x38] sm:$0xff] }
0x163a   : > { %9258 = vmatprep.subr.bf16.mxu1 %v10463_v0  ;;  %v11346_v34 = vpack.c.bf16 %v8128_v62, %v8127_v33 }
0x163b   : > { %v2952_v6 = vsel %vm1552_vm2, %v11279_v36, 0.0 }
0x163c   : > { %2953 = vadd.xlane.f32.xlu0 %v2952_v6 }
0x163d   : > { %9260 = vmatpush3.bf16.msra.mxu1 %v11293_v45 }
0x163e   : > { %8713 = vmatprep.subr.mxu1 %v10465_v1 }
0x16c9   : > { %v2954_v38 = vpop.xlane.xlu0 %2953 }
0x16ca   : > { %v2955_v35 = vmul.f32 0.03125, %v2954_v38 }
0x16cc   : > { %v2956_v37 = vsub.f32 %v11279_v36, %v2955_v35 }
0x16ce   : > { %v2957_v39 = vmul.f32 %v2956_v37, %v2956_v37 }
0x16d0   : > { %v2958_v40 = vsel %vm1552_vm2, %v2957_v39, 0.0 }
0x16d1   : > { %2959 = vadd.xlane.f32.xlu1 %v2958_v40 }
0x175e   : > { %v2960_v20 = vpop.xlane.xlu1 %2959 }
0x175f   : > { %v2961_v46 = vmul.f32 0.03125, %v2960_v20 }
0x1761   : > { %v2962_v47 = vadd.f32 1e-05, %v2961_v46 }
0x1763   : > { %9747 = vrsqrt.f32 %v2962_v47 }
0x176d   : > { %v9748_v51 = vpop.eup %9747 }
0x176e   : > { %v2964_v54 = vmul.f32 %v9748_v51, %v2956_v37 }
0x1770   : > { %v2971_v57 = vmul.f32 %v11298_v53, %v2964_v54 }
0x1772   : > { %v2978_v58 = vadd.f32 %v11301_v56, %v2971_v57  ;;  %v8131_v57 = vld [vmem:[%s12211_s20 + $0x20] sm:$0xff] }
0x1774   : > { %8711 = vmatmul.mubr.msk.f32.vlgmr.msra.gmra.mrb[20].mxu1 %vm1552_vm2, %v2978_v58 }
0x1775   : > { %8715 = vmatprep.mubr.msk.f32.mxu1 %vm10464_vm0, %v10465_v1 }
0x1847   : > { %v3048_v59 = vpop.f32.mrb[20].mxu1 }
0x1848   : > { %3221 = vrot.lane.b32.xlu1 %v3048_v59, %s12215_s17  ;;  %3054 = vrot.lane.b32.xlu0 %v3048_v59, %s12216_s18  ;;  %v8712_v61 = vpop.f32.mrb[21].mxu1  ;;  %v3052_v63 = vmul.f32 0.25, %v3048_v59 }
0x1849   : > { %v8134_v61 = vld [vmem:[%s12211_s20 + $0x38] sm:$0xff] }
0x184c   : > { %3219 = vrot.lane.b32.xlu1 %v3052_v63, %s12217_s19 }
0x18ba   : > { %v3222_v2 = vpop.permute.xlu1 %3221  ;;  %v3055_v3 = vpop.permute.xlu0 %3054 }
0x18bb   : > { %8714 = vmatpush3.xpose.msk.msra.mxu1 %vm1370_vm1, %v3055_v3  ;;  %8724 = vmatpush3.xpose.msk.msra.mxu0 %vm1370_vm1, %v3222_v2  ;;  %v8135_v2 = vld [vmem:[%s12212_s3 + $0x40] sm:$0xff]  ;;  %v8136_v3 = vld [vmem:[%s12212_s3 + $0x48] sm:$0xff] }
0x18bc   : > { %8718 = vmatprep.subr.mxu1 %v10465_v1  ;;  %9261 = vmatprep.subr.bf16.mxu0 %v10463_v0 }
0x18be   : > { %v3220_v4 = vpop.permute.xlu1 %3219  ;;  %8716 = vmatmul.mubr.msk.f32.vlgmr.msra.gmra.mrb[22].mxu1 %vm1370_vm1, %v3052_v63 }
0x18bf   : > { %8726 = vmatmul.mubr.msk.f32.vlgmr.msra.gmra.mrb[16].mxu0 %vm1370_vm1, %v3220_v4  ;;  %8720 = vmatprep.mubr.msk.f32.mxu1 %vm10464_vm0, %v10465_v1  ;;  %v8137_v4 = vld [vmem:[%s12212_s3 + $0x50] sm:$0xff] }
0x18c0   : > { %8741 = vmatprep.mubr.msk.f32.mxu0 %vm10464_vm0, %v10465_v1  ;;  %9263 = vmatpush3.bf16.msra.mxu0 %v11342_v60 }
0x18c1   : > { %9264 = vmatprep.subr.bf16.mxu0 %v10463_v0 }
0x18c4   : > { %9266 = vmatpush3.bf16.msra.mxu0 %v11346_v34 }
0x18c5   : > { %9273 = vmatprep.subr.bf16.mxu0 %v10463_v0 }
0x1991   : > { %v3127_v27 = vpop.f32.mrb[22].mxu1 }
0x1992   : > { %v3131_v7 = vsel %vm11096_vm3, -1e+09, %v3127_v27  ;;  %v8717_v8 = vpop.f32.mrb[23].mxu1  ;;  %v3293_v9 = vpop.f32.mrb[16].mxu0  ;;  %v11378_v27 = vpack.c.bf16 %v8136_v3, %v8135_v2 }
0x1993   : > { %v3297_v10 = vsel %vm11096_vm3, -1e+09, %v3293_v9  ;;  %v8727_v11 = vpop.f32.mrb[17].mxu0  ;;  %v3132_v12 = vsel %vm1734_vm4, %v3131_v7, -inf  ;;  %v8139_v9 = vld [vmem:[%s12212_s3 + $0x60] sm:$0xff] }
0x1994   : > { %3133 = vmax.xlane.f32.xlu0 %v3132_v12  ;;  %v3298_v14 = vsel %vm1734_vm4, %v3297_v10, -inf }
0x1995   : > { %3299 = vmax.xlane.f32.xlu1 %v3298_v14 }
0x19a6   : > { %3143 = vrot.lane.b32.xlu1 %v3048_v59, %s12218_s21 }
0x1a21   : > { %v3134_v15 = vpop.xlane.xlu0 %3133 }
0x1a22   : > { %v3135_v41 = vsub.f32 %v3131_v7, %v3134_v15  ;;  %v3300_v44 = vpop.xlane.xlu1 %3299  ;;  %v8138_v7 = vld [vmem:[%s12212_s3 + $0x58] sm:$0xff] }
0x1a23   : > { %v3301_v50 = vsub.f32 %v3297_v10, %v3300_v44  ;;  %v11382_v8 = vpack.c.bf16 %v8138_v7, %v8137_v4  ;;  %v8140_v10 = vld [vmem:[%s12212_s3 + $0x68] sm:$0xff]  ;;  %v11394_v44 = vld [vmem:[%s12213_s12 + $0x1] ss:$0 sm:$0xff] }
0x1a24   : > { %v3136_v16 = vmul.f32 1.442695, %v3135_v41  ;;  %v11388_v11 = vpack.c.bf16 %v8140_v10, %v8139_v9 }
0x1a25   : > { %v3302_v19 = vmul.f32 1.442695, %v3301_v50 }
0x1a26   : > { %9749 = vpow2.f32 %v3136_v16  ;;  %v3144_v21 = vpop.permute.xlu1 %3143  ;;  %v11397_v16 = vld [vmem:[%s12214_s9 + $0x1] ss:$0 sm:$0xff]  ;;  %s12226_s9 = sld [smem:[#allocation66_spill]] }
0x1a27   : > { %8719 = vmatpush3.msra.mxu1 %v3144_v21  ;;  %9751 = vpow2.f32 %v3302_v19 }
0x1a28   : > { %8728 = vmatprep.subr.mxu1 %v10465_v1 }
0x1a30   : > { %v9750_v52 = vpop.eup %9749 }
0x1a31   : > { %v3138_v22 = vsel %vm1734_vm4, %v9750_v52, 0.0  ;;  %v9752_v23 = vpop.eup %9751 }
0x1a32   : > { %3139 = vadd.xlane.f32.xlu0 %v3138_v22  ;;  %v3304_v55 = vsel %vm1734_vm4, %v9752_v23, 0.0  ;;  %v8142_v22 = vld [vmem:[%s12212_s3 + $0x78] sm:$0xff] }
0x1a36   : > { %3305 = vadd.xlane.f32.xlu0 %v3304_v55  ;;  %v11414_v55 = vld [vmem:[#allocation8 + $0x1] ss:$0 sm:$0xff] }
0x1a4c   : > { %3309 = vrot.lane.b32.xlu0 %v3048_v59, %s12219_s24  ;;  %v8133_v59 = vld [vmem:[%s12211_s20 + $0x30] sm:$0xff] }
0x1a4d   : > { %v11371_v63 = vpack.c.bf16 %v8134_v61, %v8133_v59 }
0x1abf   : > { %v3140_v24 = vpop.xlane.xlu0 %3139 }
0x1ac0   : > { %9753 = vrcp.f32 %v3140_v24 }
0x1ac3   : > { %v3306_v25 = vpop.xlane.xlu0 %3305 }
0x1ac4   : > { %9755 = vrcp.f32 %v3306_v25 }
0x1ac7   : > { %v3310_v28 = vpop.permute.xlu0 %3309 }
0x1aca   : > { %v9754_v5 = vpop.eup %9753 }
0x1acb   : > { %v3142_v26 = vmul.f32 %v9754_v5, %v9750_v52  ;;  %v8141_v52 = vld [vmem:[%s12212_s3 + $0x70] sm:$0xff]  ;;  %s12221_s3 = sld [smem:[#allocation55_spill]] }
0x1acd   : > { %8721 = vmatmul.mubr.msk.f32.vlgmr.msra.gmra.mrb[24].mxu1 %vm1734_vm4, %v3142_v26 }
0x1ace   : > { %v9756_v13 = vpop.eup %9755  ;;  %8729 = vmatpush3.msra.mxu1 %v3310_v28  ;;  %8730 = vmatprep.mubr.msk.f32.mxu1 %vm10464_vm0, %v10465_v1 }
0x1acf   : > { %v3308_v29 = vmul.f32 %v9756_v13, %v9752_v23  ;;  %9267 = vmatprep.subr.bf16.mxu1 %v10463_v0  ;;  %v11410_v23 = vpack.c.bf16 %v8142_v22, %v8141_v52 }
0x1ad1   : > { %8731 = vmatmul.mubr.msk.f32.vlgmr.msra.gmra.mrb[26].mxu1 %vm1734_vm4, %v3308_v29 }
0x1ad2   : > { %8752 = vmatprep.mubr.msk.f32.mxu1 %vm10464_vm0, %v10465_v1 }
0x1ba0   : > { %v3215_v6 = vpop.f32.mrb[24].mxu1 }
0x1ba1   : > { %v8722_v38 = vpop.f32.mrb[25].mxu1 }
0x1ba4   : > { %v3381_v35 = vpop.f32.mrb[26].mxu1 }
0x1ba5   : > { %3386 = vrot.lane.b32.xlu1 %v3381_v35, %s12220_s25  ;;  %v8732_v37 = vpop.f32.mrb[27].mxu1 }
0x1c17   : > { %v3387_v39 = vpop.permute.xlu1 %3386 }
0x1c18   : > { %v3389_v40 = vsel %vm1370_vm1, %v3215_v6, %v3387_v39 }
0x1c19   : > { %8742 = vmatmul.mubr.msk.f32.vlgmr.msra.gmra.mrb[18].mxu0 %vm1552_vm2, %v3389_v40 }
0x1c1a   : > { %8771 = vmatprep.mubr.msk.f32.mxu0 %vm10464_vm0, %v10465_v1  ;;  %9275 = vmatpush3.bf16.msra.mxu0 %v11378_v27 }
0x1c1b   : > { %9276 = vmatprep.subr.bf16.mxu0 %v10463_v0 }
0x1c1e   : > { %9278 = vmatpush3.bf16.msra.mxu0 %v11382_v8 }
0x1c1f   : > { %9279 = vmatprep.subr.bf16.mxu0 %v10463_v0 }
0x1c22   : > { %9281 = vmatpush3.bf16.msra.mxu0 %v11388_v11 }
0x1c23   : > { %9282 = vmatprep.subr.bf16.mxu0 %v10463_v0 }
0x1c26   : > { %9284 = vmatpush3.bf16.msra.mxu0 %v11410_v23 }
0x1c27   : > { %8795 = vmatprep.subr.mxu0 %v10465_v1 }
0x1cec   : > { %v3459_v18 = vpop.f32.mrb[18].mxu0 }
0x1ced   : > { %v11357_v42 = vadd.f32 %v3459_v18, %v11279_v36  ;;  %v8743_v43 = vpop.f32.mrb[19].mxu0  ;;  %v8132_v36 = vld [vmem:[%s12211_s20 + $0x28] sm:$0xff] }
0x1cee   : > { %v11365_v58 = vpack.c.bf16 %v8132_v36, %v8131_v57 }
0x1cef   : > { %v3463_v17 = vsel %vm1552_vm2, %v11357_v42, 0.0 }
0x1cf0   : > { %3464 = vadd.xlane.f32.xlu1 %v3463_v17  ;;  %9269 = vmatpush3.bf16.msra.mxu1 %v11365_v58 }
0x1cf1   : > { %9270 = vmatprep.subr.bf16.mxu1 %v10463_v0 }
0x1cf4   : > { %9272 = vmatpush3.bf16.msra.mxu1 %v11371_v63 }
0x1cf5   : > { %9285 = vmatprep.subr.bf16.mxu1 %v10463_v0 }
0x1d7d   : > { %v3465_v20 = vpop.xlane.xlu1 %3464 }
0x1d7e   : > { %v3466_v46 = vmul.f32 0.03125, %v3465_v20 }
0x1d80   : > { %v3467_v47 = vsub.f32 %v11357_v42, %v3466_v46 }
0x1d82   : > { %v3468_v51 = vmul.f32 %v3467_v47, %v3467_v47 }
0x1d84   : > { %v3469_v54 = vsel %vm1552_vm2, %v3468_v51, 0.0 }
0x1d85   : > { %3470 = vadd.xlane.f32.xlu0 %v3469_v54 }
0x1e12   : > { %v3471_v12 = vpop.xlane.xlu0 %3470 }
0x1e13   : > { %v3472_v14 = vmul.f32 0.03125, %v3471_v12 }
0x1e15   : > { %v3473_v15 = vadd.f32 1e-06, %v3472_v14 }
0x1e17   : > { %9757 = vrsqrt.f32 %v3473_v15 }
0x1e21   : > { %v9758_v41 = vpop.eup %9757 }
0x1e22   : > { %v3475_v50 = vmul.f32 %v9758_v41, %v3467_v47 }
0x1e24   : > { %v3482_v19 = vmul.f32 %v11394_v44, %v3475_v50 }
0x1e26   : > { %v3489_v21 = vadd.f32 %v11397_v16, %v3482_v19 }
0x1e28   : > { %8753 = vmatmul.mubr.msk.f32.vlgmr.msra.gmra.mrb[28].mxu1 %vm1552_vm2, %v3489_v21 }
0x1e29   : > { %9287 = vmatpush3.bf16.msra.mxu1 %v11287_v30  ;;  %8782 = vmatprep.mubr.msk.f32.mxu1 %vm10464_vm0, %v10465_v1 }
0x1e2a   : > { %9288 = vmatprep.subr.bf16.mxu1 %v10463_v0 }
0x1e2d   : > { %9290 = vmatpush3.bf16.msra.mxu1 %v11293_v45  ;;  %v11420_v45 = vld [vmem:[#allocation10 + $0x1] ss:$0 sm:$0xff] }
0x1e2e   : > { %8785 = vmatprep.subr.mxu1 %v10465_v1 }
0x1efb   : > { %v3565_v30 = vpop.f32.mrb[28].mxu1 }
0x1efc   : > { %v3566_v24 = vadd.f32 %v11414_v55, %v3565_v30  ;;  %v8754_v25 = vpop.f32.mrb[29].mxu1 }
0x1efe   : > { %v3569_v5 = vmax.f32 %v3566_v24, 0.0 }
0x1f00   : > { %8772 = vmatmul.mubr.msk.f32.vlgmr.msra.gmra.mrb[20].mxu0 %vm2179_vm5, %v3569_v5 }
0x1f01   : > { %8797 = vmatprep.mubr.msk.f32.mxu0 %vm10464_vm0, %v10465_v1 }
0x1fd3   : > { %v3645_v26 = vpop.f32.mrb[20].mxu0 }
0x1fd4   : > { %v3646_v28 = vadd.f32 %v11420_v45, %v3645_v26  ;;  %v8773_v13 = vpop.f32.mrb[21].mxu0 }
0x1fd6   : > { %v11424_v29 = vadd.f32 %v3646_v28, %v11357_v42 }
0x1fd8   : > { %v3650_v31 = vsel %vm1552_vm2, %v11424_v29, 0.0 }
0x1fd9   : > { %3651 = vadd.xlane.f32.xlu0 %v3650_v31 }
0x2066   : > { %v3652_v32 = vpop.xlane.xlu0 %3651 }
0x2067   : > { %v3653_v33 = vmul.f32 0.03125, %v3652_v32 }
0x2069   : > { %v3654_v62 = vsub.f32 %v11424_v29, %v3653_v33 }
0x206b   : > { %v3655_v6 = vmul.f32 %v3654_v62, %v3654_v62 }
0x206d   : > { %v3656_v38 = vsel %vm1552_vm2, %v3655_v6, 0.0 }
0x206e   : > { %3657 = vadd.xlane.f32.xlu1 %v3656_v38 }
0x20fb   : > { %v3658_v35 = vpop.xlane.xlu1 %3657 }
0x20fc   : > { %v3659_v37 = vmul.f32 0.03125, %v3658_v35 }
0x20fe   : > { %v3660_v39 = vadd.f32 1e-05, %v3659_v37 }
0x2100   : > { %9759 = vrsqrt.f32 %v3660_v39 }
0x210a   : > { %v9760_v40 = vpop.eup %9759 }
0x210b   : > { %v3662_v18 = vmul.f32 %v9760_v40, %v3654_v62 }
0x210d   : > { %v3663_v42 = vmul.f32 %v11298_v53, %v3662_v18 }
0x210f   : > { %v3664_v43 = vadd.f32 %v11301_v56, %v3663_v42  ;;  %v4312_v42 = vld [vmem:[%s12221_s3] sm:$0xff] }
0x2111   : > { %8783 = vmatmul.mubr.msk.f32.vlgmr.msra.gmra.mrb[30].mxu1 %vm1552_vm2, %v3664_v43  ;;  %v4313_v43 = vld [vmem:[%s12221_s3 + $0x8] sm:$0xff] }
0x2112   : > { %8787 = vmatprep.mubr.msk.f32.mxu1 %vm10464_vm0, %v10465_v1 }
0x21e4   : > { %v3734_v17 = vpop.f32.mrb[30].mxu1 }
0x21e5   : > { %3907 = vrot.lane.b32.xlu1 %v3734_v17, %s12215_s17  ;;  %3740 = vrot.lane.b32.xlu0 %v3734_v17, %s12216_s18  ;;  %v8784_v20 = vpop.f32.mrb[31].mxu1  ;;  %v3738_v46 = vmul.f32 0.25, %v3734_v17 }
0x21e9   : > { %3905 = vrot.lane.b32.xlu1 %v3738_v46, %s12217_s19 }
0x2257   : > { %v3908_v47 = vpop.permute.xlu1 %3907  ;;  %v3741_v51 = vpop.permute.xlu0 %3740 }
0x2258   : > { %8786 = vmatpush3.xpose.msk.msra.mxu1 %vm1370_vm1, %v3741_v51  ;;  %8796 = vmatpush3.xpose.msk.msra.mxu0 %vm1370_vm1, %v3908_v47  ;;  %v4315_v51 = vld [vmem:[%s12221_s3 + $0x18] sm:$0xff] }
0x2259   : > { %8790 = vmatprep.subr.mxu1 %v10465_v1  ;;  %9291 = vmatprep.subr.bf16.mxu0 %v10463_v0 }
0x225b   : > { %v3906_v53 = vpop.permute.xlu1 %3905  ;;  %8788 = vmatmul.mubr.msk.f32.vlgmr.msra.gmra.mrb[32].mxu1 %vm1370_vm1, %v3738_v46 }
0x225c   : > { %8798 = vmatmul.mubr.msk.f32.vlgmr.msra.gmra.mrb[22].mxu0 %vm1370_vm1, %v3906_v53  ;;  %8792 = vmatprep.mubr.msk.f32.mxu1 %vm10464_vm0, %v10465_v1 }
0x225d   : > { %9293 = vmatpush3.bf16.msra.mxu0 %v11342_v60  ;;  %8813 = vmatprep.mubr.msk.f32.mxu0 %vm10464_vm0, %v10465_v1 }
0x225e   : > { %9294 = vmatprep.subr.bf16.mxu0 %v10463_v0 }
0x2261   : > { %9296 = vmatpush3.bf16.msra.mxu0 %v11346_v34 }
0x2262   : > { %9303 = vmatprep.subr.bf16.mxu0 %v10463_v0 }
0x232e   : > { %v3813_v56 = vpop.f32.mrb[32].mxu1 }
0x232f   : > { %v3817_v54 = vsel %vm11096_vm3, -1e+09, %v3813_v56  ;;  %v8789_v57 = vpop.f32.mrb[33].mxu1  ;;  %v3979_v36 = vpop.f32.mrb[22].mxu0  ;;  %v4402_v56 = vld [vmem:[%s12222_s6 + $0x10] sm:$0xff] }
0x2330   : > { %v3983_v59 = vsel %vm11096_vm3, -1e+09, %v3979_v36  ;;  %v8799_v61 = vpop.f32.mrb[23].mxu0  ;;  %v3818_v60 = vsel %vm1734_vm4, %v3817_v54, -inf }
0x2331   : > { %3819 = vmax.xlane.f32.xlu0 %v3818_v60  ;;  %v3984_v2 = vsel %vm1734_vm4, %v3983_v59, -inf  ;;  %v11513_v60 = vld [vmem:[%s11038_s15] sm:$0xff] }
0x2332   : > { %3985 = vmax.xlane.f32.xlu1 %v3984_v2  ;;  %v4401_v2 = vld [vmem:[%s12222_s6 + $0x8] sm:$0xff] }
0x2343   : > { %3829 = vrot.lane.b32.xlu1 %v3734_v17, %s12218_s21 }
0x23be   : > { %v3820_v34 = vpop.xlane.xlu0 %3819 }
0x23bf   : > { %v3821_v3 = vsub.f32 %v3817_v54, %v3820_v34  ;;  %v3986_v4 = vpop.xlane.xlu1 %3985  ;;  %v4403_v54 = vld [vmem:[%s12222_s6 + $0x18] sm:$0xff] }
0x23c0   : > { %v3987_v7 = vsub.f32 %v3983_v59, %v3986_v4  ;;  %v9322_v59 = vpack.c.bf16 %v4403_v54, %v4402_v56  ;;  %v4397_v4 = vsub.f32 1.0, %v11513_v60 }
0x23c1   : > { %v3822_v9 = vmul.f32 1.442695, %v3821_v3  ;;  %v8169_v3 = vld [vmem:[#allocation11] ss:$0 sm:$0xff] }
0x23c2   : > { %v3988_v10 = vmul.f32 1.442695, %v3987_v7 }
0x23c3   : > { %9761 = vpow2.f32 %v3822_v9  ;;  %v3830_v12 = vpop.permute.xlu1 %3829 }
0x23c4   : > { %8791 = vmatpush3.msra.mxu1 %v3830_v12  ;;  %9763 = vpow2.f32 %v3988_v10  ;;  %v9824_v10 = vld [vmem:[%s10985_s23] sm:$0xff] }
0x23c5   : > { %8800 = vmatprep.subr.mxu1 %v10465_v1  ;;  %v11527_v12 = vmul.f32 %v9824_v10, %v11513_v60 }
0x23cd   : > { %v9762_v14 = vpop.eup %9761 }
0x23ce   : > { %v3824_v15 = vsel %vm1734_vm4, %v9762_v14, 0.0  ;;  %v9764_v41 = vpop.eup %9763 }
0x23cf   : > { %3825 = vadd.xlane.f32.xlu0 %v3824_v15  ;;  %v3990_v50 = vsel %vm1734_vm4, %v9764_v41, 0.0 }
0x23d3   : > { %3991 = vadd.xlane.f32.xlu0 %v3990_v50 }
0x23e9   : > { %3995 = vrot.lane.b32.xlu0 %v3734_v17, %s12219_s24  ;;  %v9316_v17 = vpack.c.bf16 %v4313_v43, %v4312_v42 }
0x245c   : > { %v3826_v19 = vpop.xlane.xlu0 %3825 }
0x245d   : > { %9765 = vrcp.f32 %v3826_v19 }
0x2460   : > { %v3992_v21 = vpop.xlane.xlu0 %3991 }
0x2461   : > { %9767 = vrcp.f32 %v3992_v21 }
0x2464   : > { %v3996_v30 = vpop.permute.xlu0 %3995 }
0x2467   : > { %v9766_v52 = vpop.eup %9765 }
0x2468   : > { %v3828_v22 = vmul.f32 %v9766_v52, %v9762_v14  ;;  %v8173_v52 = vld [vmem:[#allocation13] ss:$0 sm:$0xff] }
0x246a   : > { %8793 = vmatmul.mubr.msk.f32.vlgmr.msra.gmra.mrb[34].mxu1 %vm1734_vm4, %v3828_v22 }
0x246b   : > { %v9768_v24 = vpop.eup %9767  ;;  %8801 = vmatpush3.msra.mxu1 %v3996_v30  ;;  %8802 = vmatprep.mubr.msk.f32.mxu1 %vm10464_vm0, %v10465_v1 }
0x246c   : > { %v3994_v25 = vmul.f32 %v9768_v24, %v9764_v41  ;;  %9297 = vmatprep.subr.bf16.mxu1 %v10463_v0 }
0x246e   : > { %8803 = vmatmul.mubr.msk.f32.vlgmr.msra.gmra.mrb[36].mxu1 %vm1734_vm4, %v3994_v25  ;;  %v9825_v25 = vld [vmem:[#allocation5] sm:$0xff] }
0x246f   : > { %9299 = vmatpush3.bf16.msra.mxu1 %v11365_v58  ;;  %8824 = vmatprep.mubr.msk.f32.mxu1 %vm10464_vm0, %v10465_v1 }
0x2470   : > { %9300 = vmatprep.subr.bf16.mxu1 %v10463_v0 }
0x2473   : > { %9302 = vmatpush3.bf16.msra.mxu1 %v11371_v63 }
0x2474   : > { %9315 = vmatprep.subr.bf16.mxu1 %v10463_v0 }
0x253d   : > { %v3901_v5 = vpop.f32.mrb[34].mxu1 }
0x253e   : > { %v8794_v26 = vpop.f32.mrb[35].mxu1 }
0x2541   : > { %v4067_v28 = vpop.f32.mrb[36].mxu1 }
0x2542   : > { %4072 = vrot.lane.b32.xlu1 %v4067_v28, %s12220_s25  ;;  %v8804_v13 = vpop.f32.mrb[37].mxu1 }
0x25b4   : > { %v4073_v31 = vpop.permute.xlu1 %4072 }
0x25b5   : > { %v4075_v32 = vsel %vm1370_vm1, %v3901_v5, %v4073_v31 }
0x25b6   : > { %8814 = vmatmul.mubr.msk.f32.vlgmr.msra.gmra.mrb[24].mxu0 %vm1552_vm2, %v4075_v32 }
0x25b7   : > { %9305 = vmatpush3.bf16.msra.mxu0 %v11378_v27  ;;  %8843 = vmatprep.mubr.msk.f32.mxu0 %vm10464_vm0, %v10465_v1 }
0x25b8   : > { %9306 = vmatprep.subr.bf16.mxu0 %v10463_v0 }
0x25bb   : > { %9308 = vmatpush3.bf16.msra.mxu0 %v11382_v8 }
0x25bc   : > { %9309 = vmatprep.subr.bf16.mxu0 %v10463_v0 }
0x25bf   : > { %9311 = vmatpush3.bf16.msra.mxu0 %v11388_v11 }
0x25c0   : > { %9312 = vmatprep.subr.bf16.mxu0 %v10463_v0 }
0x25c3   : > { %9314 = vmatpush3.bf16.msra.mxu0 %v11410_v23 }
0x25c4   : > { %9327 = vmatprep.subr.bf16.mxu0 %v10463_v0 }
0x2689   : > { %v4145_v58 = vpop.f32.mrb[24].mxu0 }
0x268a   : > { %v4146_v63 = vadd.f32 %v4145_v58, %v11424_v29  ;;  %v8815_v27 = vpop.f32.mrb[25].mxu0 }
0x268c   : > { %v4149_v33 = vsel %vm1552_vm2, %v4146_v63, 0.0 }
0x268d   : > { %4150 = vadd.xlane.f32.xlu1 %v4149_v33 }
0x271a   : > { %v4151_v62 = vpop.xlane.xlu1 %4150 }
0x271b   : > { %v4152_v8 = vmul.f32 0.03125, %v4151_v62 }
0x271d   : > { %v4153_v6 = vsub.f32 %v4146_v63, %v4152_v8 }
0x271f   : > { %v4154_v38 = vmul.f32 %v4153_v6, %v4153_v6 }
0x2721   : > { %v4155_v11 = vsel %vm1552_vm2, %v4154_v38, 0.0 }
0x2722   : > { %4156 = vadd.xlane.f32.xlu0 %v4155_v11 }
0x27af   : > { %v4157_v35 = vpop.xlane.xlu0 %4156 }
0x27b0   : > { %v4158_v23 = vmul.f32 0.03125, %v4157_v35 }
0x27b2   : > { %v4159_v37 = vadd.f32 1e-06, %v4158_v23 }
0x27b4   : > { %9769 = vrsqrt.f32 %v4159_v37  ;;  %v11554_v37 = vld [vmem:[#allocation14] ss:$0 sm:$0xff] }
0x27be   : > { %v9770_v39 = vpop.eup %9769 }
0x27bf   : > { %v4161_v40 = vmul.f32 %v9770_v39, %v4153_v6 }
0x27c1   : > { %v4162_v29 = vmul.f32 %v11394_v44, %v4161_v40  ;;  %v11556_v40 = vld [vmem:[#allocation16] ss:$0 sm:$0xff] }
0x27c3   : > { %v4163_v18 = vadd.f32 %v11397_v16, %v4162_v29  ;;  %v4314_v16 = vld [vmem:[%s12221_s3 + $0x10] sm:$0xff]  ;;  %s12223_s3 = sld [smem:[#allocation60_spill]] }
0x27c4   : > { %v9319_v53 = vpack.c.bf16 %v4315_v51, %v4314_v16 }
0x27c5   : > { %8825 = vmatmul.mubr.msk.f32.vlgmr.msra.gmra.mrb[38].mxu1 %vm1552_vm2, %v4163_v18 }
0x27c6   : > { %8854 = vmatprep.mubr.msk.f32.mxu1 %vm10464_vm0, %v10465_v1  ;;  %9317 = vmatpush3.bf16.msra.mxu1 %v9316_v17 }
0x27c7   : > { %9318 = vmatprep.subr.bf16.mxu1 %v10463_v0 }
0x27c9   : > { %v4559_v27 = vld [vmem:[%s12223_s3 + $0x8] sm:$0xff]  ;;  %v4560_v62 = vld [vmem:[%s12223_s3 + $0x10] sm:$0xff]  ;;  %v4561_v8 = vld [vmem:[%s12223_s3 + $0x18] sm:$0xff] }
0x27ca   : > { %9320 = vmatpush3.bf16.msra.mxu1 %v9319_v53  ;;  %v11550_v6 = vpack.c.bf16 %v4561_v8, %v4560_v62 }
0x27cb   : > { %9321 = vmatprep.subr.bf16.mxu1 %v10463_v0 }
0x2898   : > { %v4233_v20 = vpop.f32.mrb[38].mxu1 }
0x2899   : > { %v4234_v46 = vadd.f32 %v11414_v55, %v4233_v20  ;;  %v8826_v44 = vpop.f32.mrb[39].mxu1 }
0x289b   : > { %v4237_v47 = vmax.f32 %v4234_v46, 0.0 }
0x289d   : > { %8844 = vmatmul.mubr.msk.f32.vlgmr.msra.gmra.mrb[26].mxu0 %vm2179_vm5, %v4237_v47 }
0x289e   : > { %8879 = vmatprep.mubr.msk.f32.mxu0 %vm10464_vm0, %v10465_v1 }
0x2970   : > { %v4307_v57 = vpop.f32.mrb[26].mxu0 }
0x2971   : > { %v4308_v55 = vadd.f32 %v11420_v45, %v4307_v57  ;;  %v8845_v36 = vpop.f32.mrb[27].mxu0  ;;  %v4400_v45 = vld [vmem:[%s12222_s6] sm:$0xff]  ;;  %s12224_s6 = sld [smem:[#allocation61_spill]] }
0x2972   : > { %v9325_v34 = vpack.c.bf16 %v4401_v2, %v4400_v45 }
0x2973   : > { %v4311_v61 = vadd.f32 %v4308_v55, %v4146_v63  ;;  %v4558_v63 = vld [vmem:[%s12223_s3] sm:$0xff] }
0x2974   : > { %v11544_v33 = vpack.c.bf16 %v4559_v27, %v4558_v63 }
0x2975   : > { %8855 = vmatmul.mubr.msk.f32.vlgmr.msra.gmra.mrb[40].mxu1 %vm1552_vm2, %v4311_v61 }
0x2976   : > { %9323 = vmatpush3.bf16.msra.mxu1 %v9322_v59  ;;  %8861 = vmatprep.mubr.msk.f32.mxu1 %vm10464_vm0, %v10465_v1 }
0x2977   : > { %9324 = vmatprep.subr.bf16.mxu1 %v10463_v0  ;;  %9329 = vmatpush3.bf16.msra.mxu0 %v11544_v33 }
0x2978   : > { %9330 = vmatprep.subr.bf16.mxu0 %v10463_v0 }
0x2979   : > { %8862 = vmatmul.mubr.msk.f32.vlgmr.msra.gmra.mrb[42].mxu1 %vm1370_vm1, %v11513_v60 }
0x297a   : > { %8868 = vmatprep.mubr.msk.f32.mxu1 %vm10464_vm0, %v10465_v1  ;;  %9326 = vmatpush3.bf16.msra.mxu1 %v9325_v34 }
0x297b   : > { %8882 = vmatprep.subr.mxu1 %v10465_v1  ;;  %9332 = vmatpush3.bf16.msra.mxu0 %v11550_v6 }
0x297c   : > { %8892 = vmatprep.subr.mxu0 %v10465_v1 }
0x2a48   : > { %v4392_v7 = vpop.f32.mrb[40].mxu1 }
0x2a49   : > { %v11523_v9 = vadd.f32 %v8169_v3, %v4392_v7  ;;  %v8856_v14 = vpop.f32.mrb[41].mxu1 }
0x2a4b   : > { %v4398_v15 = vmul.f32 %v4397_v4, %v11523_v9 }
0x2a4c   : > { %v4470_v41 = vpop.f32.mrb[42].mxu1 }
0x2a4d   : > { %v4399_v50 = vadd.f32 %v4398_v15, %v11527_v12  ;;  %v8863_v19 = vpop.f32.mrb[43].mxu1 }
0x2a4f   : > { %8869 = vmatmul.mubr.msk.f32.vlgmr.msra.gmra.mrb[44].mxu1 %vm1370_vm1, %v4399_v50 }
0x2a50   : > { %8884 = vmatprep.mubr.msk.f32.mxu1 %vm10464_vm0, %v10465_v1 }
0x2b22   : > { %v4543_v21 = vpop.f32.mrb[44].mxu1 }
0x2b23   : > { %v4544_v22 = vadd.f32 %v4543_v21, %v4470_v41  ;;  %v8870_v30 = vpop.f32.mrb[45].mxu1 }
0x2b25   : > { %v4554_v24 = vadd.f32 %v8173_v52, %v4544_v22 }
0x2b27   : > { %v11536_v5 = vadd.f32 %v9825_v25, %v4554_v24  ;;  %v4562_v24 = vld [vmem:[%s12224_s6] sm:$0xff]  ;;  %v4563_v25 = vld [vmem:[%s12224_s6 + $0x8] sm:$0xff] }
0x2b29   : > { %v4582_v26 = vsel %vm1552_vm2, %v11536_v5, 0.0 }
0x2b2a   : > { %4583 = vadd.xlane.f32.xlu0 %v4582_v26  ;;  %v4564_v26 = vld [vmem:[%s12224_s6 + $0x10] sm:$0xff] }
0x2bb7   : > { %v4584_v28 = vpop.xlane.xlu0 %4583 }
0x2bb8   : > { %v4585_v13 = vmul.f32 0.03125, %v4584_v28  ;;  %v11597_v28 = vpack.c.bf16 %v4563_v25, %v4562_v24 }
0x2bba   : > { %v4586_v31 = vsub.f32 %v11536_v5, %v4585_v13  ;;  %v4565_v13 = vld [vmem:[%s12224_s6 + $0x18] sm:$0xff] }
0x2bbc   : > { %v4587_v32 = vmul.f32 %v4586_v31, %v4586_v31 }
0x2bbe   : > { %v4588_v58 = vsel %vm1552_vm2, %v4587_v32, 0.0 }
0x2bbf   : > { %4589 = vadd.xlane.f32.xlu1 %v4588_v58 }
0x2c4c   : > { %v4590_v38 = vpop.xlane.xlu1 %4589 }
0x2c4d   : > { %v4591_v11 = vmul.f32 0.03125, %v4590_v38 }
0x2c4f   : > { %v4592_v35 = vadd.f32 1e-05, %v4591_v11 }
0x2c51   : > { %9771 = vrsqrt.f32 %v4592_v35 }
0x2c5b   : > { %v9772_v23 = vpop.eup %9771 }
0x2c5c   : > { %v4594_v39 = vmul.f32 %v9772_v23, %v4586_v31  ;;  %v11601_v31 = vpack.c.bf16 %v4565_v13, %v4564_v26 }
0x2c5e   : > { %v4601_v29 = vmul.f32 %v11554_v37, %v4594_v39 }
0x2c60   : > { %v4608_v18 = vadd.f32 %v11556_v40, %v4601_v29 }
0x2c62   : > { %8880 = vmatmul.mubr.msk.f32.vlgmr.msra.gmra.mrb[28].mxu0 %vm1552_vm2, %v4608_v18 }
0x2c63   : > { %8894 = vmatprep.mubr.msk.f32.mxu0 %vm10464_vm0, %v10465_v1 }
0x2d35   : > { %v4678_v42 = vpop.f32.mrb[28].mxu0 }
0x2d36   : > { %4851 = vrot.lane.b32.xlu1 %v4678_v42, %s12215_s17  ;;  %4684 = vrot.lane.b32.xlu0 %v4678_v42, %s12216_s18  ;;  %v8881_v43 = vpop.f32.mrb[29].mxu0  ;;  %v4682_v17 = vmul.f32 0.25, %v4678_v42 }
0x2d3a   : > { %4849 = vrot.lane.b32.xlu1 %v4682_v17, %s12217_s19 }
0x2da8   : > { %v4852_v20 = vpop.permute.xlu1 %4851  ;;  %v4685_v46 = vpop.permute.xlu0 %4684 }
0x2da9   : > { %8883 = vmatpush3.xpose.msk.msra.mxu1 %vm1370_vm1, %v4685_v46  ;;  %8893 = vmatpush3.xpose.msk.msra.mxu0 %vm1370_vm1, %v4852_v20  ;;  %v4570_v46 = vld [vmem:[%s12225_s7 + $0x10] sm:$0xff] }
0x2daa   : > { %8887 = vmatprep.subr.mxu1 %v10465_v1  ;;  %9333 = vmatprep.subr.bf16.mxu0 %v10463_v0 }
0x2dac   : > { %v4850_v44 = vpop.permute.xlu1 %4849  ;;  %8885 = vmatmul.mubr.msk.f32.vlgmr.msra.gmra.mrb[46].mxu1 %vm1370_vm1, %v4682_v17  ;;  %v4568_v17 = vld [vmem:[%s12225_s7] sm:$0xff] }
0x2dad   : > { %8895 = vmatmul.mubr.msk.f32.vlgmr.msra.gmra.mrb[30].mxu0 %vm1370_vm1, %v4850_v44  ;;  %8889 = vmatprep.mubr.msk.f32.mxu1 %vm10464_vm0, %v10465_v1  ;;  %v4571_v44 = vld [vmem:[%s12225_s7 + $0x18] sm:$0xff] }
0x2dae   : > { %8910 = vmatprep.mubr.msk.f32.mxu0 %vm10464_vm0, %v10465_v1  ;;  %9335 = vmatpush3.bf16.msra.mxu0 %v11597_v28 }
0x2daf   : > { %9336 = vmatprep.subr.bf16.mxu0 %v10463_v0 }
0x2db2   : > { %9338 = vmatpush3.bf16.msra.mxu0 %v11601_v31 }
0x2db3   : > { %9345 = vmatprep.subr.bf16.mxu0 %v10463_v0 }
0x2e7f   : > { %v4757_v47 = vpop.f32.mrb[46].mxu1 }
0x2e80   : > { %v4761_v16 = vsel %vm11096_vm3, -1e+09, %v4757_v47  ;;  %v8886_v51 = vpop.f32.mrb[47].mxu1  ;;  %v4923_v53 = vpop.f32.mrb[30].mxu0  ;;  %v11626_v47 = vpack.c.bf16 %v4571_v44, %v4570_v46 }
0x2e81   : > { %v4927_v56 = vsel %vm11096_vm3, -1e+09, %v4923_v53  ;;  %v8896_v54 = vpop.f32.mrb[31].mxu0  ;;  %v4762_v57 = vsel %vm1734_vm4, %v4761_v16, -inf  ;;  %v4574_v51 = vld [vmem:[%s12226_s9 + $0x8] sm:$0xff]  ;;  %v4575_v53 = vld [vmem:[%s12226_s9 + $0x10] sm:$0xff] }
0x2e82   : > { %4763 = vmax.xlane.f32.xlu0 %v4762_v57  ;;  %v4928_v55 = vsel %vm1734_vm4, %v4927_v56, -inf  ;;  %v4576_v54 = vld [vmem:[%s12226_s9 + $0x18] sm:$0xff] }
0x2e83   : > { %4929 = vmax.xlane.f32.xlu1 %v4928_v55  ;;  %v11637_v57 = vpack.c.bf16 %v4576_v54, %v4575_v53  ;;  %v4577_v55 = vld [vmem:[%s12226_s9 + $0x20] sm:$0xff] }
0x2e94   : > { %4773 = vrot.lane.b32.xlu1 %v4678_v42, %s12218_s21 }
0x2f0f   : > { %v4764_v36 = vpop.xlane.xlu0 %4763 }
0x2f10   : > { %v4765_v59 = vsub.f32 %v4761_v16, %v4764_v36  ;;  %v4930_v61 = vpop.xlane.xlu1 %4929  ;;  %v4573_v16 = vld [vmem:[%s12226_s9] sm:$0xff]  ;;  %v4578_v36 = vld [vmem:[%s12226_s9 + $0x28] sm:$0xff] }
0x2f11   : > { %v4931_v45 = vsub.f32 %v4927_v56, %v4930_v61  ;;  %v11633_v56 = vpack.c.bf16 %v4574_v51, %v4573_v16 }
0x2f12   : > { %v4766_v2 = vmul.f32 1.442695, %v4765_v59  ;;  %v11643_v59 = vpack.c.bf16 %v4578_v36, %v4577_v55 }
0x2f13   : > { %v4932_v34 = vmul.f32 1.442695, %v4931_v45 }
0x2f14   : > { %9773 = vpow2.f32 %v4766_v2  ;;  %v4774_v3 = vpop.permute.xlu1 %4773 }
0x2f15   : > { %8888 = vmatpush3.msra.mxu1 %v4774_v3  ;;  %9775 = vpow2.f32 %v4932_v34  ;;  %v11648_v3 = vld [vmem:[#allocation17] ss:$0 sm:$0xff] }
0x2f16   : > { %8897 = vmatprep.subr.mxu1 %v10465_v1 }
0x2f1e   : > { %v9774_v7 = vpop.eup %9773 }
0x2f1f   : > { %v4768_v10 = vsel %vm1734_vm4, %v9774_v7, 0.0  ;;  %v9776_v14 = vpop.eup %9775 }
0x2f20   : > { %4769 = vadd.xlane.f32.xlu0 %v4768_v10  ;;  %v4934_v15 = vsel %vm1734_vm4, %v9776_v14, 0.0  ;;  %v11650_v10 = vld [vmem:[#allocation19] ss:$0 sm:$0xff] }
0x2f24   : > { %4935 = vadd.xlane.f32.xlu0 %v4934_v15 }
0x2f3a   : > { %4939 = vrot.lane.b32.xlu0 %v4678_v42, %s12219_s24 }
0x2fad   : > { %v4770_v41 = vpop.xlane.xlu0 %4769 }
0x2fae   : > { %9777 = vrcp.f32 %v4770_v41  ;;  %v4579_v41 = vld [vmem:[%s12226_s9 + $0x30] sm:$0xff] }
0x2fb1   : > { %v4936_v50 = vpop.xlane.xlu0 %4935 }
0x2fb2   : > { %9779 = vrcp.f32 %v4936_v50  ;;  %v4580_v50 = vld [vmem:[%s12226_s9 + $0x38] sm:$0xff] }
0x2fb5   : > { %v4940_v52 = vpop.permute.xlu0 %4939 }
0x2fb8   : > { %v9778_v19 = vpop.eup %9777 }
0x2fb9   : > { %v4772_v21 = vmul.f32 %v9778_v19, %v9774_v7  ;;  %v11663_v19 = vpack.c.bf16 %v4580_v50, %v4579_v41 }
0x2fbb   : > { %8890 = vmatmul.mubr.msk.f32.vlgmr.msra.gmra.mrb[48].mxu1 %vm1734_vm4, %v4772_v21  ;;  %v11667_v21 = vld [vmem:[#allocation20] ss:$0 sm:$0xff] }
0x2fbc   : > { %v9780_v22 = vpop.eup %9779  ;;  %8898 = vmatpush3.msra.mxu1 %v4940_v52  ;;  %8899 = vmatprep.mubr.msk.f32.mxu1 %vm10464_vm0, %v10465_v1 }
0x2fbd   : > { %v4938_v30 = vmul.f32 %v9780_v22, %v9776_v14  ;;  %9339 = vmatprep.subr.bf16.mxu1 %v10463_v0 }
0x2fbf   : > { %8900 = vmatmul.mubr.msk.f32.vlgmr.msra.gmra.mrb[50].mxu1 %vm1734_vm4, %v4938_v30 }
0x2fc0   : > { %8921 = vmatprep.mubr.msk.f32.mxu1 %vm10464_vm0, %v10465_v1 }
0x308e   : > { %v4845_v32 = vpop.f32.mrb[48].mxu1 }
0x308f   : > { %v8891_v58 = vpop.f32.mrb[49].mxu1 }
0x3092   : > { %v5011_v63 = vpop.f32.mrb[50].mxu1 }
0x3093   : > { %5016 = vrot.lane.b32.xlu1 %v5011_v63, %s12220_s25  ;;  %v8901_v27 = vpop.f32.mrb[51].mxu1 }
0x3105   : > { %v5017_v62 = vpop.permute.xlu1 %5016 }
0x3106   : > { %v5019_v8 = vsel %vm1370_vm1, %v4845_v32, %v5017_v62 }
0x3107   : > { %8911 = vmatmul.mubr.msk.f32.vlgmr.msra.gmra.mrb[32].mxu0 %vm1552_vm2, %v5019_v8 }
0x3108   : > { %8940 = vmatprep.mubr.msk.f32.mxu0 %vm10464_vm0, %v10465_v1  ;;  %9347 = vmatpush3.bf16.msra.mxu0 %v11633_v56 }
0x3109   : > { %9348 = vmatprep.subr.bf16.mxu0 %v10463_v0 }
0x310c   : > { %9350 = vmatpush3.bf16.msra.mxu0 %v11637_v57 }
0x310d   : > { %9351 = vmatprep.subr.bf16.mxu0 %v10463_v0 }
0x3110   : > { %9353 = vmatpush3.bf16.msra.mxu0 %v11643_v59 }
0x3111   : > { %9354 = vmatprep.subr.bf16.mxu0 %v10463_v0 }
0x3114   : > { %9356 = vmatpush3.bf16.msra.mxu0 %v11663_v19 }
0x3115   : > { %8964 = vmatprep.subr.mxu0 %v10465_v1 }
0x31da   : > { %v5089_v38 = vpop.f32.mrb[32].mxu0 }
0x31db   : > { %v11612_v11 = vadd.f32 %v5089_v38, %v11536_v5  ;;  %v8912_v35 = vpop.f32.mrb[33].mxu0  ;;  %v4569_v5 = vld [vmem:[%s12225_s7 + $0x8] sm:$0xff] }
0x31dc   : > { %v11620_v20 = vpack.c.bf16 %v4569_v5, %v4568_v17 }
0x31dd   : > { %v5093_v23 = vsel %vm1552_vm2, %v11612_v11, 0.0 }
0x31de   : > { %5094 = vadd.xlane.f32.xlu1 %v5093_v23  ;;  %9341 = vmatpush3.bf16.msra.mxu1 %v11620_v20 }
0x31df   : > { %9342 = vmatprep.subr.bf16.mxu1 %v10463_v0 }
0x31e2   : > { %9344 = vmatpush3.bf16.msra.mxu1 %v11626_v47 }
0x31e3   : > { %9357 = vmatprep.subr.bf16.mxu1 %v10463_v0 }
0x326b   : > { %v5095_v39 = vpop.xlane.xlu1 %5094 }
0x326c   : > { %v5096_v29 = vmul.f32 0.03125, %v5095_v39 }
0x326e   : > { %v5097_v18 = vsub.f32 %v11612_v11, %v5096_v29 }
0x3270   : > { %v5098_v42 = vmul.f32 %v5097_v18, %v5097_v18 }
0x3272   : > { %v5099_v43 = vsel %vm1552_vm2, %v5098_v42, 0.0 }
0x3273   : > { %5100 = vadd.xlane.f32.xlu0 %v5099_v43 }
0x3300   : > { %v5101_v61 = vpop.xlane.xlu0 %5100 }
0x3301   : > { %v5102_v45 = vmul.f32 0.03125, %v5101_v61 }
0x3303   : > { %v5103_v2 = vadd.f32 1e-06, %v5102_v45 }
0x3305   : > { %9781 = vrsqrt.f32 %v5103_v2 }
0x330f   : > { %v9782_v34 = vpop.eup %9781 }
0x3310   : > { %v5105_v7 = vmul.f32 %v9782_v34, %v5097_v18 }
0x3312   : > { %v5112_v14 = vmul.f32 %v11648_v3, %v5105_v7 }
0x3314   : > { %v5119_v15 = vadd.f32 %v11650_v10, %v5112_v14 }
0x3316   : > { %8922 = vmatmul.mubr.msk.f32.vlgmr.msra.gmra.mrb[52].mxu1 %vm1552_vm2, %v5119_v15 }
0x3317   : > { %9359 = vmatpush3.bf16.msra.mxu1 %v11544_v33  ;;  %8951 = vmatprep.mubr.msk.f32.mxu1 %vm10464_vm0, %v10465_v1 }
0x3318   : > { %9360 = vmatprep.subr.bf16.mxu1 %v10463_v0 }
0x331b   : > { %9362 = vmatpush3.bf16.msra.mxu1 %v11550_v6  ;;  %v11673_v6 = vld [vmem:[#allocation22] ss:$0 sm:$0xff] }
0x331c   : > { %8954 = vmatprep.subr.mxu1 %v10465_v1 }
0x33e9   : > { %v5195_v33 = vpop.f32.mrb[52].mxu1 }
0x33ea   : > { %v5196_v52 = vadd.f32 %v11667_v21, %v5195_v33  ;;  %v8923_v22 = vpop.f32.mrb[53].mxu1 }
0x33ec   : > { %v5199_v30 = vmax.f32 %v5196_v52, 0.0 }
0x33ee   : > { %8941 = vmatmul.mubr.msk.f32.vlgmr.msra.gmra.mrb[34].mxu0 %vm2179_vm5, %v5199_v30 }
0x33ef   : > { %8966 = vmatprep.mubr.msk.f32.mxu0 %vm10464_vm0, %v10465_v1 }
0x34c1   : > { %v5275_v24 = vpop.f32.mrb[34].mxu0 }
0x34c2   : > { %v5276_v25 = vadd.f32 %v11673_v6, %v5275_v24  ;;  %v8942_v26 = vpop.f32.mrb[35].mxu0 }
0x34c4   : > { %v11677_v13 = vadd.f32 %v5276_v25, %v11612_v11 }
0x34c6   : > { %v5280_v32 = vsel %vm1552_vm2, %v11677_v13, 0.0 }
0x34c7   : > { %5281 = vadd.xlane.f32.xlu0 %v5280_v32 }
0x3554   : > { %v5282_v58 = vpop.xlane.xlu0 %5281 }
0x3555   : > { %v5283_v63 = vmul.f32 0.03125, %v5282_v58 }
0x3557   : > { %v5284_v27 = vsub.f32 %v11677_v13, %v5283_v63 }
0x3559   : > { %v5285_v62 = vmul.f32 %v5284_v27, %v5284_v27 }
0x355b   : > { %v5286_v8 = vsel %vm1552_vm2, %v5285_v62, 0.0 }
0x355c   : > { %5287 = vadd.xlane.f32.xlu1 %v5286_v8 }
0x35e9   : > { %v5288_v38 = vpop.xlane.xlu1 %5287 }
0x35ea   : > { %v5289_v35 = vmul.f32 0.03125, %v5288_v38 }
0x35ec   : > { %v5290_v23 = vadd.f32 1e-05, %v5289_v35 }
0x35ee   : > { %9783 = vrsqrt.f32 %v5290_v23 }
0x35f8   : > { %v9784_v39 = vpop.eup %9783 }
0x35f9   : > { %v5292_v29 = vmul.f32 %v9784_v39, %v5284_v27 }
0x35fb   : > { %v5293_v11 = vmul.f32 %v11554_v37, %v5292_v29 }
0x35fd   : > { %v5294_v18 = vadd.f32 %v11556_v40, %v5293_v11 }
0x35ff   : > { %8952 = vmatmul.mubr.msk.f32.vlgmr.msra.gmra.mrb[54].mxu1 %vm1552_vm2, %v5294_v18 }
0x3600   : > { %8956 = vmatprep.mubr.msk.f32.mxu1 %vm10464_vm0, %v10465_v1 }
0x36d2   : > { %v5364_v42 = vpop.f32.mrb[54].mxu1 }
0x36d3   : > { %5537 = vrot.lane.b32.xlu1 %v5364_v42, %s12215_s17  ;;  %5370 = vrot.lane.b32.xlu0 %v5364_v42, %s12216_s18  ;;  %v8953_v43 = vpop.f32.mrb[55].mxu1  ;;  %v5368_v17 = vmul.f32 0.25, %v5364_v42 }
0x36d7   : > { %5535 = vrot.lane.b32.xlu1 %v5368_v17, %s12217_s19 }
0x3745   : > { %v5538_v5 = vpop.permute.xlu1 %5537  ;;  %v5371_v46 = vpop.permute.xlu0 %5370 }
0x3746   : > { %8955 = vmatpush3.xpose.msk.msra.mxu1 %vm1370_vm1, %v5371_v46  ;;  %8965 = vmatpush3.xpose.msk.msra.mxu0 %vm1370_vm1, %v5538_v5 }
0x3747   : > { %8959 = vmatprep.subr.mxu1 %v10465_v1  ;;  %9363 = vmatprep.subr.bf16.mxu0 %v10463_v0 }
0x3749   : > { %v5536_v37 = vpop.permute.xlu1 %5535  ;;  %8957 = vmatmul.mubr.msk.f32.vlgmr.msra.gmra.mrb[56].mxu1 %vm1370_vm1, %v5368_v17 }
0x374a   : > { %8967 = vmatmul.mubr.msk.f32.vlgmr.msra.gmra.mrb[36].mxu0 %vm1370_vm1, %v5536_v37  ;;  %8961 = vmatprep.mubr.msk.f32.mxu1 %vm10464_vm0, %v10465_v1 }
0x374b   : > { %9365 = vmatpush3.bf16.msra.mxu0 %v11597_v28  ;;  %8982 = vmatprep.mubr.msk.f32.mxu0 %vm10464_vm0, %v10465_v1 }
0x374c   : > { %9366 = vmatprep.subr.bf16.mxu0 %v10463_v0 }
0x374f   : > { %9368 = vmatpush3.bf16.msra.mxu0 %v11601_v31 }
0x3750   : > { %9375 = vmatprep.subr.bf16.mxu0 %v10463_v0 }
0x381c   : > { %v5443_v40 = vpop.f32.mrb[56].mxu1 }
0x381d   : > { %v5447_v44 = vsel %vm11096_vm3, -1e+09, %v5443_v40  ;;  %v8958_v16 = vpop.f32.mrb[57].mxu1  ;;  %v5609_v51 = vpop.f32.mrb[36].mxu0 }
0x381e   : > { %v5613_v53 = vsel %vm11096_vm3, -1e+09, %v5609_v51  ;;  %v8968_v54 = vpop.f32.mrb[37].mxu0  ;;  %v5448_v28 = vsel %vm1734_vm4, %v5447_v44, -inf }
0x381f   : > { %5449 = vmax.xlane.f32.xlu0 %v5448_v28  ;;  %v5614_v55 = vsel %vm1734_vm4, %v5613_v53, -inf }
0x3820   : > { %5615 = vmax.xlane.f32.xlu1 %v5614_v55  ;;  %v8200_v55 = vld [vmem:[%s12223_s3 + $0x20] sm:$0xff] }
0x3831   : > { %5459 = vrot.lane.b32.xlu1 %v5364_v42, %s12218_s21 }
0x38ac   : > { %v5450_v31 = vpop.xlane.xlu0 %5449 }
0x38ad   : > { %v5451_v36 = vsub.f32 %v5447_v44, %v5450_v31  ;;  %v5616_v61 = vpop.xlane.xlu1 %5615  ;;  %v8201_v31 = vld [vmem:[%s12223_s3 + $0x28] sm:$0xff] }
0x38ae   : > { %v5617_v45 = vsub.f32 %v5613_v53, %v5616_v61  ;;  %v8203_v61 = vld [vmem:[%s12223_s3 + $0x38] sm:$0xff] }
0x38af   : > { %v5452_v2 = vmul.f32 1.442695, %v5451_v36  ;;  %v11761_v36 = vpack.c.bf16 %v8201_v31, %v8200_v55 }
0x38b0   : > { %v5618_v34 = vmul.f32 1.442695, %v5617_v45 }
0x38b1   : > { %9785 = vpow2.f32 %v5452_v2  ;;  %v5460_v7 = vpop.permute.xlu1 %5459 }
0x38b2   : > { %8960 = vmatpush3.msra.mxu1 %v5460_v7  ;;  %9787 = vpow2.f32 %v5618_v34 }
0x38b3   : > { %8969 = vmatprep.subr.mxu1 %v10465_v1 }
0x38bb   : > { %v9786_v14 = vpop.eup %9785 }
0x38bc   : > { %v5454_v15 = vsel %vm1734_vm4, %v9786_v14, 0.0  ;;  %v9788_v41 = vpop.eup %9787 }
0x38bd   : > { %5455 = vadd.xlane.f32.xlu0 %v5454_v15  ;;  %v5620_v50 = vsel %vm1734_vm4, %v9788_v41, 0.0  ;;  %v11771_v15 = vld [vmem:[#allocation14 + $0x1] ss:$0 sm:$0xff] }
0x38c1   : > { %5621 = vadd.xlane.f32.xlu0 %v5620_v50  ;;  %v11773_v50 = vld [vmem:[#allocation16 + $0x1] ss:$0 sm:$0xff] }
0x38d7   : > { %5625 = vrot.lane.b32.xlu0 %v5364_v42, %s12219_s24 }
0x394a   : > { %v5456_v33 = vpop.xlane.xlu0 %5455 }
0x394b   : > { %9789 = vrcp.f32 %v5456_v33 }
0x394e   : > { %v5622_v52 = vpop.xlane.xlu0 %5621 }
0x394f   : > { %9791 = vrcp.f32 %v5622_v52 }
0x3952   : > { %v5626_v24 = vpop.permute.xlu0 %5625 }
0x3955   : > { %v9790_v22 = vpop.eup %9789 }
0x3956   : > { %v5458_v30 = vmul.f32 %v9790_v22, %v9786_v14 }
0x3958   : > { %8962 = vmatmul.mubr.msk.f32.vlgmr.msra.gmra.mrb[58].mxu1 %vm1734_vm4, %v5458_v30 }
0x3959   : > { %v9792_v25 = vpop.eup %9791  ;;  %8970 = vmatpush3.msra.mxu1 %v5626_v24  ;;  %8971 = vmatprep.mubr.msk.f32.mxu1 %vm10464_vm0, %v10465_v1 }
0x395a   : > { %v5624_v26 = vmul.f32 %v9792_v25, %v9788_v41  ;;  %9369 = vmatprep.subr.bf16.mxu1 %v10463_v0 }
0x395c   : > { %8972 = vmatmul.mubr.msk.f32.vlgmr.msra.gmra.mrb[60].mxu1 %vm1734_vm4, %v5624_v26 }
0x395d   : > { %9371 = vmatpush3.bf16.msra.mxu1 %v11620_v20  ;;  %8993 = vmatprep.mubr.msk.f32.mxu1 %vm10464_vm0, %v10465_v1 }
0x395e   : > { %9372 = vmatprep.subr.bf16.mxu1 %v10463_v0 }
0x3961   : > { %9374 = vmatpush3.bf16.msra.mxu1 %v11626_v47 }
0x3962   : > { %9387 = vmatprep.subr.bf16.mxu1 %v10463_v0 }
0x3a2b   : > { %v5531_v32 = vpop.f32.mrb[58].mxu1 }
0x3a2c   : > { %v8963_v58 = vpop.f32.mrb[59].mxu1 }
0x3a2f   : > { %v5697_v63 = vpop.f32.mrb[60].mxu1 }
0x3a30   : > { %5702 = vrot.lane.b32.xlu1 %v5697_v63, %s12220_s25  ;;  %v8973_v27 = vpop.f32.mrb[61].mxu1 }
0x3aa2   : > { %v5703_v62 = vpop.permute.xlu1 %5702 }
0x3aa3   : > { %v5705_v8 = vsel %vm1370_vm1, %v5531_v32, %v5703_v62 }
0x3aa4   : > { %8983 = vmatmul.mubr.msk.f32.vlgmr.msra.gmra.mrb[38].mxu0 %vm1552_vm2, %v5705_v8 }
0x3aa5   : > { %9377 = vmatpush3.bf16.msra.mxu0 %v11633_v56  ;;  %9012 = vmatprep.mubr.msk.f32.mxu0 %vm10464_vm0, %v10465_v1 }
0x3aa6   : > { %9378 = vmatprep.subr.bf16.mxu0 %v10463_v0 }
0x3aa9   : > { %9380 = vmatpush3.bf16.msra.mxu0 %v11637_v57 }
0x3aaa   : > { %9381 = vmatprep.subr.bf16.mxu0 %v10463_v0 }
0x3aad   : > { %9383 = vmatpush3.bf16.msra.mxu0 %v11643_v59 }
0x3aae   : > { %9384 = vmatprep.subr.bf16.mxu0 %v10463_v0 }
0x3ab1   : > { %9386 = vmatpush3.bf16.msra.mxu0 %v11663_v19 }
0x3ab2   : > { %9036 = vmatprep.subr.mxu0 %v10465_v1 }
0x3b77   : > { %v5775_v20 = vpop.f32.mrb[38].mxu0 }
0x3b78   : > { %v5776_v47 = vadd.f32 %v5775_v20, %v11677_v13  ;;  %v8984_v56 = vpop.f32.mrb[39].mxu0 }
0x3b7a   : > { %v5779_v38 = vsel %vm1552_vm2, %v5776_v47, 0.0 }
0x3b7b   : > { %5780 = vadd.xlane.f32.xlu1 %v5779_v38 }
0x3c08   : > { %v5781_v35 = vpop.xlane.xlu1 %5780 }
0x3c09   : > { %v5782_v23 = vmul.f32 0.03125, %v5781_v35 }
0x3c0b   : > { %v5783_v57 = vsub.f32 %v5776_v47, %v5782_v23 }
0x3c0d   : > { %v5784_v39 = vmul.f32 %v5783_v57, %v5783_v57 }
0x3c0f   : > { %v5785_v29 = vsel %vm1552_vm2, %v5784_v39, 0.0 }
0x3c10   : > { %5786 = vadd.xlane.f32.xlu0 %v5785_v29 }
0x3c9d   : > { %v5787_v59 = vpop.xlane.xlu0 %5786 }
0x3c9e   : > { %v5788_v11 = vmul.f32 0.03125, %v5787_v59 }
0x3ca0   : > { %v5789_v18 = vadd.f32 1e-06, %v5788_v11 }
0x3ca2   : > { %9793 = vrsqrt.f32 %v5789_v18 }
0x3cac   : > { %v9794_v19 = vpop.eup %9793 }
0x3cad   : > { %v5791_v42 = vmul.f32 %v9794_v19, %v5783_v57 }
0x3caf   : > { %v5792_v43 = vmul.f32 %v11648_v3, %v5791_v42 }
0x3cb1   : > { %v5793_v13 = vadd.f32 %v11650_v10, %v5792_v43 }
0x3cb3   : > { %8994 = vmatmul.mubr.msk.f32.vlgmr.msra.gmra.mrb[62].mxu1 %vm1552_vm2, %v5793_v13 }
0x3cb4   : > { %9023 = vmatprep.mubr.msk.f32.mxu1 %vm10464_vm0, %v10465_v1  ;;  %9389 = vmatpush3.bf16.msra.mxu1 %v11761_v36 }
0x3cb5   : > { %9390 = vmatprep.subr.bf16.mxu1 %v10463_v0 }
0x3d86   : > { %v5863_v17 = vpop.f32.mrb[62].mxu1 }
0x3d87   : > { %v5864_v5 = vadd.f32 %v11667_v21, %v5863_v17  ;;  %v8995_v46 = vpop.f32.mrb[63].mxu1 }
0x3d89   : > { %v5867_v37 = vmax.f32 %v5864_v5, 0.0 }
0x3d8b   : > { %9013 = vmatmul.mubr.msk.f32.vlgmr.msra.gmra.mrb[40].mxu0 %vm2179_vm5, %v5867_v37 }
0x3d8c   : > { %9038 = vmatprep.mubr.msk.f32.mxu0 %vm10464_vm0, %v10465_v1 }
0x3e5e   : > { %v5937_v3 = vpop.f32.mrb[40].mxu0 }
0x3e5f   : > { %v5938_v10 = vadd.f32 %v11673_v6, %v5937_v3  ;;  %v9014_v40 = vpop.f32.mrb[41].mxu0  ;;  %v8202_v6 = vld [vmem:[%s12223_s3 + $0x30] sm:$0xff]  ;;  %s10472_s3 = smov [#allocation29]  }
0x3e60   : > { %v11767_v45 = vpack.c.bf16 %v8203_v61, %v8202_v6  ;;  %v8205_v40 = vld [vmem:[%s12224_s6 + $0x28] sm:$0xff] }
0x3e61   : > { %v11753_v44 = vadd.f32 %v5938_v10, %v5776_v47  ;;  %v8204_v10 = vld [vmem:[%s12224_s6 + $0x20] sm:$0xff] }
0x3e62   : > { %9392 = vmatpush3.bf16.msra.mxu1 %v11767_v45 }
0x3e63   : > { %v5978_v21 = vsel %vm1552_vm2, %v11753_v44, 0.0  ;;  %9026 = vmatprep.subr.mxu1 %v10465_v1 }
0x3e64   : > { %5979 = vadd.xlane.f32.xlu0 %v5978_v21  ;;  %v8206_v21 = vld [vmem:[%s12224_s6 + $0x30] sm:$0xff] }
0x3ef1   : > { %v5980_v16 = vpop.xlane.xlu0 %5979 }
0x3ef2   : > { %v5981_v51 = vmul.f32 0.03125, %v5980_v16  ;;  %v11814_v16 = vpack.c.bf16 %v8205_v40, %v8204_v10 }
0x3ef4   : > { %v5982_v53 = vsub.f32 %v11753_v44, %v5981_v51  ;;  %v8207_v51 = vld [vmem:[%s12224_s6 + $0x38] sm:$0xff] }
0x3ef6   : > { %v5983_v54 = vmul.f32 %v5982_v53, %v5982_v53 }
0x3ef8   : > { %v5984_v28 = vsel %vm1552_vm2, %v5983_v54, 0.0 }
0x3ef9   : > { %5985 = vadd.xlane.f32.xlu1 %v5984_v28 }
0x3f86   : > { %v5986_v2 = vpop.xlane.xlu1 %5985 }
0x3f87   : > { %v5987_v34 = vmul.f32 0.03125, %v5986_v2 }
0x3f89   : > { %v5988_v7 = vadd.f32 1e-05, %v5987_v34 }
0x3f8b   : > { %9795 = vrsqrt.f32 %v5988_v7 }
0x3f95   : > { %v9796_v14 = vpop.eup %9795 }
0x3f96   : > { %v5990_v41 = vmul.f32 %v9796_v14, %v5982_v53  ;;  %v11818_v53 = vpack.c.bf16 %v8207_v51, %v8206_v21 }
0x3f98   : > { %v5997_v33 = vmul.f32 %v11771_v15, %v5990_v41 }
0x3f9a   : > { %v6004_v52 = vadd.f32 %v11773_v50, %v5997_v33 }
0x3f9c   : > { %9024 = vmatmul.mubr.msk.f32.vlgmr.msra.gmra.mrb[64].mxu1 %vm1552_vm2, %v6004_v52 }
0x3f9d   : > { %9028 = vmatprep.mubr.msk.f32.mxu1 %vm10464_vm0, %v10465_v1 }
0x406f   : > { %v6074_v22 = vpop.f32.mrb[64].mxu1 }
0x4070   : > { %6247 = vrot.lane.b32.xlu1 %v6074_v22, %s12215_s17  ;;  %6080 = vrot.lane.b32.xlu0 %v6074_v22, %s12216_s18  ;;  %v9025_v30 = vpop.f32.mrb[65].mxu1  ;;  %v6078_v24 = vmul.f32 0.25, %v6074_v22 }
0x4074   : > { %6245 = vrot.lane.b32.xlu1 %v6078_v24, %s12217_s19 }
0x40e2   : > { %v6248_v25 = vpop.permute.xlu1 %6247  ;;  %v6081_v26 = vpop.permute.xlu0 %6080 }
0x40e3   : > { %9027 = vmatpush3.xpose.msk.msra.mxu1 %vm1370_vm1, %v6081_v26  ;;  %9037 = vmatpush3.xpose.msk.msra.mxu0 %vm1370_vm1, %v6248_v25  ;;  %v8210_v26 = vld [vmem:[%s12225_s7 + $0x30] sm:$0xff] }
0x40e4   : > { %9031 = vmatprep.subr.mxu1 %v10465_v1  ;;  %9393 = vmatprep.subr.bf16.mxu0 %v10463_v0 }
0x40e6   : > { %v6246_v32 = vpop.permute.xlu1 %6245  ;;  %9029 = vmatmul.mubr.msk.f32.vlgmr.msra.gmra.mrb[66].mxu1 %vm1370_vm1, %v6078_v24  ;;  %v8208_v24 = vld [vmem:[%s12225_s7 + $0x20] sm:$0xff] }
0x40e7   : > { %9039 = vmatmul.mubr.msk.f32.vlgmr.msra.gmra.mrb[42].mxu0 %vm1370_vm1, %v6246_v32  ;;  %9033 = vmatprep.mubr.msk.f32.mxu1 %vm10464_vm0, %v10465_v1  ;;  %v8211_v32 = vld [vmem:[%s12225_s7 + $0x38] sm:$0xff] }
0x40e8   : > { %9054 = vmatprep.mubr.msk.f32.mxu0 %vm10464_vm0, %v10465_v1  ;;  %9395 = vmatpush3.bf16.msra.mxu0 %v11814_v16 }
0x40e9   : > { %9396 = vmatprep.subr.bf16.mxu0 %v10463_v0 }
0x40ec   : > { %9398 = vmatpush3.bf16.msra.mxu0 %v11818_v53 }
0x40ed   : > { %9405 = vmatprep.subr.bf16.mxu0 %v10463_v0 }
0x41b9   : > { %v6153_v58 = vpop.f32.mrb[66].mxu1 }
0x41ba   : > { %v6157_v63 = vsel %vm11096_vm3, -1e+09, %v6153_v58  ;;  %v9030_v27 = vpop.f32.mrb[67].mxu1  ;;  %v6319_v62 = vpop.f32.mrb[42].mxu0  ;;  %v11843_v58 = vpack.c.bf16 %v8211_v32, %v8210_v26 }
0x41bb   : > { %v6323_v8 = vsel %vm11096_vm3, -1e+09, %v6319_v62  ;;  %v9040_v20 = vpop.f32.mrb[43].mxu0  ;;  %v6158_v47 = vsel %vm1734_vm4, %v6157_v63, -inf  ;;  %v8213_v27 = vld [vmem:[%s12226_s9 + $0x48] sm:$0xff]  ;;  %v8214_v62 = vld [vmem:[%s12226_s9 + $0x50] sm:$0xff] }
0x41bc   : > { %6159 = vmax.xlane.f32.xlu0 %v6158_v47  ;;  %v6324_v56 = vsel %vm1734_vm4, %v6323_v8, -inf  ;;  %v8215_v20 = vld [vmem:[%s12226_s9 + $0x58] sm:$0xff] }
0x41bd   : > { %6325 = vmax.xlane.f32.xlu1 %v6324_v56  ;;  %v11854_v47 = vpack.c.bf16 %v8215_v20, %v8214_v62  ;;  %v8216_v56 = vld [vmem:[%s12226_s9 + $0x60] sm:$0xff] }
0x41ce   : > { %6169 = vrot.lane.b32.xlu1 %v6074_v22, %s12218_s21 }
0x4249   : > { %v6160_v38 = vpop.xlane.xlu0 %6159 }
0x424a   : > { %v6161_v35 = vsub.f32 %v6157_v63, %v6160_v38  ;;  %v6326_v23 = vpop.xlane.xlu1 %6325  ;;  %v8212_v63 = vld [vmem:[%s12226_s9 + $0x40] sm:$0xff]  ;;  %v8217_v38 = vld [vmem:[%s12226_s9 + $0x68] sm:$0xff] }
0x424b   : > { %v6327_v57 = vsub.f32 %v6323_v8, %v6326_v23  ;;  %v11850_v8 = vpack.c.bf16 %v8213_v27, %v8212_v63 }
0x424c   : > { %v6162_v39 = vmul.f32 1.442695, %v6161_v35  ;;  %v11860_v35 = vpack.c.bf16 %v8217_v38, %v8216_v56 }
0x424d   : > { %v6328_v29 = vmul.f32 1.442695, %v6327_v57 }
0x424e   : > { %9797 = vpow2.f32 %v6162_v39  ;;  %v6170_v59 = vpop.permute.xlu1 %6169 }
0x424f   : > { %9032 = vmatpush3.msra.mxu1 %v6170_v59  ;;  %9799 = vpow2.f32 %v6328_v29  ;;  %v11865_v59 = vld [vmem:[#allocation17 + $0x1] ss:$0 sm:$0xff] }
0x4250   : > { %9041 = vmatprep.subr.mxu1 %v10465_v1 }
0x4258   : > { %v9798_v11 = vpop.eup %9797 }
0x4259   : > { %v6164_v18 = vsel %vm1734_vm4, %v9798_v11, 0.0  ;;  %v9800_v19 = vpop.eup %9799 }
0x425a   : > { %6165 = vadd.xlane.f32.xlu0 %v6164_v18  ;;  %v6330_v42 = vsel %vm1734_vm4, %v9800_v19, 0.0  ;;  %v11867_v18 = vld [vmem:[#allocation19 + $0x1] ss:$0 sm:$0xff] }
0x425e   : > { %6331 = vadd.xlane.f32.xlu0 %v6330_v42 }
0x4274   : > { %6335 = vrot.lane.b32.xlu0 %v6074_v22, %s12219_s24 }
0x42e7   : > { %v6166_v43 = vpop.xlane.xlu0 %6165 }
0x42e8   : > { %9801 = vrcp.f32 %v6166_v43  ;;  %v8218_v43 = vld [vmem:[%s12226_s9 + $0x70] sm:$0xff] }
0x42eb   : > { %v6332_v13 = vpop.xlane.xlu0 %6331 }
0x42ec   : > { %9803 = vrcp.f32 %v6332_v13  ;;  %v8219_v13 = vld [vmem:[%s12226_s9 + $0x78] sm:$0xff] }
0x42ef   : > { %v6336_v46 = vpop.permute.xlu0 %6335 }
0x42f2   : > { %v9802_v17 = vpop.eup %9801 }
0x42f3   : > { %v6168_v5 = vmul.f32 %v9802_v17, %v9798_v11  ;;  %v11880_v17 = vpack.c.bf16 %v8219_v13, %v8218_v43 }
0x42f5   : > { %9034 = vmatmul.mubr.msk.f32.vlgmr.msra.gmra.mrb[68].mxu1 %vm1734_vm4, %v6168_v5  ;;  %v11884_v5 = vld [vmem:[#allocation20 + $0x1] ss:$0 sm:$0xff] }
0x42f6   : > { %v9804_v37 = vpop.eup %9803  ;;  %9042 = vmatpush3.msra.mxu1 %v6336_v46  ;;  %9043 = vmatprep.mubr.msk.f32.mxu1 %vm10464_vm0, %v10465_v1 }
0x42f7   : > { %v6334_v3 = vmul.f32 %v9804_v37, %v9800_v19  ;;  %9399 = vmatprep.subr.bf16.mxu1 %v10463_v0 }
0x42f9   : > { %9044 = vmatmul.mubr.msk.f32.vlgmr.msra.gmra.mrb[70].mxu1 %vm1734_vm4, %v6334_v3 }
0x42fa   : > { %9065 = vmatprep.mubr.msk.f32.mxu1 %vm10464_vm0, %v10465_v1 }
0x43c8   : > { %v6241_v54 = vpop.f32.mrb[68].mxu1 }
0x43c9   : > { %v9035_v28 = vpop.f32.mrb[69].mxu1 }
0x43cc   : > { %v6407_v55 = vpop.f32.mrb[70].mxu1 }
0x43cd   : > { %6412 = vrot.lane.b32.xlu1 %v6407_v55, %s12220_s25  ;;  %v9045_v31 = vpop.f32.mrb[71].mxu1 }
0x443f   : > { %v6413_v6 = vpop.permute.xlu1 %6412 }
0x4440   : > { %v6415_v61 = vsel %vm1370_vm1, %v6241_v54, %v6413_v6 }
0x4441   : > { %9055 = vmatmul.mubr.msk.f32.vlgmr.msra.gmra.mrb[44].mxu0 %vm1552_vm2, %v6415_v61 }
0x4442   : > { %9084 = vmatprep.mubr.msk.f32.mxu0 %vm10464_vm0, %v10465_v1  ;;  %9407 = vmatpush3.bf16.msra.mxu0 %v11850_v8 }
0x4443   : > { %9408 = vmatprep.subr.bf16.mxu0 %v10463_v0 }
0x4446   : > { %9410 = vmatpush3.bf16.msra.mxu0 %v11854_v47 }
0x4447   : > { %9411 = vmatprep.subr.bf16.mxu0 %v10463_v0 }
0x444a   : > { %9413 = vmatpush3.bf16.msra.mxu0 %v11860_v35 }
0x444b   : > { %9414 = vmatprep.subr.bf16.mxu0 %v10463_v0 }
0x444e   : > { %9416 = vmatpush3.bf16.msra.mxu0 %v11880_v17 }
0x444f   : > { %9108 = vmatprep.subr.mxu0 %v10465_v1 }
0x4514   : > { %v6485_v2 = vpop.f32.mrb[44].mxu0 }
0x4515   : > { %v11829_v34 = vadd.f32 %v6485_v2, %v11753_v44  ;;  %v9056_v7 = vpop.f32.mrb[45].mxu0  ;;  %v8209_v44 = vld [vmem:[%s12225_s7 + $0x28] sm:$0xff] }
0x4516   : > { %v11837_v25 = vpack.c.bf16 %v8209_v44, %v8208_v24 }
0x4517   : > { %v6489_v14 = vsel %vm1552_vm2, %v11829_v34, 0.0 }
0x4518   : > { %6490 = vadd.xlane.f32.xlu1 %v6489_v14  ;;  %9401 = vmatpush3.bf16.msra.mxu1 %v11837_v25 }
0x4519   : > { %9402 = vmatprep.subr.bf16.mxu1 %v10463_v0 }
0x451c   : > { %9404 = vmatpush3.bf16.msra.mxu1 %v11843_v58 }
0x451d   : > { %9417 = vmatprep.subr.bf16.mxu1 %v10463_v0 }
0x45a5   : > { %v6491_v41 = vpop.xlane.xlu1 %6490 }
0x45a6   : > { %v6492_v33 = vmul.f32 0.03125, %v6491_v41 }
0x45a8   : > { %v6493_v52 = vsub.f32 %v11829_v34, %v6492_v33 }
0x45aa   : > { %v6494_v22 = vmul.f32 %v6493_v52, %v6493_v52 }
0x45ac   : > { %v6495_v30 = vsel %vm1552_vm2, %v6494_v22, 0.0 }
0x45ad   : > { %6496 = vadd.xlane.f32.xlu0 %v6495_v30 }
0x463a   : > { %v6497_v23 = vpop.xlane.xlu0 %6496 }
0x463b   : > { %v6498_v57 = vmul.f32 0.03125, %v6497_v23 }
0x463d   : > { %v6499_v39 = vadd.f32 1e-06, %v6498_v57 }
0x463f   : > { %9805 = vrsqrt.f32 %v6499_v39 }
0x4649   : > { %v9806_v29 = vpop.eup %9805 }
0x464a   : > { %v6501_v11 = vmul.f32 %v9806_v29, %v6493_v52 }
0x464c   : > { %v6508_v19 = vmul.f32 %v11865_v59, %v6501_v11 }
0x464e   : > { %v6515_v42 = vadd.f32 %v11867_v18, %v6508_v19 }
0x4650   : > { %9066 = vmatmul.mubr.msk.f32.vlgmr.msra.gmra.mrb[72].mxu1 %vm1552_vm2, %v6515_v42 }
0x4651   : > { %9419 = vmatpush3.bf16.msra.mxu1 %v11761_v36  ;;  %9095 = vmatprep.mubr.msk.f32.mxu1 %vm10464_vm0, %v10465_v1 }
0x4652   : > { %9420 = vmatprep.subr.bf16.mxu1 %v10463_v0 }
0x4655   : > { %9422 = vmatpush3.bf16.msra.mxu1 %v11767_v45  ;;  %v11890_v45 = vld [vmem:[#allocation22 + $0x1] ss:$0 sm:$0xff] }
0x4656   : > { %9098 = vmatprep.subr.mxu1 %v10465_v1 }
0x4723   : > { %v6591_v36 = vpop.f32.mrb[72].mxu1 }
0x4724   : > { %v6592_v46 = vadd.f32 %v11884_v5, %v6591_v36  ;;  %v9067_v37 = vpop.f32.mrb[73].mxu1 }
0x4726   : > { %v6595_v3 = vmax.f32 %v6592_v46, 0.0 }
0x4728   : > { %9085 = vmatmul.mubr.msk.f32.vlgmr.msra.gmra.mrb[46].mxu0 %vm2179_vm5, %v6595_v3 }
0x4729   : > { %9110 = vmatprep.mubr.msk.f32.mxu0 %vm10464_vm0, %v10465_v1 }
0x47fb   : > { %v6671_v10 = vpop.f32.mrb[46].mxu0 }
0x47fc   : > { %v6672_v40 = vadd.f32 %v11890_v45, %v6671_v10  ;;  %v9086_v21 = vpop.f32.mrb[47].mxu0 }
0x47fe   : > { %v11894_v51 = vadd.f32 %v6672_v40, %v11829_v34 }
0x4800   : > { %v6676_v54 = vsel %vm1552_vm2, %v11894_v51, 0.0 }
0x4801   : > { %6677 = vadd.xlane.f32.xlu0 %v6676_v54 }
0x488e   : > { %v6678_v28 = vpop.xlane.xlu0 %6677 }
0x488f   : > { %v6679_v55 = vmul.f32 0.03125, %v6678_v28 }
0x4891   : > { %v6680_v31 = vsub.f32 %v11894_v51, %v6679_v55 }
0x4893   : > { %v6681_v6 = vmul.f32 %v6680_v31, %v6680_v31 }
0x4895   : > { %v6682_v61 = vsel %vm1552_vm2, %v6681_v6, 0.0 }
0x4896   : > { %6683 = vadd.xlane.f32.xlu1 %v6682_v61 }
0x4923   : > { %v6684_v2 = vpop.xlane.xlu1 %6683 }
0x4924   : > { %v6685_v7 = vmul.f32 0.03125, %v6684_v2 }
0x4926   : > { %v6686_v14 = vadd.f32 1e-05, %v6685_v7  ;;  %v11962_v7 = vld [vmem:[%s10985_s23] sm:$0xff]  ;;  %s7741_s23 = scalar_lea.sflag [#allocation4], %s10979_s14 }
0x4928   : > { %9807 = vrsqrt.f32 %v6686_v14 }
0x4932   : > { %v9808_v41 = vpop.eup %9807 }
0x4933   : > { %v6688_v33 = vmul.f32 %v9808_v41, %v6680_v31 }
0x4935   : > { %v6689_v34 = vmul.f32 %v11771_v15, %v6688_v33 }
0x4937   : > { %v6690_v52 = vadd.f32 %v11773_v50, %v6689_v34 }
0x4939   : > { %9096 = vmatmul.mubr.msk.f32.vlgmr.msra.gmra.mrb[74].mxu1 %vm1552_vm2, %v6690_v52  ;;  %v11968_v52 = vld [vmem:[%s11038_s15] sm:$0xff] }
0x493a   : > { %9100 = vmatprep.mubr.msk.f32.mxu1 %vm10464_vm0, %v10465_v1 }
0x4a0c   : > { %v6760_v22 = vpop.f32.mrb[74].mxu1 }
0x4a0d   : > { %6933 = vrot.lane.b32.xlu1 %v6760_v22, %s12215_s17  ;;  %6766 = vrot.lane.b32.xlu0 %v6760_v22, %s12216_s18  ;;  %v9097_v30 = vpop.f32.mrb[75].mxu1  ;;  %v6764_v24 = vmul.f32 0.25, %v6760_v22  ;;  %s12227_s17 = sld [smem:[#allocation68_spill]] }
0x4a11   : > { %6931 = vrot.lane.b32.xlu1 %v6764_v24, %s12217_s19  ;;  %s8255_s19 = sshll.u32 %s10684_s11, 7 }
0x4a12   : > { %s12019_s18 = scalar_lea.hbm %s10656_s5, %s8255_s19 }
0x4a7f   : > { %v6934_v44 = vpop.permute.xlu1 %6933  ;;  %v6767_v26 = vpop.permute.xlu0 %6766 }
0x4a80   : > { %9099 = vmatpush3.xpose.msk.msra.mxu1 %vm1370_vm1, %v6767_v26  ;;  %9109 = vmatpush3.xpose.msk.msra.mxu0 %vm1370_vm1, %v6934_v44 }
0x4a81   : > { %9103 = vmatprep.subr.mxu1 %v10465_v1  ;;  %9423 = vmatprep.subr.bf16.mxu0 %v10463_v0 }
0x4a83   : > { %v6932_v15 = vpop.permute.xlu1 %6931  ;;  %9101 = vmatmul.mubr.msk.f32.vlgmr.msra.gmra.mrb[76].mxu1 %vm1370_vm1, %v6764_v24 }
0x4a84   : > { %9111 = vmatmul.mubr.msk.f32.vlgmr.msra.gmra.mrb[48].mxu0 %vm1370_vm1, %v6932_v15  ;;  %9105 = vmatprep.mubr.msk.f32.mxu1 %vm10464_vm0, %v10465_v1 }
0x4a85   : > { %9425 = vmatpush3.bf16.msra.mxu0 %v11814_v16  ;;  %9126 = vmatprep.mubr.msk.f32.mxu0 %vm10464_vm0, %v10465_v1 }
0x4a86   : > { %9426 = vmatprep.subr.bf16.mxu0 %v10463_v0 }
0x4a89   : > { %9428 = vmatpush3.bf16.msra.mxu0 %v11818_v53 }
0x4a8a   : > { %9435 = vmatprep.subr.bf16.mxu0 %v10463_v0 }
0x4b56   : > { %v6839_v50 = vpop.f32.mrb[76].mxu1 }
0x4b57   : > { %v6843_v32 = vsel %vm11096_vm3, -1e+09, %v6839_v50  ;;  %v9102_v63 = vpop.f32.mrb[77].mxu1  ;;  %v7005_v27 = vpop.f32.mrb[48].mxu0 }
0x4b58   : > { %v6844_v62 = vsel %vm1734_vm4, %v6843_v32, -inf  ;;  %v7009_v16 = vsel %vm11096_vm3, -1e+09, %v7005_v27  ;;  %v9112_v20 = vpop.f32.mrb[49].mxu0 }
0x4b59   : > { %v7010_v56 = vsel %vm1734_vm4, %v7009_v16, -inf  ;;  %6845 = vmax.xlane.f32.xlu0 %v6844_v62 }
0x4b5a   : > { %7011 = vmax.xlane.f32.xlu1 %v7010_v56 }
0x4b6b   : > { %6855 = vrot.lane.b32.xlu1 %v6760_v22, %s12218_s21  ;;  %s12228_s21 = sshll.u32 %s10979_s14, 3 }
0x4be6   : > { %v6846_v53 = vpop.xlane.xlu0 %6845 }
0x4be7   : > { %v6847_v38 = vsub.f32 %v6843_v32, %v6846_v53  ;;  %v7012_v23 = vpop.xlane.xlu1 %7011 }
0x4be8   : > { %v7013_v57 = vsub.f32 %v7009_v16, %v7012_v23  ;;  %v7341_v23 = vld [vmem:[%s12227_s17 + $0x8] sm:$0xff] }
0x4be9   : > { %v6848_v39 = vmul.f32 1.442695, %v6847_v38  ;;  %v7340_v38 = vld [vmem:[%s12227_s17] sm:$0xff] }
0x4bea   : > { %v7014_v29 = vmul.f32 1.442695, %v7013_v57  ;;  %v9448_v57 = vpack.c.bf16 %v7341_v23, %v7340_v38 }
0x4beb   : > { %9809 = vpow2.f32 %v6848_v39  ;;  %v6856_v11 = vpop.permute.xlu1 %6855 }
0x4bec   : > { %9104 = vmatpush3.msra.mxu1 %v6856_v11  ;;  %9811 = vpow2.f32 %v7014_v29 }
0x4bed   : > { %9113 = vmatprep.subr.mxu1 %v10465_v1 }
0x4bf5   : > { %v9810_v49 = vpop.eup %9809 }
0x4bf6   : > { %v6850_v19 = vsel %vm1734_vm4, %v9810_v49, 0.0  ;;  %v9812_v42 = vpop.eup %9811 }
0x4bf7   : > { %6851 = vadd.xlane.f32.xlu0 %v6850_v19  ;;  %v7016_v43 = vsel %vm1734_vm4, %v9812_v42, 0.0 }
0x4bfb   : > { %7017 = vadd.xlane.f32.xlu0 %v7016_v43 }
0x4c11   : > { %7021 = vrot.lane.b32.xlu0 %v6760_v22, %s12219_s24 }
0x4c84   : > { %v6852_v13 = vpop.xlane.xlu0 %6851 }
0x4c85   : > { %9813 = vrcp.f32 %v6852_v13 }
0x4c88   : > { %v7018_v36 = vpop.xlane.xlu0 %7017 }
0x4c89   : > { %9815 = vrcp.f32 %v7018_v36  ;;  %v7425_v36 = vld [vmem:[#allocation25] sm:$0xff] }
0x4c8c   : > { %v7022_v3 = vpop.permute.xlu0 %7021 }
0x4c8f   : > { %v9814_v46 = vpop.eup %9813 }
0x4c90   : > { %v6854_v37 = vmul.f32 %v9814_v46, %v9810_v49  ;;  %v7426_v46 = vld [vmem:[#allocation25 + $0x8] sm:$0xff] }
0x4c92   : > { %9106 = vmatmul.mubr.msk.f32.vlgmr.msra.gmra.mrb[78].mxu1 %vm1734_vm4, %v6854_v37 }
0x4c93   : > { %v9816_v10 = vpop.eup %9815  ;;  %9114 = vmatpush3.msra.mxu1 %v7022_v3  ;;  %9115 = vmatprep.mubr.msk.f32.mxu1 %vm10464_vm0, %v10465_v1  ;;  %v7507_v3 = vld [vmem:[%s12158_s4] sm:$0xff] }
0x4c94   : > { %v7020_v40 = vmul.f32 %v9816_v10, %v9812_v42  ;;  %9429 = vmatprep.subr.bf16.mxu1 %v10463_v0  ;;  %v7508_v10 = vld [vmem:[%s12158_s4 + $0x8] sm:$0xff] }
0x4c96   : > { %9116 = vmatmul.mubr.msk.f32.vlgmr.msra.gmra.mrb[80].mxu1 %vm1734_vm4, %v7020_v40  ;;  %v11938_v21 = vadd.f32 %v7020_v40, %v6854_v37  ;;  %v9454_v37 = vpack.c.bf16 %v7426_v46, %v7425_v36 }
0x4c97   : > { %9431 = vmatpush3.bf16.msra.mxu1 %v11837_v25  ;;  %9137 = vmatprep.mubr.msk.f32.mxu1 %vm10464_vm0, %v10465_v1 }
0x4c98   : > { %9432 = vmatprep.subr.bf16.mxu1 %v10463_v0 }
0x4c9b   : > { %9434 = vmatpush3.bf16.msra.mxu1 %v11843_v58 }
0x4c9c   : > { %9447 = vmatprep.subr.bf16.mxu1 %v10463_v0 }
0x4d65   : > { %v6927_v54 = vpop.f32.mrb[78].mxu1 }
0x4d66   : > { %v9107_v28 = vpop.f32.mrb[79].mxu1 }
0x4d69   : > { %v7093_v55 = vpop.f32.mrb[80].mxu1 }
0x4d6a   : > { %7099 = vrot.lane.b32.xlu1 %v7093_v55, %s12220_s25  ;;  %v9117_v31 = vpop.f32.mrb[81].mxu1  ;;  %s1345_s25 = scalar_lea.vmem [#allocation29], %s12228_s21 }
0x4d6b   : > { %v7509_v31 = vld [vmem:[%s12158_s4 + $0x10] sm:$0xff]  ;;  %s7757_s24 = sshll.u32 %s1345_s25, 4  ;;  %s10310_s4 = sshll.u32 %s10472_s3, 4  ;;  %s7758_s24 = int_to_ptr.vmem [resolvable:$true] %s7757_s24  ;;  %s10311_s4 = int_to_ptr.vmem [resolvable:$false] %s10310_s4 }
0x4d6c   : > { %s10306_s15 = scalar_lea.vmem %s7758_s24, 128  ;;  %s10312_s21 = scalar_lea.vmem %s10311_s4, 256 }
0x4d6d   : > { %p10307_p8 = scmp.ne.s32.totalorder %s7758_s24, %s10306_s15  ;;  %p10313_p4 = scmp.lt.s32.totalorder %s7758_s24, %s10311_s4 }
0x4d6e   : > { %p10314_p5 = scmp.lt.s32.totalorder %s10312_s21, %s10306_s15 }
0x4d6f   : > { %p10308_p3 = pnand %p10307_p8, %p12229_p1 }
0x4d70   : > { %p10315_p7 = por %p10314_p5, %p10313_p4 }
0x4d71   : > { %p10309_p11 = pneg %p10308_p3 }
0x4d73   : > { %p10316_p10 = pnand %p10315_p7, %p10309_p11 }
0x4ddc   : > { %v7100_v6 = vpop.permute.xlu1 %7099 }
0x4ddd   : > { %v7102_v61 = vsel %vm1370_vm1, %v6927_v54, %v7100_v6  ;;  %v7339_v6 = vmul.f32 0.5, %v11938_v21 }
0x4dde   : > { %9127 = vmatmul.mubr.msk.f32.vlgmr.msra.gmra.mrb[50].mxu0 %vm1552_vm2, %v7102_v61 }
0x4ddf   : > { %9437 = vmatpush3.bf16.msra.mxu0 %v11850_v8  ;;  %9156 = vmatprep.mubr.msk.f32.mxu0 %vm10464_vm0, %v10465_v1 }
0x4de0   : > { %9438 = vmatprep.subr.bf16.mxu0 %v10463_v0 }
0x4de3   : > { %9440 = vmatpush3.bf16.msra.mxu0 %v11854_v47  ;;  %v7674_v47 = vsub.f32 %v11523_v9, %v11962_v7 }
0x4de4   : > { %9441 = vmatprep.subr.bf16.mxu0 %v10463_v0 }
0x4de5   : > { %v7675_v41 = vand.u32 2147483647, %v7674_v47 }
0x4de7   : > { %9443 = vmatpush3.bf16.msra.mxu0 %v11860_v35 }
0x4de8   : > { %9444 = vmatprep.subr.bf16.mxu0 %v10463_v0 }
0x4deb   : > { %9446 = vmatpush3.bf16.msra.mxu0 %v11880_v17 }
0x4dec   : > { %9456 = vmatprep.subr.bf16.mxu0 %v10463_v0 }
0x4eb1   : > { %v7172_v25 = vpop.f32.mrb[50].mxu0 }
0x4eb2   : > { %v7173_v58 = vadd.f32 %v7172_v25, %v11894_v51  ;;  %v9128_v8 = vpop.f32.mrb[51].mxu0  ;;  %v7676_v51 = vmul.f32 %v11968_v52, %v7675_v41  ;;  %v8252_v41 = vld [vmem:[#allocation28] ss:$0 sm:$0xff] }
0x4eb4   : > { %v7176_v2 = vsel %vm1552_vm2, %v7173_v58, 0.0  ;;  %v7677_v22 = vsel %vm1370_vm1, %v7676_v51, 0.0 }
0x4eb5   : > { %7177 = vadd.xlane.f32.xlu1 %v7176_v2 }
0x4f42   : > { %v7178_v35 = vpop.xlane.xlu1 %7177 }
0x4f43   : > { %v7179_v14 = vmul.f32 0.03125, %v7178_v35 }
0x4f45   : > { %v7180_v33 = vsub.f32 %v7173_v58, %v7179_v14 }
0x4f47   : > { %v7181_v34 = vmul.f32 %v7180_v33, %v7180_v33 }
0x4f49   : > { %v7182_v17 = vsel %vm1552_vm2, %v7181_v34, 0.0 }
0x4f4a   : > { %7183 = vadd.xlane.f32.xlu0 %v7182_v17 }
0x4f4e   : > { %7678 = vadd.xlane.f32.xlu0 %v7677_v22 }
0x4fd7   : > { %v7184_v30 = vpop.xlane.xlu0 %7183 }
0x4fd8   : > { %v7185_v24 = vmul.f32 0.03125, %v7184_v30  ;;  %v7713_v30 = vsel %vm1370_vm1, %v11968_v52, 0.0 }
0x4fda   : > { %v7186_v44 = vadd.f32 1e-06, %v7185_v24 }
0x4fdb   : > { %v7679_v26 = vpop.xlane.xlu0 %7678 }
0x4fdc   : > { %9817 = vrsqrt.f32 %v7186_v44  ;;  %v7680_v15 = vrot.slane %v7679_v26, 4 }
0x4fde   : > { %v7681_v50 = vadd.f32 %v7680_v15, %v7679_v26 }
0x4fe0   : > { %v7682_v32 = vrot.slane %v7681_v50, 2 }
0x4fe2   : > { %v7683_v63 = vadd.f32 %v7682_v32, %v7681_v50 }
0x4fe4   : > { %v7684_v27 = vrot.slane %v7683_v63, 1 }
0x4fe6   : > { %v9818_v62 = vpop.eup %9817  ;;  %v7685_v16 = vadd.f32 %v7684_v27, %v7683_v63 }
0x4fe7   : > { %v7188_v20 = vmul.f32 %v9818_v62, %v7180_v33 }
0x4fe8   : > { %9459 = vpush %v7685_v16 }
0x4fe9   : > { %v7189_v56 = vmul.f32 %v11865_v59, %v7188_v20  ;;  %v7342_v59 = vld [vmem:[%s12227_s17 + $0x10] sm:$0xff] }
0x4feb   : > { %v7190_v53 = vadd.f32 %v11867_v18, %v7189_v56  ;;  %v7343_v18 = vld [vmem:[%s12227_s17 + $0x18] sm:$0xff] }
0x4fec   : > { %v9451_v19 = vpack.c.bf16 %v7343_v18, %v7342_v59 }
0x4fed   : > { %9138 = vmatmul.mubr.msk.f32.vlgmr.msra.gmra.mrb[82].mxu1 %vm1552_vm2, %v7190_v53 }
0x4fee   : > { %9167 = vmatprep.mubr.msk.f32.mxu1 %vm10464_vm0, %v10465_v1  ;;  %9449 = vmatpush3.bf16.msra.mxu1 %v9448_v57 }
0x4fef   : > { %9450 = vmatprep.subr.bf16.mxu1 %v10463_v0 }
0x4ff2   : > { %9452 = vmatpush3.bf16.msra.mxu1 %v9451_v19 }
0x4ff3   : > { %9453 = vmatprep.subr.bf16.mxu1 %v10463_v0  ;;  %v9457_v0 = vpack.c.bf16 %v7508_v10, %v7507_v3 }
0x50c0   : > { %v7260_v39 = vpop.f32.mrb[82].mxu1 }
0x50c1   : > { %v7261_v29 = vadd.f32 %v11884_v5, %v7260_v39  ;;  %v9139_v11 = vpop.f32.mrb[83].mxu1 }
0x50c3   : > { %v7264_v49 = vmax.f32 %v7261_v29, 0.0 }
0x50c5   : > { %9157 = vmatmul.mubr.msk.f32.vlgmr.msra.gmra.mrb[52].mxu0 %vm2179_vm5, %v7264_v49 }
0x50c6   : > { %9186 = vmatprep.mubr.msk.f32.mxu0 %vm10464_vm0, %v10465_v1  ;;  %9458 = vmatpush3.bf16.msra.mxu0 %v9457_v0 }
0x50c9   : > { %9187 = vmatmul.mubr.msk.f32.vlgmr.msra.gmra.mrb[54].mxu0 %vm1370_vm1, %v11968_v52 }
0x5198   : > { %v7334_v42 = vpop.f32.mrb[52].mxu0 }
0x5199   : > { %v7335_v43 = vadd.f32 %v11890_v45, %v7334_v42  ;;  %v9158_v13 = vpop.f32.mrb[53].mxu0  ;;  %v8246_v45 = vld [vmem:[#allocation23] ss:$0 sm:$0xff] }
0x519b   : > { %v7338_v5 = vadd.f32 %v7335_v43, %v7173_v58  ;;  %v8248_v58 = vld [vmem:[#allocation26] ss:$0 sm:$0xff] }
0x519c   : > { %v7649_v61 = vpop.f32.mrb[54].mxu0 }
0x519d   : > { %9168 = vmatmul.mubr.msk.f32.vlgmr.msra.gmra.mrb[84].mxu1 %vm1552_vm2, %v7338_v5  ;;  %v9188_v25 = vpop.f32.mrb[55].mxu0 }
0x519e   : > { %9174 = vmatprep.mubr.msk.f32.mxu1 %vm10464_vm0, %v10465_v1  ;;  %9455 = vmatpush3.bf16.msra.mxu1 %v9454_v37 }
0x519f   : > { %9177 = vmatprep.subr.mxu1 %v10465_v1 }
0x5270   : > { %v7420_v40 = vpop.f32.mrb[84].mxu1 }
0x5271   : > { %v7421_v54 = vadd.f32 %v8246_v45, %v7420_v40  ;;  %v9169_v28 = vpop.f32.mrb[85].mxu1 }
0x5273   : > { %v7424_v55 = vmax.f32 %v7421_v54, 0.0 }
0x5275   : > { %9175 = vmatmul.mubr.msk.f32.vlgmr.msra.gmra.mrb[86].mxu1 %vm1370_vm1, %v7424_v55 }
0x5276   : > { %9178 = vmatpush3.msra.mxu1 %v7509_v31  ;;  %9179 = vmatprep.mubr.msk.f32.mxu1 %vm10464_vm0, %v10465_v1 }
0x5279   : > { %9180 = vmatmul.mubr.msk.f32.vlgmr.msra.gmra.mrb[88].mxu1 %vm1734_vm4, %v7339_v6 }
0x5348   : > { %v7503_v8 = vpop.f32.mrb[86].mxu1 }
0x5349   : > { %v7504_v2 = vadd.f32 %v8248_v58, %v7503_v8  ;;  %v9176_v47 = vpop.f32.mrb[87].mxu1 }
0x534b   : > { %v7687_v35 = vsub.f32 %v7504_v2, %v11962_v7 }
0x534c   : > { %v7579_v14 = vpop.f32.mrb[88].mxu1 }
0x534d   : > { %v7688_v33 = vand.u32 2147483647, %v7687_v35  ;;  %v7650_v34 = vadd.f32 %v7649_v61, %v7579_v14  ;;  %v9181_v17 = vpop.f32.mrb[89].mxu1 }
0x534f   : > { %v7660_v51 = vadd.f32 %v8252_v41, %v7650_v34  ;;  %v7689_v1 = vmul.f32 %v11968_v52, %v7688_v33 }
0x5351   : > { %v8253_v22 = vmul.f32 -1.442695, %v7660_v51  ;;  %v7690_v21 = vsel %vm1370_vm1, %v7689_v1, 0.0 }
0x5352   : > { %7691 = vadd.xlane.f32.xlu1 %v7690_v21 }
0x5353   : > { %9819 = vpow2.f32 %v8253_v22 }
0x5356   : > { %7714 = vadd.xlane.f32.xlu1 %v7713_v30 }
0x535d   : > { %v9820_v24 = vpop.eup %9819 }
0x535e   : > { %v7664_v44 = vadd.f32 1.0, %v9820_v24 }
0x5360   : > { %9821 = vrcp.f32 %v7664_v44 }
0x536a   : > { %v9822_v26 = vpop.eup %9821 }
0x536b   : > { %v7667_v15 = vsub.f32 1.0, %v9822_v26  ;;  %v7669_v32 = vmul.f32 %v9822_v26, %v11523_v9 }
0x536d   : > { %v7668_v50 = vmul.f32 %v7667_v15, %v7504_v2 }
0x536f   : > { %v7670_v63 = vadd.f32 %v7669_v32, %v7668_v50 }
0x5371   : > { %v7700_v27 = vsub.f32 %v7670_v63, %v11962_v7  ;;  %v7671_v62 = vmul.f32 %v7670_v63, %v4397_v4 }
0x5373   : > { %v7701_v16 = vand.u32 2147483647, %v7700_v27  ;;  %v7672_v20 = vadd.f32 %v7671_v62, %v11527_v12 }
0x5375   : > { %v7702_v56 = vmul.f32 %v11968_v52, %v7701_v16  ;;  %7673 = vst.msk [vmem:[%s1345_s25] sm:$0xff] %vm1370_vm1, %v7672_v20 }
0x5377   : > { %v7703_v53 = vsel %vm1370_vm1, %v7702_v56, 0.0 }
0x5378   : > { %7704 = vadd.xlane.f32.xlu0 %v7703_v53 }
0x5379   : > { %10319 = shalt.err (!%p10316_p10)
}
0x537a   : > { %s10320_s11 = scalar_lea.hbm %s12019_s18, 128  ;;  %s10324_s14 = scalar_lea.hbm %s10656_s5, 256 }
0x537b   : > { %p10321_p12 = scmp.ne.s32.totalorder %s12019_s18, %s10320_s11  ;;  %p10325_p13 = scmp.lt.u32.totalorder %s12019_s18, %s10656_s5 }
0x537c   : > { %p10326_p0 = scmp.lt.u32.totalorder %s10324_s14, %s10320_s11  ;;  %p10328_p8 = scmp.lt.u32.totalorder %s10320_s11, %s12019_s18 }
0x537d   : > { %p10322_p9 = pnand %p10321_p12, %p12229_p1 }
0x537e   : > { %p10327_p2 = por %p10326_p0, %p10325_p13 }
0x537f   : > { %p10323_p6 = pneg %p10322_p9 }
0x5380   : > { %p10329_p3 = por %p10328_p8, %p10327_p2 }
0x5382   : > { %p10330_p11 = pnand %p10329_p3, %p10323_p6 }
0x5384   : > { %10333 = shalt.err (!%p10330_p11)
}
0x5385   : > { %9533 = dma.vmem_to_hbm [thread:$0]  (%p12229_p1), %s7758_s24, 128, %s12019_s18, %s7741_s23   ;;  %vm7726_vm6 = vcmp.eq.s32.totalorder %v11093_v48, 1  ;;  %vm7723_vm7 = vcmp.eq.s32.totalorder %v11093_v48, 0  ;;  %vm7730_vm8 = vcmp.eq.s32.totalorder %v11093_v48, 2  ;;  %vm7734_vm9 = vcmp.eq.s32.totalorder %v11093_v48, 3 }
0x5386   : > { %s9460_s4 = spop %9459  ;;  %s12230_s3 = sld [smem:[#allocation74_spill]]  ;;  %vm7738_vm10 = vcmask 24576  }
0x5387   : > { %v7724_v37 = vstv %s9460_s4 }
0x5388   : > { %v7725_v10 = vsel %vm7723_vm7, %v7724_v37, 0.0 }
0x538c   : > { %s1357_s24 = scalar_lea.vmem %s12230_s3, %s11031_s8 }
0x53df   : > { %v7692_v60 = vpop.xlane.xlu1 %7691 }
0x53e0   : > { %v7693_v4 = vrot.slane %v7692_v60, 4 }
0x53e2   : > { %v7694_v9 = vadd.f32 %v7693_v4, %v7692_v60 }
0x53e3   : > { %v7715_v23 = vpop.xlane.xlu1 %7714 }
0x53e4   : > { %v7695_v12 = vrot.slane %v7694_v9, 2  ;;  %v7716_v57 = vrot.slane %v7715_v23, 4 }
0x53e6   : > { %v7696_v7 = vadd.f32 %v7695_v12, %v7694_v9  ;;  %v7717_v39 = vadd.f32 %v7716_v57, %v7715_v23 }
0x53e8   : > { %v7697_v52 = vrot.slane %v7696_v7, 1  ;;  %v7718_v29 = vrot.slane %v7717_v39, 2 }
0x53ea   : > { %v7698_v38 = vadd.f32 %v7697_v52, %v7696_v7  ;;  %v7719_v18 = vadd.f32 %v7718_v29, %v7717_v39 }
0x53ec   : > { %9461 = vpush %v7698_v38  ;;  %v7720_v43 = vrot.slane %v7719_v18, 1 }
0x53ee   : > { %v7721_v36 = vadd.f32 %v7720_v43, %v7719_v18 }
0x5405   : > { %v7705_v11 = vpop.xlane.xlu0 %7704 }
0x5406   : > { %v7706_v49 = vrot.slane %v7705_v11, 4 }
0x5408   : > { %v7707_v59 = vadd.f32 %v7706_v49, %v7705_v11 }
0x540a   : > { %v7708_v19 = vrot.slane %v7707_v59, 2 }
0x540c   : > { %v7709_v42 = vadd.f32 %v7708_v19, %v7707_v59 }
0x540e   : > { %v7710_v13 = vrot.slane %v7709_v42, 1 }
0x5410   : > { %v7711_v5 = vadd.f32 %v7710_v13, %v7709_v42 }
0x5412   : > { %9463 = vpush %v7711_v5 }
0x5413   : > { %9465 = vpush %v7721_v36 }
0x541d   : > { %s9462_s30 = spop %9461 }
0x541e   : > { %v7727_v46 = vstv %s9462_s30 }
0x541f   : > { %v7728_v3 = vsel %vm7726_vm6, %v7727_v46, 0.0 }
0x5420   : > { %v7729_v0 = vadd.f32 %v7728_v3, %v7725_v10 }
0x5443   : > { %s9464_s25 = spop %9463 }
0x5444   : > { %v7731_v45 = vstv %s9464_s25  ;;  %s9466_s19 = spop %9465 }
0x5445   : > { %v7732_v40 = vsel %vm7730_vm8, %v7731_v45, 0.0  ;;  %v7735_v54 = vstv %s9466_s19 }
0x5446   : > { %v7733_v28 = vadd.f32 %v7732_v40, %v7729_v0  ;;  %v7736_v55 = vsel %vm7734_vm9, %v7735_v54, 0.0 }
0x5448   : > { %v7737_v31 = vadd.f32 %v7736_v55, %v7733_v28 }
0x544a   : > { %7739 = vst.msk [vmem:[%s1357_s24] sm:$0x1] %vm7738_vm10, %v7737_v31 }
0x544b PF: > { %s7772_s18 = sand.u32 1, %s10392_s28   ;;  %p12231_p1 = scmp.ne.s32.totalorder %s12184_s13, 0 }
0x544c   : > { %p12232_p4 = scmp.ge.s32.totalorder %s10404_s0, 2  ;;  %s7773_s23 = scalar_lea.sflag [#allocation4], %s7772_s18 }
0x544e   : > { %p9589_p5 = pnand %p12232_p4, %p12231_p1 }
0x5450   : > { %10387 = dma.done.wait (!%p9589_p5), %s7773_s23, 128  }
0x5451   : > { %10389 = vsyncadd (!%p9589_p5), %s7773_s23, 4294967168  ;;  %p95_p7 = scmp.ge.s32.totalorder %s10909_s16, 4   ;;  %s12233_s28 = smov %s10396_s1 }
0x5452   : > { %s12234_s1 = smov %s10400_s2  ;;  %s12235_s2 = smov %s10920_s10 }
0x5453   : > { %s12236_s0 = smov %s10909_s16  ;;  %97 = sbr.rel (!%p95_p7) target bundleno = 90 (0x5a), region = 340 }
0x545a   :  { %7784 = vsyncpa [#allocation3], 1 }
0x545b   :  { %7786 = vsyncpa [#allocation3 + $0x1], 1 }
0x545c   :  { %7787 = vsyncpa [#allocation6], 1 }
0x545d   :  { %7788 = vsyncpa [#allocation9], 1 }
0x545e   :  { %7789 = vsyncpa [#allocation12], 1 }
0x545f   :  { %7790 = vsyncpa [#allocation15], 1 }
0x5460   :  { %7791 = vsyncpa [#allocation18], 1 }
0x5461   :  { %7792 = vsyncpa [#allocation21], 1 }
0x5462   :  { %7793 = vsyncpa [#allocation24], 1 }
0x5463   :  { %7794 = vsyncpa [#allocation27], 1 }
0x5464   :  { %7795 = vsyncpa [#allocation4], 1 }
0x5465   :  { %7797 = vsyncpa [#allocation4 + $0x1], 1 }

</bundles_post_ra>
